<compile_context>
chip_gen: v5e
topology: v5e:2x2
jax: 0.10.0
libtpu: 0.0.40
codegen_flags: <defaults>
</compile_context>

<pallas_src>
import math
from functools import partial

import jax
import jax.numpy as jnp
import numpy as np
from jax.experimental import pallas as pl
from jax.experimental.pallas import tpu as pltpu


# ----------------------------------------------------------------------------
# Parameter preparation (plain JAX, outside the kernel; runs under the same jit)
# ----------------------------------------------------------------------------
def interp1d_align_corners(w, k_out):
    """w: (..., k_in) -> (..., k_out), matching F.interpolate bilinear
    align_corners=True applied to a (k,1)/(1,k) depthwise kernel."""
    k_in = w.shape[-1]
    if k_out == k_in:
        return w
    pos = jnp.arange(k_out, dtype=jnp.float32) * ((k_in - 1) / (k_out - 1))
    lo = jnp.clip(jnp.floor(pos).astype(jnp.int32), 0, k_in - 1)
    hi = jnp.clip(lo + 1, 0, k_in - 1)
    frac = pos - lo.astype(jnp.float32)
    return jnp.take(w, lo, axis=-1) * (1.0 - frac) + jnp.take(w, hi, axis=-1) * frac


def prepare_constants(params, C, Cl, Cg, H, W):
    """Build the lane-dense matrices / bias rows consumed by the fused kernel."""
    f32 = jnp.float32
    bf16 = jnp.bfloat16
    hi = jax.lax.Precision.HIGHEST
    WC = W * C
    eyeC = jnp.eye(C, dtype=f32)
    eyeW = jnp.eye(W, dtype=f32)

    w0r = params['w0'][:, 0].astype(f32)                      # (C, 3, 3)
    b0 = params['b0'].astype(f32)
    wlh = params['wlh'][:, 0, :, 0].astype(f32)               # (Cl, 5)
    wlw = params['wlw'][:, 0, 0, :].astype(f32)               # (Cl, 5)
    wgh = interp1d_align_corners(params['wgh'][:, 0, :, 0].astype(f32), 2 * H - 1)
    wgw = interp1d_align_corners(params['wgw'][:, 0, 0, :].astype(f32), 2 * W - 1)
    blh, blw = params['blh'].astype(f32), params['blw'].astype(f32)
    bgh, bgw = params['bgh'].astype(f32), params['bgw'].astype(f32)
    w1 = params['w1'][:, :, 0, 0].astype(f32)                 # (C, C) [out, in]
    b1 = params['b1'].astype(f32)
    wp1 = params['wp1'][:, :, 0, 0].astype(f32)
    bp1 = params['bp1'].astype(f32)
    wp2 = params['wp2'][:, :, 0, 0].astype(f32)
    bp2 = params['bp2'].astype(f32)

    def conv_matrix(taps, size, pad):
        # taps: (G, K) -> M (G, size_in, size_out); M[g, si, so] = taps[g, si-so+pad]
        # (zero outside the tap range) == 1-D cross-correlation with zero padding.
        k = taps.shape[1]
        t = jnp.arange(size)[:, None] - jnp.arange(size)[None, :] + pad
        valid = ((t >= 0) & (t < k)).astype(f32)
        return taps[:, jnp.clip(t, 0, k - 1)] * valid[None]

    def lane_tile(vec_c):                                     # (C,) -> (1, W*C)
        return jnp.tile(vec_c, W)[None, :]

    def blockdiag_1x1(wmat):                                  # (Cout, Cin) -> (W*Cin, W*Cout)
        return jnp.einsum('ab,oc->acbo', eyeW, wmat).reshape(WC, WC)

    # conv0 W-taps (one lane-block per H-tap i), FUSED with proj_1 (shared LHS x):
    # N1[(w',c'), (i,w,c)] = delta_{c,c'} * w0[c, i, w'-w+1]
    M0 = jnp.stack([conv_matrix(w0r[:, i, :], W, 1) for i in range(3)])   # (3, C, W, W)
    N1 = jnp.einsum('icab,dc->adibc', M0, eyeC).reshape(WC, 3 * WC)
    P1 = blockdiag_1x1(wp1)
    N1P1 = jnp.concatenate([N1, P1], axis=1).astype(bf16)                 # (WC, 4*WC)

    # H-direction depthwise conv (local 5-tap / global (2H-1)-tap), channel
    # split respected, with the conv0 H-tap shift i folded in:
    # GH3[i, h_in, h_out, (w,c)] = KH[c, h_in - i + 1, h_out]  (0 if clipped)
    KH = jnp.concatenate([conv_matrix(wlh, H, 2),
                          conv_matrix(wgh, H, H - 1)], axis=0)            # (C, H, H)
    shifted = []
    for i in range(3):
        hpp = jnp.arange(H) - i + 1
        valid = ((hpp >= 0) & (hpp < H)).astype(f32)
        shifted.append(KH[:, jnp.clip(hpp, 0, H - 1), :] * valid[None, :, None])
    KHext = jnp.stack(shifted)                                            # (3, C, H, H)
    GH3 = jnp.tile(KHext.transpose(0, 2, 3, 1)[:, :, :, None, :],
                   (1, 1, 1, W, 1)).reshape(3, H, H, WC).astype(bf16)

    # Bias reaching the H-conv output: b_h[c] + b0[c] * sum_h_in KH[c, h_in, h_out]
    bh_vec = jnp.concatenate([blh, bgh])
    bhz_hc = bh_vec[None, :] + b0[None, :] * KH.sum(axis=1).T             # (H, C)
    BHZ = jnp.tile(bhz_hc[:, None, :], (1, W, 1)).reshape(H, WC)          # f32

    # W-direction depthwise conv folded with conv1 (1x1).
    KW = jnp.concatenate([conv_matrix(wlw, W, 2),
                          conv_matrix(wgw, W, W - 1)], axis=0)            # (C, W, W)
    AW = jnp.einsum('cab,dc->adbc', KW, eyeC).reshape(WC, WC)
    W1S = blockdiag_1x1(w1)
    MW = jnp.dot(AW, W1S, precision=hi).astype(bf16)
    bw_vec = jnp.concatenate([blw, bgw])
    bW = jnp.dot(lane_tile(bw_vec), W1S, precision=hi) + lane_tile(b1)    # (1, WC) f32

    P2 = blockdiag_1x1(wp2).astype(bf16)
    return (N1P1, GH3, BHZ, MW, bW, lane_tile(bp1), P2, lane_tile(bp2))


# ----------------------------------------------------------------------------
# Fused kernel: entire Attention forward for Bt images per grid step.
# ----------------------------------------------------------------------------
def _gelu_exact(x):
    # GELU(x) = 0.5 x (1 + erf(x/sqrt(2))); erf via Abramowitz & Stegun 7.1.26
    # (|err| < 1.5e-7).  Divide and exp are routed to the EUP slot.
    a1, a2, a3, a4, a5 = (0.254829592, -0.284496736, 1.421413741,
                          -1.453152027, 1.061405429)
    p = 0.3275911
    z = x * (1.0 / math.sqrt(2.0))
    s = jnp.where(z >= 0.0, 1.0, -1.0)
    az = jnp.abs(z)
    t = pl.reciprocal(1.0 + p * az, approx=True)
    poly = ((((a5 * t + a4) * t + a3) * t + a2) * t + a1) * t
    erf = s * (1.0 - poly * jnp.exp(-az * az))
    return 0.5 * x * (1.0 + erf)


def _attention_kernel(x_ref, n1p1_ref, gh_ref, bhz_ref, mw_ref, bw_ref,
                      bp1_ref, p2_ref, bp2_ref, out_ref):
    f32 = jnp.float32
    bf16 = jnp.bfloat16
    Bt, H, WC = x_ref.shape

    x = x_ref[...].reshape(Bt * H, WC)                        # (M, WC), M = Bt*H
    xb = x.astype(bf16)

    # conv0 W-taps (3 lane-blocks) + proj_1: ONE bf16 MXU matmul, f32 accumulate.
    vg = jnp.dot(xb, n1p1_ref[...], preferred_element_type=f32)   # (M, 4*WC)

    # proj_1 branch -> exact-form GELU (kept f32 on the VPU/EUP).
    g = _gelu_exact(vg[:, 3 * WC:] + bp1_ref[...])                # (M, WC)

    # conv0 H-taps + {local | global} depthwise H-conv: streamed broadcast-FMA
    # over h_in (only z + one gh row live; no (H,H,WC) intermediate).
    v3 = vg[:, :3 * WC].reshape(Bt, H, 3 * WC)
    z = jnp.zeros((Bt, H, WC), f32) + bhz_ref[...]                # (Bt, H, WC)
    for i in range(3):
        base = i * WC
        for hin in range(H):
            u = v3[:, hin:hin + 1, base:base + WC]                # (Bt, 1, WC)
            z = z + u * gh_ref[i, hin].astype(f32)[None]          # (Bt, H, WC)

    # {local | global} depthwise W-conv folded with conv1 (1x1): one bf16 matmul.
    zb = z.reshape(Bt * H, WC).astype(bf16)
    attn = jnp.dot(zb, mw_ref[...], preferred_element_type=f32) + bw_ref[...]

    # gate -> proj_2 -> residual.
    h = (g * attn).astype(bf16)
    y = jnp.dot(h, p2_ref[...], preferred_element_type=f32) + bp2_ref[...] + x
    out_ref[...] = y.reshape(Bt, H, WC).astype(out_ref.dtype)


def _full_spec(shape):
    zeros = (0,) * len(shape)
    return pl.BlockSpec(shape, lambda *_: zeros)


def _pick_block_batch(N, H):
    # Largest divisor of N whose Bt*H matmul M-dim stays <= 512 rows: amortizes
    # constant loads / MXU fill-drain while keeping the activation block small.
    bt = 1
    for d in range(1, N + 1):
        if N % d == 0 and d * H <= 512:
            bt = d
    return bt


def attention_fused(x_slab, consts):
    N, H, WC = x_slab.shape
    bt = _pick_block_batch(N, H)
    grid_spec = pltpu.PrefetchScalarGridSpec(
        num_scalar_prefetch=0,
        grid=(N // bt,),
        in_specs=[pl.BlockSpec((bt, H, WC), lambda n: (n, 0, 0))]
                 + [_full_spec(c.shape) for c in consts],
        out_specs=pl.BlockSpec((bt, H, WC), lambda n: (n, 0, 0)),
    )
    return pl.pallas_call(
        _attention_kernel,
        out_shape=jax.ShapeDtypeStruct((N, H, WC), jnp.float32),
        grid_spec=grid_spec,
        compiler_params=pltpu.CompilerParams(
            dimension_semantics=("parallel",)),
    )(x_slab, *consts)


# ----------------------------------------------------------------------------
# Full forward (host glue). x is NCHW like the PyTorch module.
# ----------------------------------------------------------------------------
@partial(jax.jit, static_argnames=("ratio",))
def attention_forward(x_nchw, params, ratio=0.5):
    N, C, H, W = x_nchw.shape
    Cg = round(ratio * C)
    Cl = C - Cg
    # TODO(synk): local-only / global-only LKC variants (ratio 0 or 1) not wired up.
    assert Cl > 0 and Cg > 0

    # NOTE: if the surrounding network carries NHWC/slab layout these two
    # transposes (the op's main extra HBM traffic) can be dropped.
    x_nhwc = jnp.transpose(x_nchw, (0, 2, 3, 1)).astype(jnp.float32)
    x_slab = x_nhwc.reshape(N, H, W * C)                      # lanes = (w, c)

    consts = prepare_constants(params, C, Cl, Cg, H, W)
    out_slab = attention_fused(x_slab, consts)
    return jnp.transpose(out_slab.reshape(N, H, W, C), (0, 3, 1, 2))  # back to NCHW


# ----------------------------------------------------------------------------
# Pure-JAX reference (NCHW, lax.conv), mirroring the PyTorch module exactly.
# ----------------------------------------------------------------------------
def _ref_depthwise(x, w, b, pad):
    out = jax.lax.conv_general_dilated(
        x, w, window_strides=(1, 1),
        padding=((pad[0], pad[0]), (pad[1], pad[1])),
        dimension_numbers=('NCHW', 'OIHW', 'NCHW'),
        feature_group_count=x.shape[1],
        precision=jax.lax.Precision.HIGHEST)
    return out + b[None, :, None, None]


def _ref_pointwise(x, w, b):
    out = jnp.einsum('oc,nchw->nohw', w, x, precision=jax.lax.Precision.HIGHEST)
    return out + b[None, :, None, None]


def attention_reference(x, params, ratio=0.5):
    N, C, H, W = x.shape
    Cg = round(ratio * C)
    Cl = C - Cg
    attn0 = _ref_depthwise(x, params['w0'], params['b0'], (1, 1))
    la0, ga0 = attn0[:, :Cl], attn0[:, Cl:]
    la = _ref_depthwise(la0, params['wlh'], params['blh'], (2, 0))
    la = _ref_depthwise(la, params['wlw'], params['blw'], (0, 2))
    wgh_i = interp1d_align_corners(params['wgh'][:, 0, :, 0], 2 * H - 1)
    wgw_i = interp1d_align_corners(params['wgw'][:, 0, 0, :], 2 * W - 1)
    ga = _ref_depthwise(ga0, wgh_i[:, None, :, None], params['bgh'], (H - 1, 0))
    ga = _ref_depthwise(ga, wgw_i[:, None, None, :], params['bgw'], (0, W - 1))
    attn = jnp.concatenate([la, ga], axis=1)
    attn = _ref_pointwise(attn, params['w1'][:, :, 0, 0], params['b1'])
    h = _ref_pointwise(x, params['wp1'][:, :, 0, 0], params['bp1'])
    h = jax.nn.gelu(h, approximate=False) * attn
    y = _ref_pointwise(h, params['wp2'][:, :, 0, 0], params['bp2'])
    return y + x


if __name__ == "__main__":
    d_model, H, W, N = 16, 16, 16, 2
    kernel_size = 7
    ratio = 0.5
    Cg = round(ratio * d_model)
    Cl = d_model - Cg

    key = jax.random.PRNGKey(0)
    keys = jax.random.split(key, 17)

    def nrm(k, shape, scale=0.2):
        return scale * jax.random.normal(k, shape, dtype=jnp.float32)

    params = {
        'w0': nrm(keys[0], (d_model, 1, 3, 3)),        'b0': nrm(keys[1], (d_model,), 0.1),
        'wlh': nrm(keys[2], (Cl, 1, 5, 1)),            'blh': nrm(keys[3], (Cl,), 0.1),
        'wlw': nrm(keys[4], (Cl, 1, 1, 5)),            'blw': nrm(keys[5], (Cl,), 0.1),
        'wgh': nrm(keys[6], (Cg, 1, kernel_size, 1)),  'bgh': nrm(keys[7], (Cg,), 0.1),
        'wgw': nrm(keys[8], (Cg, 1, 1, kernel_size)),  'bgw': nrm(keys[9], (Cg,), 0.1),
        'w1': nrm(keys[10], (d_model, d_model, 1, 1)), 'b1': nrm(keys[11], (d_model,), 0.1),
        'wp1': nrm(keys[12], (d_model, d_model, 1, 1)), 'bp1': nrm(keys[13], (d_model,), 0.1),
        'wp2': nrm(keys[14], (d_model, d_model, 1, 1)), 'bp2': nrm(keys[15], (d_model,), 0.1),
    }
    x = jax.random.normal(keys[16], (N, d_model, H, W), dtype=jnp.float32)

    out = attention_forward(x, params, ratio=ratio)
    out = jax.block_until_ready(out)

    ref = jax.block_until_ready(attention_reference(x, params, ratio=ratio))
    np.testing.assert_allclose(np.asarray(out), np.asarray(ref), rtol=1e-2, atol=1e-2)

    print("KERNEL_OK")
</pallas_src>

<mosaic_0001>
module attributes {stable_mosaic.version = 11 : i64} {
  func.func @_attention_kernel(%arg0: i32, %arg1: memref<2x16x256xf32, #tpu.memory_space<vmem>>, %arg2: memref<256x1024xbf16, #tpu.memory_space<vmem>>, %arg3: memref<3x16x16x256xbf16, #tpu.memory_space<vmem>>, %arg4: memref<16x256xf32, #tpu.memory_space<vmem>>, %arg5: memref<256x256xbf16, #tpu.memory_space<vmem>>, %arg6: memref<1x256xf32, #tpu.memory_space<vmem>>, %arg7: memref<1x256xf32, #tpu.memory_space<vmem>>, %arg8: memref<256x256xbf16, #tpu.memory_space<vmem>>, %arg9: memref<1x256xf32, #tpu.memory_space<vmem>>, %arg10: memref<2x16x256xf32, #tpu.memory_space<vmem>>) attributes {dimension_semantics = [#tpu.dimension_semantics<parallel>], iteration_bounds = array<i64: 1>, scalar_prefetch = 0 : i64, scratch_operands = 0 : i64, tpu.core_type = #tpu.core_type<tc>, window_params = [{transform_indices = @transform_0, window_bounds = array<i64: 2, 16, 256>}, {pipeline_mode = #tpu.pipeline_mode<synchronous>, transform_indices = @transform_1, window_bounds = array<i64: 256, 1024>}, {pipeline_mode = #tpu.pipeline_mode<synchronous>, transform_indices = @transform_2, window_bounds = array<i64: 3, 16, 16, 256>}, {pipeline_mode = #tpu.pipeline_mode<synchronous>, transform_indices = @transform_3, window_bounds = array<i64: 16, 256>}, {pipeline_mode = #tpu.pipeline_mode<synchronous>, transform_indices = @transform_4, window_bounds = array<i64: 256, 256>}, {pipeline_mode = #tpu.pipeline_mode<synchronous>, transform_indices = @transform_5, window_bounds = array<i64: 1, 256>}, {pipeline_mode = #tpu.pipeline_mode<synchronous>, transform_indices = @transform_6, window_bounds = array<i64: 1, 256>}, {pipeline_mode = #tpu.pipeline_mode<synchronous>, transform_indices = @transform_7, window_bounds = array<i64: 256, 256>}, {pipeline_mode = #tpu.pipeline_mode<synchronous>, transform_indices = @transform_8, window_bounds = array<i64: 1, 256>}, {transform_indices = @transform_9, window_bounds = array<i64: 2, 16, 256>}]} {
    %c0 = arith.constant 0 : index
    %c0_0 = arith.constant 0 : index
    %c0_1 = arith.constant 0 : index
    %0 = vector.load %arg1[%c0, %c0_0, %c0_1] : memref<2x16x256xf32, #tpu.memory_space<vmem>>, vector<2x16x256xf32>
    %1 = vector.shape_cast %0 : vector<2x16x256xf32> to vector<32x256xf32>
    %2 = arith.truncf %1 : vector<32x256xf32> to vector<32x256xbf16>
    %c0_2 = arith.constant 0 : index
    %c0_3 = arith.constant 0 : index
    %3 = vector.load %arg2[%c0_2, %c0_3] : memref<256x1024xbf16, #tpu.memory_space<vmem>>, vector<256x1024xbf16>
    %cst = arith.constant dense<0.000000e+00> : vector<32x1024xf32>
    %4 = tpu.matmul %2, %3, %cst {dimension_numbers = #tpu.dot_dimension_numbers<[1], [0], [0], [1], [0, 0, 1, 1], [], []>} : vector<32x256xbf16>, vector<256x1024xbf16>, vector<32x1024xf32> -> vector<32x1024xf32>
    %5 = vector.extract_strided_slice %4 {offsets = [0, 768], sizes = [32, 256], strides = [1, 1]} : vector<32x1024xf32> to vector<32x256xf32>
    %c0_4 = arith.constant 0 : index
    %c0_5 = arith.constant 0 : index
    %6 = vector.load %arg7[%c0_4, %c0_5] : memref<1x256xf32, #tpu.memory_space<vmem>>, vector<1x256xf32>
    %7 = vector.broadcast %6 : vector<1x256xf32> to vector<32x256xf32>
    %8 = arith.addf %5, %7 : vector<32x256xf32>
    %cst_6 = arith.constant 0.707106769 : f32
    %9 = vector.broadcast %cst_6 : f32 to vector<32x256xf32>
    %10 = arith.mulf %8, %9 : vector<32x256xf32>
    %cst_7 = arith.constant 0.000000e+00 : f32
    %11 = vector.broadcast %cst_7 : f32 to vector<32x256xf32>
    %12 = arith.cmpf oge, %10, %11 : vector<32x256xf32>
    %cst_8 = arith.constant 1.000000e+00 : f32
    %cst_9 = arith.constant -1.000000e+00 : f32
    %13 = vector.broadcast %cst_8 : f32 to vector<32x256xf32>
    %14 = vector.broadcast %cst_9 : f32 to vector<32x256xf32>
    %15 = arith.select %12, %13, %14 : vector<32x256xi1>, vector<32x256xf32>
    %16 = math.absf %10 : vector<32x256xf32>
    %cst_10 = arith.constant 0.327591091 : f32
    %17 = vector.broadcast %cst_10 : f32 to vector<32x256xf32>
    %18 = arith.mulf %17, %16 : vector<32x256xf32>
    %cst_11 = arith.constant 1.000000e+00 : f32
    %19 = vector.broadcast %cst_11 : f32 to vector<32x256xf32>
    %20 = arith.addf %19, %18 : vector<32x256xf32>
    %21 = tpu.reciprocal %20 {approx = true} : vector<32x256xf32> -> vector<32x256xf32>
    %cst_12 = arith.constant 1.06140542 : f32
    %22 = vector.broadcast %cst_12 : f32 to vector<32x256xf32>
    %23 = arith.mulf %22, %21 : vector<32x256xf32>
    %cst_13 = arith.constant -1.45315206 : f32
    %24 = vector.broadcast %cst_13 : f32 to vector<32x256xf32>
    %25 = arith.addf %23, %24 : vector<32x256xf32>
    %26 = arith.mulf %25, %21 : vector<32x256xf32>
    %cst_14 = arith.constant 1.42141378 : f32
    %27 = vector.broadcast %cst_14 : f32 to vector<32x256xf32>
    %28 = arith.addf %26, %27 : vector<32x256xf32>
    %29 = arith.mulf %28, %21 : vector<32x256xf32>
    %cst_15 = arith.constant -0.284496725 : f32
    %30 = vector.broadcast %cst_15 : f32 to vector<32x256xf32>
    %31 = arith.addf %29, %30 : vector<32x256xf32>
    %32 = arith.mulf %31, %21 : vector<32x256xf32>
    %cst_16 = arith.constant 0.254829586 : f32
    %33 = vector.broadcast %cst_16 : f32 to vector<32x256xf32>
    %34 = arith.addf %32, %33 : vector<32x256xf32>
    %35 = arith.mulf %34, %21 : vector<32x256xf32>
    %cst_17 = arith.constant 0.000000e+00 : f32
    %36 = vector.broadcast %cst_17 : f32 to vector<32x256xf32>
    %37 = arith.subf %36, %16 : vector<32x256xf32>
    %38 = arith.mulf %37, %16 : vector<32x256xf32>
    %39 = math.exp %38 : vector<32x256xf32>
    %40 = arith.mulf %35, %39 : vector<32x256xf32>
    %cst_18 = arith.constant 1.000000e+00 : f32
    %41 = vector.broadcast %cst_18 : f32 to vector<32x256xf32>
    %42 = arith.subf %41, %40 : vector<32x256xf32>
    %43 = arith.mulf %15, %42 : vector<32x256xf32>
    %cst_19 = arith.constant 5.000000e-01 : f32
    %44 = vector.broadcast %cst_19 : f32 to vector<32x256xf32>
    %45 = arith.mulf %44, %8 : vector<32x256xf32>
    %cst_20 = arith.constant 1.000000e+00 : f32
    %46 = vector.broadcast %cst_20 : f32 to vector<32x256xf32>
    %47 = arith.addf %46, %43 : vector<32x256xf32>
    %48 = arith.mulf %45, %47 : vector<32x256xf32>
    %49 = vector.extract_strided_slice %4 {offsets = [0, 0], sizes = [32, 768], strides = [1, 1]} : vector<32x1024xf32> to vector<32x768xf32>
    %50 = vector.shape_cast %49 : vector<32x768xf32> to vector<2x16x768xf32>
    %cst_21 = arith.constant 0.000000e+00 : f32
    %51 = vector.broadcast %cst_21 : f32 to vector<2x16x256xf32>
    %c0_22 = arith.constant 0 : index
    %c0_23 = arith.constant 0 : index
    %52 = vector.load %arg4[%c0_22, %c0_23] : memref<16x256xf32, #tpu.memory_space<vmem>>, vector<16x256xf32>
    %53 = vector.shape_cast %52 : vector<16x256xf32> to vector<1x16x256xf32>
    %54 = vector.broadcast %53 : vector<1x16x256xf32> to vector<2x16x256xf32>
    %55 = arith.addf %51, %54 : vector<2x16x256xf32>
    %56 = vector.extract_strided_slice %50 {offsets = [0, 0, 0], sizes = [2, 1, 256], strides = [1, 1, 1]} : vector<2x16x768xf32> to vector<2x1x256xf32>
    %c0_24 = arith.constant 0 : index
    %c0_25 = arith.constant 0 : index
    %c0_26 = arith.constant 0 : index
    %c0_27 = arith.constant 0 : index
    %57 = vector.load %arg3[%c0_24, %c0_25, %c0_26, %c0_27] : memref<3x16x16x256xbf16, #tpu.memory_space<vmem>>, vector<1x1x16x256xbf16>
    %58 = vector.shape_cast %57 : vector<1x1x16x256xbf16> to vector<16x256xbf16>
    %59 = arith.extf %58 : vector<16x256xbf16> to vector<16x256xf32>
    %60 = vector.shape_cast %59 : vector<16x256xf32> to vector<1x16x256xf32>
    %61 = vector.broadcast %56 : vector<2x1x256xf32> to vector<2x16x256xf32>
    %62 = vector.broadcast %60 : vector<1x16x256xf32> to vector<2x16x256xf32>
    %63 = arith.mulf %61, %62 : vector<2x16x256xf32>
    %64 = arith.addf %55, %63 : vector<2x16x256xf32>
    %65 = vector.extract_strided_slice %50 {offsets = [0, 1, 0], sizes = [2, 1, 256], strides = [1, 1, 1]} : vector<2x16x768xf32> to vector<2x1x256xf32>
    %c0_28 = arith.constant 0 : index
    %c1 = arith.constant 1 : index
    %c0_29 = arith.constant 0 : index
    %c0_30 = arith.constant 0 : index
    %66 = vector.load %arg3[%c0_28, %c1, %c0_29, %c0_30] : memref<3x16x16x256xbf16, #tpu.memory_space<vmem>>, vector<1x1x16x256xbf16>
    %67 = vector.shape_cast %66 : vector<1x1x16x256xbf16> to vector<16x256xbf16>
    %68 = arith.extf %67 : vector<16x256xbf16> to vector<16x256xf32>
    %69 = vector.shape_cast %68 : vector<16x256xf32> to vector<1x16x256xf32>
    %70 = vector.broadcast %65 : vector<2x1x256xf32> to vector<2x16x256xf32>
    %71 = vector.broadcast %69 : vector<1x16x256xf32> to vector<2x16x256xf32>
    %72 = arith.mulf %70, %71 : vector<2x16x256xf32>
    %73 = arith.addf %64, %72 : vector<2x16x256xf32>
    %74 = vector.extract_strided_slice %50 {offsets = [0, 2, 0], sizes = [2, 1, 256], strides = [1, 1, 1]} : vector<2x16x768xf32> to vector<2x1x256xf32>
    %c0_31 = arith.constant 0 : index
    %c2 = arith.constant 2 : index
    %c0_32 = arith.constant 0 : index
    %c0_33 = arith.constant 0 : index
    %75 = vector.load %arg3[%c0_31, %c2, %c0_32, %c0_33] : memref<3x16x16x256xbf16, #tpu.memory_space<vmem>>, vector<1x1x16x256xbf16>
    %76 = vector.shape_cast %75 : vector<1x1x16x256xbf16> to vector<16x256xbf16>
    %77 = arith.extf %76 : vector<16x256xbf16> to vector<16x256xf32>
    %78 = vector.shape_cast %77 : vector<16x256xf32> to vector<1x16x256xf32>
    %79 = vector.broadcast %74 : vector<2x1x256xf32> to vector<2x16x256xf32>
    %80 = vector.broadcast %78 : vector<1x16x256xf32> to vector<2x16x256xf32>
    %81 = arith.mulf %79, %80 : vector<2x16x256xf32>
    %82 = arith.addf %73, %81 : vector<2x16x256xf32>
    %83 = vector.extract_strided_slice %50 {offsets = [0, 3, 0], sizes = [2, 1, 256], strides = [1, 1, 1]} : vector<2x16x768xf32> to vector<2x1x256xf32>
    %c0_34 = arith.constant 0 : index
    %c3 = arith.constant 3 : index
    %c0_35 = arith.constant 0 : index
    %c0_36 = arith.constant 0 : index
    %84 = vector.load %arg3[%c0_34, %c3, %c0_35, %c0_36] : memref<3x16x16x256xbf16, #tpu.memory_space<vmem>>, vector<1x1x16x256xbf16>
    %85 = vector.shape_cast %84 : vector<1x1x16x256xbf16> to vector<16x256xbf16>
    %86 = arith.extf %85 : vector<16x256xbf16> to vector<16x256xf32>
    %87 = vector.shape_cast %86 : vector<16x256xf32> to vector<1x16x256xf32>
    %88 = vector.broadcast %83 : vector<2x1x256xf32> to vector<2x16x256xf32>
    %89 = vector.broadcast %87 : vector<1x16x256xf32> to vector<2x16x256xf32>
    %90 = arith.mulf %88, %89 : vector<2x16x256xf32>
    %91 = arith.addf %82, %90 : vector<2x16x256xf32>
    %92 = vector.extract_strided_slice %50 {offsets = [0, 4, 0], sizes = [2, 1, 256], strides = [1, 1, 1]} : vector<2x16x768xf32> to vector<2x1x256xf32>
    %c0_37 = arith.constant 0 : index
    %c4 = arith.constant 4 : index
    %c0_38 = arith.constant 0 : index
    %c0_39 = arith.constant 0 : index
    %93 = vector.load %arg3[%c0_37, %c4, %c0_38, %c0_39] : memref<3x16x16x256xbf16, #tpu.memory_space<vmem>>, vector<1x1x16x256xbf16>
    %94 = vector.shape_cast %93 : vector<1x1x16x256xbf16> to vector<16x256xbf16>
    %95 = arith.extf %94 : vector<16x256xbf16> to vector<16x256xf32>
    %96 = vector.shape_cast %95 : vector<16x256xf32> to vector<1x16x256xf32>
    %97 = vector.broadcast %92 : vector<2x1x256xf32> to vector<2x16x256xf32>
    %98 = vector.broadcast %96 : vector<1x16x256xf32> to vector<2x16x256xf32>
    %99 = arith.mulf %97, %98 : vector<2x16x256xf32>
    %100 = arith.addf %91, %99 : vector<2x16x256xf32>
    %101 = vector.extract_strided_slice %50 {offsets = [0, 5, 0], sizes = [2, 1, 256], strides = [1, 1, 1]} : vector<2x16x768xf32> to vector<2x1x256xf32>
    %c0_40 = arith.constant 0 : index
    %c5 = arith.constant 5 : index
    %c0_41 = arith.constant 0 : index
    %c0_42 = arith.constant 0 : index
    %102 = vector.load %arg3[%c0_40, %c5, %c0_41, %c0_42] : memref<3x16x16x256xbf16, #tpu.memory_space<vmem>>, vector<1x1x16x256xbf16>
    %103 = vector.shape_cast %102 : vector<1x1x16x256xbf16> to vector<16x256xbf16>
    %104 = arith.extf %103 : vector<16x256xbf16> to vector<16x256xf32>
    %105 = vector.shape_cast %104 : vector<16x256xf32> to vector<1x16x256xf32>
    %106 = vector.broadcast %101 : vector<2x1x256xf32> to vector<2x16x256xf32>
    %107 = vector.broadcast %105 : vector<1x16x256xf32> to vector<2x16x256xf32>
    %108 = arith.mulf %106, %107 : vector<2x16x256xf32>
    %109 = arith.addf %100, %108 : vector<2x16x256xf32>
    %110 = vector.extract_strided_slice %50 {offsets = [0, 6, 0], sizes = [2, 1, 256], strides = [1, 1, 1]} : vector<2x16x768xf32> to vector<2x1x256xf32>
    %c0_43 = arith.constant 0 : index
    %c6 = arith.constant 6 : index
    %c0_44 = arith.constant 0 : index
    %c0_45 = arith.constant 0 : index
    %111 = vector.load %arg3[%c0_43, %c6, %c0_44, %c0_45] : memref<3x16x16x256xbf16, #tpu.memory_space<vmem>>, vector<1x1x16x256xbf16>
    %112 = vector.shape_cast %111 : vector<1x1x16x256xbf16> to vector<16x256xbf16>
    %113 = arith.extf %112 : vector<16x256xbf16> to vector<16x256xf32>
    %114 = vector.shape_cast %113 : vector<16x256xf32> to vector<1x16x256xf32>
    %115 = vector.broadcast %110 : vector<2x1x256xf32> to vector<2x16x256xf32>
    %116 = vector.broadcast %114 : vector<1x16x256xf32> to vector<2x16x256xf32>
    %117 = arith.mulf %115, %116 : vector<2x16x256xf32>
    %118 = arith.addf %109, %117 : vector<2x16x256xf32>
    %119 = vector.extract_strided_slice %50 {offsets = [0, 7, 0], sizes = [2, 1, 256], strides = [1, 1, 1]} : vector<2x16x768xf32> to vector<2x1x256xf32>
    %c0_46 = arith.constant 0 : index
    %c7 = arith.constant 7 : index
    %c0_47 = arith.constant 0 : index
    %c0_48 = arith.constant 0 : index
    %120 = vector.load %arg3[%c0_46, %c7, %c0_47, %c0_48] : memref<3x16x16x256xbf16, #tpu.memory_space<vmem>>, vector<1x1x16x256xbf16>
    %121 = vector.shape_cast %120 : vector<1x1x16x256xbf16> to vector<16x256xbf16>
    %122 = arith.extf %121 : vector<16x256xbf16> to vector<16x256xf32>
    %123 = vector.shape_cast %122 : vector<16x256xf32> to vector<1x16x256xf32>
    %124 = vector.broadcast %119 : vector<2x1x256xf32> to vector<2x16x256xf32>
    %125 = vector.broadcast %123 : vector<1x16x256xf32> to vector<2x16x256xf32>
    %126 = arith.mulf %124, %125 : vector<2x16x256xf32>
    %127 = arith.addf %118, %126 : vector<2x16x256xf32>
    %128 = vector.extract_strided_slice %50 {offsets = [0, 8, 0], sizes = [2, 1, 256], strides = [1, 1, 1]} : vector<2x16x768xf32> to vector<2x1x256xf32>
    %c0_49 = arith.constant 0 : index
    %c8 = arith.constant 8 : index
    %c0_50 = arith.constant 0 : index
    %c0_51 = arith.constant 0 : index
    %129 = vector.load %arg3[%c0_49, %c8, %c0_50, %c0_51] : memref<3x16x16x256xbf16, #tpu.memory_space<vmem>>, vector<1x1x16x256xbf16>
    %130 = vector.shape_cast %129 : vector<1x1x16x256xbf16> to vector<16x256xbf16>
    %131 = arith.extf %130 : vector<16x256xbf16> to vector<16x256xf32>
    %132 = vector.shape_cast %131 : vector<16x256xf32> to vector<1x16x256xf32>
    %133 = vector.broadcast %128 : vector<2x1x256xf32> to vector<2x16x256xf32>
    %134 = vector.broadcast %132 : vector<1x16x256xf32> to vector<2x16x256xf32>
    %135 = arith.mulf %133, %134 : vector<2x16x256xf32>
    %136 = arith.addf %127, %135 : vector<2x16x256xf32>
    %137 = vector.extract_strided_slice %50 {offsets = [0, 9, 0], sizes = [2, 1, 256], strides = [1, 1, 1]} : vector<2x16x768xf32> to vector<2x1x256xf32>
    %c0_52 = arith.constant 0 : index
    %c9 = arith.constant 9 : index
    %c0_53 = arith.constant 0 : index
    %c0_54 = arith.constant 0 : index
    %138 = vector.load %arg3[%c0_52, %c9, %c0_53, %c0_54] : memref<3x16x16x256xbf16, #tpu.memory_space<vmem>>, vector<1x1x16x256xbf16>
    %139 = vector.shape_cast %138 : vector<1x1x16x256xbf16> to vector<16x256xbf16>
    %140 = arith.extf %139 : vector<16x256xbf16> to vector<16x256xf32>
    %141 = vector.shape_cast %140 : vector<16x256xf32> to vector<1x16x256xf32>
    %142 = vector.broadcast %137 : vector<2x1x256xf32> to vector<2x16x256xf32>
    %143 = vector.broadcast %141 : vector<1x16x256xf32> to vector<2x16x256xf32>
    %144 = arith.mulf %142, %143 : vector<2x16x256xf32>
    %145 = arith.addf %136, %144 : vector<2x16x256xf32>
    %146 = vector.extract_strided_slice %50 {offsets = [0, 10, 0], sizes = [2, 1, 256], strides = [1, 1, 1]} : vector<2x16x768xf32> to vector<2x1x256xf32>
    %c0_55 = arith.constant 0 : index
    %c10 = arith.constant 10 : index
    %c0_56 = arith.constant 0 : index
    %c0_57 = arith.constant 0 : index
    %147 = vector.load %arg3[%c0_55, %c10, %c0_56, %c0_57] : memref<3x16x16x256xbf16, #tpu.memory_space<vmem>>, vector<1x1x16x256xbf16>
    %148 = vector.shape_cast %147 : vector<1x1x16x256xbf16> to vector<16x256xbf16>
    %149 = arith.extf %148 : vector<16x256xbf16> to vector<16x256xf32>
    %150 = vector.shape_cast %149 : vector<16x256xf32> to vector<1x16x256xf32>
    %151 = vector.broadcast %146 : vector<2x1x256xf32> to vector<2x16x256xf32>
    %152 = vector.broadcast %150 : vector<1x16x256xf32> to vector<2x16x256xf32>
    %153 = arith.mulf %151, %152 : vector<2x16x256xf32>
    %154 = arith.addf %145, %153 : vector<2x16x256xf32>
    %155 = vector.extract_strided_slice %50 {offsets = [0, 11, 0], sizes = [2, 1, 256], strides = [1, 1, 1]} : vector<2x16x768xf32> to vector<2x1x256xf32>
    %c0_58 = arith.constant 0 : index
    %c11 = arith.constant 11 : index
    %c0_59 = arith.constant 0 : index
    %c0_60 = arith.constant 0 : index
    %156 = vector.load %arg3[%c0_58, %c11, %c0_59, %c0_60] : memref<3x16x16x256xbf16, #tpu.memory_space<vmem>>, vector<1x1x16x256xbf16>
    %157 = vector.shape_cast %156 : vector<1x1x16x256xbf16> to vector<16x256xbf16>
    %158 = arith.extf %157 : vector<16x256xbf16> to vector<16x256xf32>
    %159 = vector.shape_cast %158 : vector<16x256xf32> to vector<1x16x256xf32>
    %160 = vector.broadcast %155 : vector<2x1x256xf32> to vector<2x16x256xf32>
    %161 = vector.broadcast %159 : vector<1x16x256xf32> to vector<2x16x256xf32>
    %162 = arith.mulf %160, %161 : vector<2x16x256xf32>
    %163 = arith.addf %154, %162 : vector<2x16x256xf32>
    %164 = vector.extract_strided_slice %50 {offsets = [0, 12, 0], sizes = [2, 1, 256], strides = [1, 1, 1]} : vector<2x16x768xf32> to vector<2x1x256xf32>
    %c0_61 = arith.constant 0 : index
    %c12 = arith.constant 12 : index
    %c0_62 = arith.constant 0 : index
    %c0_63 = arith.constant 0 : index
    %165 = vector.load %arg3[%c0_61, %c12, %c0_62, %c0_63] : memref<3x16x16x256xbf16, #tpu.memory_space<vmem>>, vector<1x1x16x256xbf16>
    %166 = vector.shape_cast %165 : vector<1x1x16x256xbf16> to vector<16x256xbf16>
    %167 = arith.extf %166 : vector<16x256xbf16> to vector<16x256xf32>
    %168 = vector.shape_cast %167 : vector<16x256xf32> to vector<1x16x256xf32>
    %169 = vector.broadcast %164 : vector<2x1x256xf32> to vector<2x16x256xf32>
    %170 = vector.broadcast %168 : vector<1x16x256xf32> to vector<2x16x256xf32>
    %171 = arith.mulf %169, %170 : vector<2x16x256xf32>
    %172 = arith.addf %163, %171 : vector<2x16x256xf32>
    %173 = vector.extract_strided_slice %50 {offsets = [0, 13, 0], sizes = [2, 1, 256], strides = [1, 1, 1]} : vector<2x16x768xf32> to vector<2x1x256xf32>
    %c0_64 = arith.constant 0 : index
    %c13 = arith.constant 13 : index
    %c0_65 = arith.constant 0 : index
    %c0_66 = arith.constant 0 : index
    %174 = vector.load %arg3[%c0_64, %c13, %c0_65, %c0_66] : memref<3x16x16x256xbf16, #tpu.memory_space<vmem>>, vector<1x1x16x256xbf16>
    %175 = vector.shape_cast %174 : vector<1x1x16x256xbf16> to vector<16x256xbf16>
    %176 = arith.extf %175 : vector<16x256xbf16> to vector<16x256xf32>
    %177 = vector.shape_cast %176 : vector<16x256xf32> to vector<1x16x256xf32>
    %178 = vector.broadcast %173 : vector<2x1x256xf32> to vector<2x16x256xf32>
    %179 = vector.broadcast %177 : vector<1x16x256xf32> to vector<2x16x256xf32>
    %180 = arith.mulf %178, %179 : vector<2x16x256xf32>
    %181 = arith.addf %172, %180 : vector<2x16x256xf32>
    %182 = vector.extract_strided_slice %50 {offsets = [0, 14, 0], sizes = [2, 1, 256], strides = [1, 1, 1]} : vector<2x16x768xf32> to vector<2x1x256xf32>
    %c0_67 = arith.constant 0 : index
    %c14 = arith.constant 14 : index
    %c0_68 = arith.constant 0 : index
    %c0_69 = arith.constant 0 : index
    %183 = vector.load %arg3[%c0_67, %c14, %c0_68, %c0_69] : memref<3x16x16x256xbf16, #tpu.memory_space<vmem>>, vector<1x1x16x256xbf16>
    %184 = vector.shape_cast %183 : vector<1x1x16x256xbf16> to vector<16x256xbf16>
    %185 = arith.extf %184 : vector<16x256xbf16> to vector<16x256xf32>
    %186 = vector.shape_cast %185 : vector<16x256xf32> to vector<1x16x256xf32>
    %187 = vector.broadcast %182 : vector<2x1x256xf32> to vector<2x16x256xf32>
    %188 = vector.broadcast %186 : vector<1x16x256xf32> to vector<2x16x256xf32>
    %189 = arith.mulf %187, %188 : vector<2x16x256xf32>
    %190 = arith.addf %181, %189 : vector<2x16x256xf32>
    %191 = vector.extract_strided_slice %50 {offsets = [0, 15, 0], sizes = [2, 1, 256], strides = [1, 1, 1]} : vector<2x16x768xf32> to vector<2x1x256xf32>
    %c0_70 = arith.constant 0 : index
    %c15 = arith.constant 15 : index
    %c0_71 = arith.constant 0 : index
    %c0_72 = arith.constant 0 : index
    %192 = vector.load %arg3[%c0_70, %c15, %c0_71, %c0_72] : memref<3x16x16x256xbf16, #tpu.memory_space<vmem>>, vector<1x1x16x256xbf16>
    %193 = vector.shape_cast %192 : vector<1x1x16x256xbf16> to vector<16x256xbf16>
    %194 = arith.extf %193 : vector<16x256xbf16> to vector<16x256xf32>
    %195 = vector.shape_cast %194 : vector<16x256xf32> to vector<1x16x256xf32>
    %196 = vector.broadcast %191 : vector<2x1x256xf32> to vector<2x16x256xf32>
    %197 = vector.broadcast %195 : vector<1x16x256xf32> to vector<2x16x256xf32>
    %198 = arith.mulf %196, %197 : vector<2x16x256xf32>
    %199 = arith.addf %190, %198 : vector<2x16x256xf32>
    %200 = vector.extract_strided_slice %50 {offsets = [0, 0, 256], sizes = [2, 1, 256], strides = [1, 1, 1]} : vector<2x16x768xf32> to vector<2x1x256xf32>
    %c1_73 = arith.constant 1 : index
    %c0_74 = arith.constant 0 : index
    %c0_75 = arith.constant 0 : index
    %c0_76 = arith.constant 0 : index
    %201 = vector.load %arg3[%c1_73, %c0_74, %c0_75, %c0_76] : memref<3x16x16x256xbf16, #tpu.memory_space<vmem>>, vector<1x1x16x256xbf16>
    %202 = vector.shape_cast %201 : vector<1x1x16x256xbf16> to vector<16x256xbf16>
    %203 = arith.extf %202 : vector<16x256xbf16> to vector<16x256xf32>
    %204 = vector.shape_cast %203 : vector<16x256xf32> to vector<1x16x256xf32>
    %205 = vector.broadcast %200 : vector<2x1x256xf32> to vector<2x16x256xf32>
    %206 = vector.broadcast %204 : vector<1x16x256xf32> to vector<2x16x256xf32>
    %207 = arith.mulf %205, %206 : vector<2x16x256xf32>
    %208 = arith.addf %199, %207 : vector<2x16x256xf32>
    %209 = vector.extract_strided_slice %50 {offsets = [0, 1, 256], sizes = [2, 1, 256], strides = [1, 1, 1]} : vector<2x16x768xf32> to vector<2x1x256xf32>
    %c1_77 = arith.constant 1 : index
    %c1_78 = arith.constant 1 : index
    %c0_79 = arith.constant 0 : index
    %c0_80 = arith.constant 0 : index
    %210 = vector.load %arg3[%c1_77, %c1_78, %c0_79, %c0_80] : memref<3x16x16x256xbf16, #tpu.memory_space<vmem>>, vector<1x1x16x256xbf16>
    %211 = vector.shape_cast %210 : vector<1x1x16x256xbf16> to vector<16x256xbf16>
    %212 = arith.extf %211 : vector<16x256xbf16> to vector<16x256xf32>
    %213 = vector.shape_cast %212 : vector<16x256xf32> to vector<1x16x256xf32>
    %214 = vector.broadcast %209 : vector<2x1x256xf32> to vector<2x16x256xf32>
    %215 = vector.broadcast %213 : vector<1x16x256xf32> to vector<2x16x256xf32>
    %216 = arith.mulf %214, %215 : vector<2x16x256xf32>
    %217 = arith.addf %208, %216 : vector<2x16x256xf32>
    %218 = vector.extract_strided_slice %50 {offsets = [0, 2, 256], sizes = [2, 1, 256], strides = [1, 1, 1]} : vector<2x16x768xf32> to vector<2x1x256xf32>
    %c1_81 = arith.constant 1 : index
    %c2_82 = arith.constant 2 : index
    %c0_83 = arith.constant 0 : index
    %c0_84 = arith.constant 0 : index
    %219 = vector.load %arg3[%c1_81, %c2_82, %c0_83, %c0_84] : memref<3x16x16x256xbf16, #tpu.memory_space<vmem>>, vector<1x1x16x256xbf16>
    %220 = vector.shape_cast %219 : vector<1x1x16x256xbf16> to vector<16x256xbf16>
    %221 = arith.extf %220 : vector<16x256xbf16> to vector<16x256xf32>
    %222 = vector.shape_cast %221 : vector<16x256xf32> to vector<1x16x256xf32>
    %223 = vector.broadcast %218 : vector<2x1x256xf32> to vector<2x16x256xf32>
    %224 = vector.broadcast %222 : vector<1x16x256xf32> to vector<2x16x256xf32>
    %225 = arith.mulf %223, %224 : vector<2x16x256xf32>
    %226 = arith.addf %217, %225 : vector<2x16x256xf32>
    %227 = vector.extract_strided_slice %50 {offsets = [0, 3, 256], sizes = [2, 1, 256], strides = [1, 1, 1]} : vector<2x16x768xf32> to vector<2x1x256xf32>
    %c1_85 = arith.constant 1 : index
    %c3_86 = arith.constant 3 : index
    %c0_87 = arith.constant 0 : index
    %c0_88 = arith.constant 0 : index
    %228 = vector.load %arg3[%c1_85, %c3_86, %c0_87, %c0_88] : memref<3x16x16x256xbf16, #tpu.memory_space<vmem>>, vector<1x1x16x256xbf16>
    %229 = vector.shape_cast %228 : vector<1x1x16x256xbf16> to vector<16x256xbf16>
    %230 = arith.extf %229 : vector<16x256xbf16> to vector<16x256xf32>
    %231 = vector.shape_cast %230 : vector<16x256xf32> to vector<1x16x256xf32>
    %232 = vector.broadcast %227 : vector<2x1x256xf32> to vector<2x16x256xf32>
    %233 = vector.broadcast %231 : vector<1x16x256xf32> to vector<2x16x256xf32>
    %234 = arith.mulf %232, %233 : vector<2x16x256xf32>
    %235 = arith.addf %226, %234 : vector<2x16x256xf32>
    %236 = vector.extract_strided_slice %50 {offsets = [0, 4, 256], sizes = [2, 1, 256], strides = [1, 1, 1]} : vector<2x16x768xf32> to vector<2x1x256xf32>
    %c1_89 = arith.constant 1 : index
    %c4_90 = arith.constant 4 : index
    %c0_91 = arith.constant 0 : index
    %c0_92 = arith.constant 0 : index
    %237 = vector.load %arg3[%c1_89, %c4_90, %c0_91, %c0_92] : memref<3x16x16x256xbf16, #tpu.memory_space<vmem>>, vector<1x1x16x256xbf16>
    %238 = vector.shape_cast %237 : vector<1x1x16x256xbf16> to vector<16x256xbf16>
    %239 = arith.extf %238 : vector<16x256xbf16> to vector<16x256xf32>
    %240 = vector.shape_cast %239 : vector<16x256xf32> to vector<1x16x256xf32>
    %241 = vector.broadcast %236 : vector<2x1x256xf32> to vector<2x16x256xf32>
    %242 = vector.broadcast %240 : vector<1x16x256xf32> to vector<2x16x256xf32>
    %243 = arith.mulf %241, %242 : vector<2x16x256xf32>
    %244 = arith.addf %235, %243 : vector<2x16x256xf32>
    %245 = vector.extract_strided_slice %50 {offsets = [0, 5, 256], sizes = [2, 1, 256], strides = [1, 1, 1]} : vector<2x16x768xf32> to vector<2x1x256xf32>
    %c1_93 = arith.constant 1 : index
    %c5_94 = arith.constant 5 : index
    %c0_95 = arith.constant 0 : index
    %c0_96 = arith.constant 0 : index
    %246 = vector.load %arg3[%c1_93, %c5_94, %c0_95, %c0_96] : memref<3x16x16x256xbf16, #tpu.memory_space<vmem>>, vector<1x1x16x256xbf16>
    %247 = vector.shape_cast %246 : vector<1x1x16x256xbf16> to vector<16x256xbf16>
    %248 = arith.extf %247 : vector<16x256xbf16> to vector<16x256xf32>
    %249 = vector.shape_cast %248 : vector<16x256xf32> to vector<1x16x256xf32>
    %250 = vector.broadcast %245 : vector<2x1x256xf32> to vector<2x16x256xf32>
    %251 = vector.broadcast %249 : vector<1x16x256xf32> to vector<2x16x256xf32>
    %252 = arith.mulf %250, %251 : vector<2x16x256xf32>
    %253 = arith.addf %244, %252 : vector<2x16x256xf32>
    %254 = vector.extract_strided_slice %50 {offsets = [0, 6, 256], sizes = [2, 1, 256], strides = [1, 1, 1]} : vector<2x16x768xf32> to vector<2x1x256xf32>
    %c1_97 = arith.constant 1 : index
    %c6_98 = arith.constant 6 : index
    %c0_99 = arith.constant 0 : index
    %c0_100 = arith.constant 0 : index
    %255 = vector.load %arg3[%c1_97, %c6_98, %c0_99, %c0_100] : memref<3x16x16x256xbf16, #tpu.memory_space<vmem>>, vector<1x1x16x256xbf16>
    %256 = vector.shape_cast %255 : vector<1x1x16x256xbf16> to vector<16x256xbf16>
    %257 = arith.extf %256 : vector<16x256xbf16> to vector<16x256xf32>
    %258 = vector.shape_cast %257 : vector<16x256xf32> to vector<1x16x256xf32>
    %259 = vector.broadcast %254 : vector<2x1x256xf32> to vector<2x16x256xf32>
    %260 = vector.broadcast %258 : vector<1x16x256xf32> to vector<2x16x256xf32>
    %261 = arith.mulf %259, %260 : vector<2x16x256xf32>
    %262 = arith.addf %253, %261 : vector<2x16x256xf32>
    %263 = vector.extract_strided_slice %50 {offsets = [0, 7, 256], sizes = [2, 1, 256], strides = [1, 1, 1]} : vector<2x16x768xf32> to vector<2x1x256xf32>
    %c1_101 = arith.constant 1 : index
    %c7_102 = arith.constant 7 : index
    %c0_103 = arith.constant 0 : index
    %c0_104 = arith.constant 0 : index
    %264 = vector.load %arg3[%c1_101, %c7_102, %c0_103, %c0_104] : memref<3x16x16x256xbf16, #tpu.memory_space<vmem>>, vector<1x1x16x256xbf16>
    %265 = vector.shape_cast %264 : vector<1x1x16x256xbf16> to vector<16x256xbf16>
    %266 = arith.extf %265 : vector<16x256xbf16> to vector<16x256xf32>
    %267 = vector.shape_cast %266 : vector<16x256xf32> to vector<1x16x256xf32>
    %268 = vector.broadcast %263 : vector<2x1x256xf32> to vector<2x16x256xf32>
    %269 = vector.broadcast %267 : vector<1x16x256xf32> to vector<2x16x256xf32>
    %270 = arith.mulf %268, %269 : vector<2x16x256xf32>
    %271 = arith.addf %262, %270 : vector<2x16x256xf32>
    %272 = vector.extract_strided_slice %50 {offsets = [0, 8, 256], sizes = [2, 1, 256], strides = [1, 1, 1]} : vector<2x16x768xf32> to vector<2x1x256xf32>
    %c1_105 = arith.constant 1 : index
    %c8_106 = arith.constant 8 : index
    %c0_107 = arith.constant 0 : index
    %c0_108 = arith.constant 0 : index
    %273 = vector.load %arg3[%c1_105, %c8_106, %c0_107, %c0_108] : memref<3x16x16x256xbf16, #tpu.memory_space<vmem>>, vector<1x1x16x256xbf16>
    %274 = vector.shape_cast %273 : vector<1x1x16x256xbf16> to vector<16x256xbf16>
    %275 = arith.extf %274 : vector<16x256xbf16> to vector<16x256xf32>
    %276 = vector.shape_cast %275 : vector<16x256xf32> to vector<1x16x256xf32>
    %277 = vector.broadcast %272 : vector<2x1x256xf32> to vector<2x16x256xf32>
    %278 = vector.broadcast %276 : vector<1x16x256xf32> to vector<2x16x256xf32>
    %279 = arith.mulf %277, %278 : vector<2x16x256xf32>
    %280 = arith.addf %271, %279 : vector<2x16x256xf32>
    %281 = vector.extract_strided_slice %50 {offsets = [0, 9, 256], sizes = [2, 1, 256], strides = [1, 1, 1]} : vector<2x16x768xf32> to vector<2x1x256xf32>
    %c1_109 = arith.constant 1 : index
    %c9_110 = arith.constant 9 : index
    %c0_111 = arith.constant 0 : index
    %c0_112 = arith.constant 0 : index
    %282 = vector.load %arg3[%c1_109, %c9_110, %c0_111, %c0_112] : memref<3x16x16x256xbf16, #tpu.memory_space<vmem>>, vector<1x1x16x256xbf16>
    %283 = vector.shape_cast %282 : vector<1x1x16x256xbf16> to vector<16x256xbf16>
    %284 = arith.extf %283 : vector<16x256xbf16> to vector<16x256xf32>
    %285 = vector.shape_cast %284 : vector<16x256xf32> to vector<1x16x256xf32>
    %286 = vector.broadcast %281 : vector<2x1x256xf32> to vector<2x16x256xf32>
    %287 = vector.broadcast %285 : vector<1x16x256xf32> to vector<2x16x256xf32>
    %288 = arith.mulf %286, %287 : vector<2x16x256xf32>
    %289 = arith.addf %280, %288 : vector<2x16x256xf32>
    %290 = vector.extract_strided_slice %50 {offsets = [0, 10, 256], sizes = [2, 1, 256], strides = [1, 1, 1]} : vector<2x16x768xf32> to vector<2x1x256xf32>
    %c1_113 = arith.constant 1 : index
    %c10_114 = arith.constant 10 : index
    %c0_115 = arith.constant 0 : index
    %c0_116 = arith.constant 0 : index
    %291 = vector.load %arg3[%c1_113, %c10_114, %c0_115, %c0_116] : memref<3x16x16x256xbf16, #tpu.memory_space<vmem>>, vector<1x1x16x256xbf16>
    %292 = vector.shape_cast %291 : vector<1x1x16x256xbf16> to vector<16x256xbf16>
    %293 = arith.extf %292 : vector<16x256xbf16> to vector<16x256xf32>
    %294 = vector.shape_cast %293 : vector<16x256xf32> to vector<1x16x256xf32>
    %295 = vector.broadcast %290 : vector<2x1x256xf32> to vector<2x16x256xf32>
    %296 = vector.broadcast %294 : vector<1x16x256xf32> to vector<2x16x256xf32>
    %297 = arith.mulf %295, %296 : vector<2x16x256xf32>
    %298 = arith.addf %289, %297 : vector<2x16x256xf32>
    %299 = vector.extract_strided_slice %50 {offsets = [0, 11, 256], sizes = [2, 1, 256], strides = [1, 1, 1]} : vector<2x16x768xf32> to vector<2x1x256xf32>
    %c1_117 = arith.constant 1 : index
    %c11_118 = arith.constant 11 : index
    %c0_119 = arith.constant 0 : index
    %c0_120 = arith.constant 0 : index
    %300 = vector.load %arg3[%c1_117, %c11_118, %c0_119, %c0_120] : memref<3x16x16x256xbf16, #tpu.memory_space<vmem>>, vector<1x1x16x256xbf16>
    %301 = vector.shape_cast %300 : vector<1x1x16x256xbf16> to vector<16x256xbf16>
    %302 = arith.extf %301 : vector<16x256xbf16> to vector<16x256xf32>
    %303 = vector.shape_cast %302 : vector<16x256xf32> to vector<1x16x256xf32>
    %304 = vector.broadcast %299 : vector<2x1x256xf32> to vector<2x16x256xf32>
    %305 = vector.broadcast %303 : vector<1x16x256xf32> to vector<2x16x256xf32>
    %306 = arith.mulf %304, %305 : vector<2x16x256xf32>
    %307 = arith.addf %298, %306 : vector<2x16x256xf32>
    %308 = vector.extract_strided_slice %50 {offsets = [0, 12, 256], sizes = [2, 1, 256], strides = [1, 1, 1]} : vector<2x16x768xf32> to vector<2x1x256xf32>
    %c1_121 = arith.constant 1 : index
    %c12_122 = arith.constant 12 : index
    %c0_123 = arith.constant 0 : index
    %c0_124 = arith.constant 0 : index
    %309 = vector.load %arg3[%c1_121, %c12_122, %c0_123, %c0_124] : memref<3x16x16x256xbf16, #tpu.memory_space<vmem>>, vector<1x1x16x256xbf16>
    %310 = vector.shape_cast %309 : vector<1x1x16x256xbf16> to vector<16x256xbf16>
    %311 = arith.extf %310 : vector<16x256xbf16> to vector<16x256xf32>
    %312 = vector.shape_cast %311 : vector<16x256xf32> to vector<1x16x256xf32>
    %313 = vector.broadcast %308 : vector<2x1x256xf32> to vector<2x16x256xf32>
    %314 = vector.broadcast %312 : vector<1x16x256xf32> to vector<2x16x256xf32>
    %315 = arith.mulf %313, %314 : vector<2x16x256xf32>
    %316 = arith.addf %307, %315 : vector<2x16x256xf32>
    %317 = vector.extract_strided_slice %50 {offsets = [0, 13, 256], sizes = [2, 1, 256], strides = [1, 1, 1]} : vector<2x16x768xf32> to vector<2x1x256xf32>
    %c1_125 = arith.constant 1 : index
    %c13_126 = arith.constant 13 : index
    %c0_127 = arith.constant 0 : index
    %c0_128 = arith.constant 0 : index
    %318 = vector.load %arg3[%c1_125, %c13_126, %c0_127, %c0_128] : memref<3x16x16x256xbf16, #tpu.memory_space<vmem>>, vector<1x1x16x256xbf16>
    %319 = vector.shape_cast %318 : vector<1x1x16x256xbf16> to vector<16x256xbf16>
    %320 = arith.extf %319 : vector<16x256xbf16> to vector<16x256xf32>
    %321 = vector.shape_cast %320 : vector<16x256xf32> to vector<1x16x256xf32>
    %322 = vector.broadcast %317 : vector<2x1x256xf32> to vector<2x16x256xf32>
    %323 = vector.broadcast %321 : vector<1x16x256xf32> to vector<2x16x256xf32>
    %324 = arith.mulf %322, %323 : vector<2x16x256xf32>
    %325 = arith.addf %316, %324 : vector<2x16x256xf32>
    %326 = vector.extract_strided_slice %50 {offsets = [0, 14, 256], sizes = [2, 1, 256], strides = [1, 1, 1]} : vector<2x16x768xf32> to vector<2x1x256xf32>
    %c1_129 = arith.constant 1 : index
    %c14_130 = arith.constant 14 : index
    %c0_131 = arith.constant 0 : index
    %c0_132 = arith.constant 0 : index
    %327 = vector.load %arg3[%c1_129, %c14_130, %c0_131, %c0_132] : memref<3x16x16x256xbf16, #tpu.memory_space<vmem>>, vector<1x1x16x256xbf16>
    %328 = vector.shape_cast %327 : vector<1x1x16x256xbf16> to vector<16x256xbf16>
    %329 = arith.extf %328 : vector<16x256xbf16> to vector<16x256xf32>
    %330 = vector.shape_cast %329 : vector<16x256xf32> to vector<1x16x256xf32>
    %331 = vector.broadcast %326 : vector<2x1x256xf32> to vector<2x16x256xf32>
    %332 = vector.broadcast %330 : vector<1x16x256xf32> to vector<2x16x256xf32>
    %333 = arith.mulf %331, %332 : vector<2x16x256xf32>
    %334 = arith.addf %325, %333 : vector<2x16x256xf32>
    %335 = vector.extract_strided_slice %50 {offsets = [0, 15, 256], sizes = [2, 1, 256], strides = [1, 1, 1]} : vector<2x16x768xf32> to vector<2x1x256xf32>
    %c1_133 = arith.constant 1 : index
    %c15_134 = arith.constant 15 : index
    %c0_135 = arith.constant 0 : index
    %c0_136 = arith.constant 0 : index
    %336 = vector.load %arg3[%c1_133, %c15_134, %c0_135, %c0_136] : memref<3x16x16x256xbf16, #tpu.memory_space<vmem>>, vector<1x1x16x256xbf16>
    %337 = vector.shape_cast %336 : vector<1x1x16x256xbf16> to vector<16x256xbf16>
    %338 = arith.extf %337 : vector<16x256xbf16> to vector<16x256xf32>
    %339 = vector.shape_cast %338 : vector<16x256xf32> to vector<1x16x256xf32>
    %340 = vector.broadcast %335 : vector<2x1x256xf32> to vector<2x16x256xf32>
    %341 = vector.broadcast %339 : vector<1x16x256xf32> to vector<2x16x256xf32>
    %342 = arith.mulf %340, %341 : vector<2x16x256xf32>
    %343 = arith.addf %334, %342 : vector<2x16x256xf32>
    %344 = vector.extract_strided_slice %50 {offsets = [0, 0, 512], sizes = [2, 1, 256], strides = [1, 1, 1]} : vector<2x16x768xf32> to vector<2x1x256xf32>
    %c2_137 = arith.constant 2 : index
    %c0_138 = arith.constant 0 : index
    %c0_139 = arith.constant 0 : index
    %c0_140 = arith.constant 0 : index
    %345 = vector.load %arg3[%c2_137, %c0_138, %c0_139, %c0_140] : memref<3x16x16x256xbf16, #tpu.memory_space<vmem>>, vector<1x1x16x256xbf16>
    %346 = vector.shape_cast %345 : vector<1x1x16x256xbf16> to vector<16x256xbf16>
    %347 = arith.extf %346 : vector<16x256xbf16> to vector<16x256xf32>
    %348 = vector.shape_cast %347 : vector<16x256xf32> to vector<1x16x256xf32>
    %349 = vector.broadcast %344 : vector<2x1x256xf32> to vector<2x16x256xf32>
    %350 = vector.broadcast %348 : vector<1x16x256xf32> to vector<2x16x256xf32>
    %351 = arith.mulf %349, %350 : vector<2x16x256xf32>
    %352 = arith.addf %343, %351 : vector<2x16x256xf32>
    %353 = vector.extract_strided_slice %50 {offsets = [0, 1, 512], sizes = [2, 1, 256], strides = [1, 1, 1]} : vector<2x16x768xf32> to vector<2x1x256xf32>
    %c2_141 = arith.constant 2 : index
    %c1_142 = arith.constant 1 : index
    %c0_143 = arith.constant 0 : index
    %c0_144 = arith.constant 0 : index
    %354 = vector.load %arg3[%c2_141, %c1_142, %c0_143, %c0_144] : memref<3x16x16x256xbf16, #tpu.memory_space<vmem>>, vector<1x1x16x256xbf16>
    %355 = vector.shape_cast %354 : vector<1x1x16x256xbf16> to vector<16x256xbf16>
    %356 = arith.extf %355 : vector<16x256xbf16> to vector<16x256xf32>
    %357 = vector.shape_cast %356 : vector<16x256xf32> to vector<1x16x256xf32>
    %358 = vector.broadcast %353 : vector<2x1x256xf32> to vector<2x16x256xf32>
    %359 = vector.broadcast %357 : vector<1x16x256xf32> to vector<2x16x256xf32>
    %360 = arith.mulf %358, %359 : vector<2x16x256xf32>
    %361 = arith.addf %352, %360 : vector<2x16x256xf32>
    %362 = vector.extract_strided_slice %50 {offsets = [0, 2, 512], sizes = [2, 1, 256], strides = [1, 1, 1]} : vector<2x16x768xf32> to vector<2x1x256xf32>
    %c2_145 = arith.constant 2 : index
    %c2_146 = arith.constant 2 : index
    %c0_147 = arith.constant 0 : index
    %c0_148 = arith.constant 0 : index
    %363 = vector.load %arg3[%c2_145, %c2_146, %c0_147, %c0_148] : memref<3x16x16x256xbf16, #tpu.memory_space<vmem>>, vector<1x1x16x256xbf16>
    %364 = vector.shape_cast %363 : vector<1x1x16x256xbf16> to vector<16x256xbf16>
    %365 = arith.extf %364 : vector<16x256xbf16> to vector<16x256xf32>
    %366 = vector.shape_cast %365 : vector<16x256xf32> to vector<1x16x256xf32>
    %367 = vector.broadcast %362 : vector<2x1x256xf32> to vector<2x16x256xf32>
    %368 = vector.broadcast %366 : vector<1x16x256xf32> to vector<2x16x256xf32>
    %369 = arith.mulf %367, %368 : vector<2x16x256xf32>
    %370 = arith.addf %361, %369 : vector<2x16x256xf32>
    %371 = vector.extract_strided_slice %50 {offsets = [0, 3, 512], sizes = [2, 1, 256], strides = [1, 1, 1]} : vector<2x16x768xf32> to vector<2x1x256xf32>
    %c2_149 = arith.constant 2 : index
    %c3_150 = arith.constant 3 : index
    %c0_151 = arith.constant 0 : index
    %c0_152 = arith.constant 0 : index
    %372 = vector.load %arg3[%c2_149, %c3_150, %c0_151, %c0_152] : memref<3x16x16x256xbf16, #tpu.memory_space<vmem>>, vector<1x1x16x256xbf16>
    %373 = vector.shape_cast %372 : vector<1x1x16x256xbf16> to vector<16x256xbf16>
    %374 = arith.extf %373 : vector<16x256xbf16> to vector<16x256xf32>
    %375 = vector.shape_cast %374 : vector<16x256xf32> to vector<1x16x256xf32>
    %376 = vector.broadcast %371 : vector<2x1x256xf32> to vector<2x16x256xf32>
    %377 = vector.broadcast %375 : vector<1x16x256xf32> to vector<2x16x256xf32>
    %378 = arith.mulf %376, %377 : vector<2x16x256xf32>
    %379 = arith.addf %370, %378 : vector<2x16x256xf32>
    %380 = vector.extract_strided_slice %50 {offsets = [0, 4, 512], sizes = [2, 1, 256], strides = [1, 1, 1]} : vector<2x16x768xf32> to vector<2x1x256xf32>
    %c2_153 = arith.constant 2 : index
    %c4_154 = arith.constant 4 : index
    %c0_155 = arith.constant 0 : index
    %c0_156 = arith.constant 0 : index
    %381 = vector.load %arg3[%c2_153, %c4_154, %c0_155, %c0_156] : memref<3x16x16x256xbf16, #tpu.memory_space<vmem>>, vector<1x1x16x256xbf16>
    %382 = vector.shape_cast %381 : vector<1x1x16x256xbf16> to vector<16x256xbf16>
    %383 = arith.extf %382 : vector<16x256xbf16> to vector<16x256xf32>
    %384 = vector.shape_cast %383 : vector<16x256xf32> to vector<1x16x256xf32>
    %385 = vector.broadcast %380 : vector<2x1x256xf32> to vector<2x16x256xf32>
    %386 = vector.broadcast %384 : vector<1x16x256xf32> to vector<2x16x256xf32>
    %387 = arith.mulf %385, %386 : vector<2x16x256xf32>
    %388 = arith.addf %379, %387 : vector<2x16x256xf32>
    %389 = vector.extract_strided_slice %50 {offsets = [0, 5, 512], sizes = [2, 1, 256], strides = [1, 1, 1]} : vector<2x16x768xf32> to vector<2x1x256xf32>
    %c2_157 = arith.constant 2 : index
    %c5_158 = arith.constant 5 : index
    %c0_159 = arith.constant 0 : index
    %c0_160 = arith.constant 0 : index
    %390 = vector.load %arg3[%c2_157, %c5_158, %c0_159, %c0_160] : memref<3x16x16x256xbf16, #tpu.memory_space<vmem>>, vector<1x1x16x256xbf16>
    %391 = vector.shape_cast %390 : vector<1x1x16x256xbf16> to vector<16x256xbf16>
    %392 = arith.extf %391 : vector<16x256xbf16> to vector<16x256xf32>
    %393 = vector.shape_cast %392 : vector<16x256xf32> to vector<1x16x256xf32>
    %394 = vector.broadcast %389 : vector<2x1x256xf32> to vector<2x16x256xf32>
    %395 = vector.broadcast %393 : vector<1x16x256xf32> to vector<2x16x256xf32>
    %396 = arith.mulf %394, %395 : vector<2x16x256xf32>
    %397 = arith.addf %388, %396 : vector<2x16x256xf32>
    %398 = vector.extract_strided_slice %50 {offsets = [0, 6, 512], sizes = [2, 1, 256], strides = [1, 1, 1]} : vector<2x16x768xf32> to vector<2x1x256xf32>
    %c2_161 = arith.constant 2 : index
    %c6_162 = arith.constant 6 : index
    %c0_163 = arith.constant 0 : index
    %c0_164 = arith.constant 0 : index
    %399 = vector.load %arg3[%c2_161, %c6_162, %c0_163, %c0_164] : memref<3x16x16x256xbf16, #tpu.memory_space<vmem>>, vector<1x1x16x256xbf16>
    %400 = vector.shape_cast %399 : vector<1x1x16x256xbf16> to vector<16x256xbf16>
    %401 = arith.extf %400 : vector<16x256xbf16> to vector<16x256xf32>
    %402 = vector.shape_cast %401 : vector<16x256xf32> to vector<1x16x256xf32>
    %403 = vector.broadcast %398 : vector<2x1x256xf32> to vector<2x16x256xf32>
    %404 = vector.broadcast %402 : vector<1x16x256xf32> to vector<2x16x256xf32>
    %405 = arith.mulf %403, %404 : vector<2x16x256xf32>
    %406 = arith.addf %397, %405 : vector<2x16x256xf32>
    %407 = vector.extract_strided_slice %50 {offsets = [0, 7, 512], sizes = [2, 1, 256], strides = [1, 1, 1]} : vector<2x16x768xf32> to vector<2x1x256xf32>
    %c2_165 = arith.constant 2 : index
    %c7_166 = arith.constant 7 : index
    %c0_167 = arith.constant 0 : index
    %c0_168 = arith.constant 0 : index
    %408 = vector.load %arg3[%c2_165, %c7_166, %c0_167, %c0_168] : memref<3x16x16x256xbf16, #tpu.memory_space<vmem>>, vector<1x1x16x256xbf16>
    %409 = vector.shape_cast %408 : vector<1x1x16x256xbf16> to vector<16x256xbf16>
    %410 = arith.extf %409 : vector<16x256xbf16> to vector<16x256xf32>
    %411 = vector.shape_cast %410 : vector<16x256xf32> to vector<1x16x256xf32>
    %412 = vector.broadcast %407 : vector<2x1x256xf32> to vector<2x16x256xf32>
    %413 = vector.broadcast %411 : vector<1x16x256xf32> to vector<2x16x256xf32>
    %414 = arith.mulf %412, %413 : vector<2x16x256xf32>
    %415 = arith.addf %406, %414 : vector<2x16x256xf32>
    %416 = vector.extract_strided_slice %50 {offsets = [0, 8, 512], sizes = [2, 1, 256], strides = [1, 1, 1]} : vector<2x16x768xf32> to vector<2x1x256xf32>
    %c2_169 = arith.constant 2 : index
    %c8_170 = arith.constant 8 : index
    %c0_171 = arith.constant 0 : index
    %c0_172 = arith.constant 0 : index
    %417 = vector.load %arg3[%c2_169, %c8_170, %c0_171, %c0_172] : memref<3x16x16x256xbf16, #tpu.memory_space<vmem>>, vector<1x1x16x256xbf16>
    %418 = vector.shape_cast %417 : vector<1x1x16x256xbf16> to vector<16x256xbf16>
    %419 = arith.extf %418 : vector<16x256xbf16> to vector<16x256xf32>
    %420 = vector.shape_cast %419 : vector<16x256xf32> to vector<1x16x256xf32>
    %421 = vector.broadcast %416 : vector<2x1x256xf32> to vector<2x16x256xf32>
    %422 = vector.broadcast %420 : vector<1x16x256xf32> to vector<2x16x256xf32>
    %423 = arith.mulf %421, %422 : vector<2x16x256xf32>
    %424 = arith.addf %415, %423 : vector<2x16x256xf32>
    %425 = vector.extract_strided_slice %50 {offsets = [0, 9, 512], sizes = [2, 1, 256], strides = [1, 1, 1]} : vector<2x16x768xf32> to vector<2x1x256xf32>
    %c2_173 = arith.constant 2 : index
    %c9_174 = arith.constant 9 : index
    %c0_175 = arith.constant 0 : index
    %c0_176 = arith.constant 0 : index
    %426 = vector.load %arg3[%c2_173, %c9_174, %c0_175, %c0_176] : memref<3x16x16x256xbf16, #tpu.memory_space<vmem>>, vector<1x1x16x256xbf16>
    %427 = vector.shape_cast %426 : vector<1x1x16x256xbf16> to vector<16x256xbf16>
    %428 = arith.extf %427 : vector<16x256xbf16> to vector<16x256xf32>
    %429 = vector.shape_cast %428 : vector<16x256xf32> to vector<1x16x256xf32>
    %430 = vector.broadcast %425 : vector<2x1x256xf32> to vector<2x16x256xf32>
    %431 = vector.broadcast %429 : vector<1x16x256xf32> to vector<2x16x256xf32>
    %432 = arith.mulf %430, %431 : vector<2x16x256xf32>
    %433 = arith.addf %424, %432 : vector<2x16x256xf32>
    %434 = vector.extract_strided_slice %50 {offsets = [0, 10, 512], sizes = [2, 1, 256], strides = [1, 1, 1]} : vector<2x16x768xf32> to vector<2x1x256xf32>
    %c2_177 = arith.constant 2 : index
    %c10_178 = arith.constant 10 : index
    %c0_179 = arith.constant 0 : index
    %c0_180 = arith.constant 0 : index
    %435 = vector.load %arg3[%c2_177, %c10_178, %c0_179, %c0_180] : memref<3x16x16x256xbf16, #tpu.memory_space<vmem>>, vector<1x1x16x256xbf16>
    %436 = vector.shape_cast %435 : vector<1x1x16x256xbf16> to vector<16x256xbf16>
    %437 = arith.extf %436 : vector<16x256xbf16> to vector<16x256xf32>
    %438 = vector.shape_cast %437 : vector<16x256xf32> to vector<1x16x256xf32>
    %439 = vector.broadcast %434 : vector<2x1x256xf32> to vector<2x16x256xf32>
    %440 = vector.broadcast %438 : vector<1x16x256xf32> to vector<2x16x256xf32>
    %441 = arith.mulf %439, %440 : vector<2x16x256xf32>
    %442 = arith.addf %433, %441 : vector<2x16x256xf32>
    %443 = vector.extract_strided_slice %50 {offsets = [0, 11, 512], sizes = [2, 1, 256], strides = [1, 1, 1]} : vector<2x16x768xf32> to vector<2x1x256xf32>
    %c2_181 = arith.constant 2 : index
    %c11_182 = arith.constant 11 : index
    %c0_183 = arith.constant 0 : index
    %c0_184 = arith.constant 0 : index
    %444 = vector.load %arg3[%c2_181, %c11_182, %c0_183, %c0_184] : memref<3x16x16x256xbf16, #tpu.memory_space<vmem>>, vector<1x1x16x256xbf16>
    %445 = vector.shape_cast %444 : vector<1x1x16x256xbf16> to vector<16x256xbf16>
    %446 = arith.extf %445 : vector<16x256xbf16> to vector<16x256xf32>
    %447 = vector.shape_cast %446 : vector<16x256xf32> to vector<1x16x256xf32>
    %448 = vector.broadcast %443 : vector<2x1x256xf32> to vector<2x16x256xf32>
    %449 = vector.broadcast %447 : vector<1x16x256xf32> to vector<2x16x256xf32>
    %450 = arith.mulf %448, %449 : vector<2x16x256xf32>
    %451 = arith.addf %442, %450 : vector<2x16x256xf32>
    %452 = vector.extract_strided_slice %50 {offsets = [0, 12, 512], sizes = [2, 1, 256], strides = [1, 1, 1]} : vector<2x16x768xf32> to vector<2x1x256xf32>
    %c2_185 = arith.constant 2 : index
    %c12_186 = arith.constant 12 : index
    %c0_187 = arith.constant 0 : index
    %c0_188 = arith.constant 0 : index
    %453 = vector.load %arg3[%c2_185, %c12_186, %c0_187, %c0_188] : memref<3x16x16x256xbf16, #tpu.memory_space<vmem>>, vector<1x1x16x256xbf16>
    %454 = vector.shape_cast %453 : vector<1x1x16x256xbf16> to vector<16x256xbf16>
    %455 = arith.extf %454 : vector<16x256xbf16> to vector<16x256xf32>
    %456 = vector.shape_cast %455 : vector<16x256xf32> to vector<1x16x256xf32>
    %457 = vector.broadcast %452 : vector<2x1x256xf32> to vector<2x16x256xf32>
    %458 = vector.broadcast %456 : vector<1x16x256xf32> to vector<2x16x256xf32>
    %459 = arith.mulf %457, %458 : vector<2x16x256xf32>
    %460 = arith.addf %451, %459 : vector<2x16x256xf32>
    %461 = vector.extract_strided_slice %50 {offsets = [0, 13, 512], sizes = [2, 1, 256], strides = [1, 1, 1]} : vector<2x16x768xf32> to vector<2x1x256xf32>
    %c2_189 = arith.constant 2 : index
    %c13_190 = arith.constant 13 : index
    %c0_191 = arith.constant 0 : index
    %c0_192 = arith.constant 0 : index
    %462 = vector.load %arg3[%c2_189, %c13_190, %c0_191, %c0_192] : memref<3x16x16x256xbf16, #tpu.memory_space<vmem>>, vector<1x1x16x256xbf16>
    %463 = vector.shape_cast %462 : vector<1x1x16x256xbf16> to vector<16x256xbf16>
    %464 = arith.extf %463 : vector<16x256xbf16> to vector<16x256xf32>
    %465 = vector.shape_cast %464 : vector<16x256xf32> to vector<1x16x256xf32>
    %466 = vector.broadcast %461 : vector<2x1x256xf32> to vector<2x16x256xf32>
    %467 = vector.broadcast %465 : vector<1x16x256xf32> to vector<2x16x256xf32>
    %468 = arith.mulf %466, %467 : vector<2x16x256xf32>
    %469 = arith.addf %460, %468 : vector<2x16x256xf32>
    %470 = vector.extract_strided_slice %50 {offsets = [0, 14, 512], sizes = [2, 1, 256], strides = [1, 1, 1]} : vector<2x16x768xf32> to vector<2x1x256xf32>
    %c2_193 = arith.constant 2 : index
    %c14_194 = arith.constant 14 : index
    %c0_195 = arith.constant 0 : index
    %c0_196 = arith.constant 0 : index
    %471 = vector.load %arg3[%c2_193, %c14_194, %c0_195, %c0_196] : memref<3x16x16x256xbf16, #tpu.memory_space<vmem>>, vector<1x1x16x256xbf16>
    %472 = vector.shape_cast %471 : vector<1x1x16x256xbf16> to vector<16x256xbf16>
    %473 = arith.extf %472 : vector<16x256xbf16> to vector<16x256xf32>
    %474 = vector.shape_cast %473 : vector<16x256xf32> to vector<1x16x256xf32>
    %475 = vector.broadcast %470 : vector<2x1x256xf32> to vector<2x16x256xf32>
    %476 = vector.broadcast %474 : vector<1x16x256xf32> to vector<2x16x256xf32>
    %477 = arith.mulf %475, %476 : vector<2x16x256xf32>
    %478 = arith.addf %469, %477 : vector<2x16x256xf32>
    %479 = vector.extract_strided_slice %50 {offsets = [0, 15, 512], sizes = [2, 1, 256], strides = [1, 1, 1]} : vector<2x16x768xf32> to vector<2x1x256xf32>
    %c2_197 = arith.constant 2 : index
    %c15_198 = arith.constant 15 : index
    %c0_199 = arith.constant 0 : index
    %c0_200 = arith.constant 0 : index
    %480 = vector.load %arg3[%c2_197, %c15_198, %c0_199, %c0_200] : memref<3x16x16x256xbf16, #tpu.memory_space<vmem>>, vector<1x1x16x256xbf16>
    %481 = vector.shape_cast %480 : vector<1x1x16x256xbf16> to vector<16x256xbf16>
    %482 = arith.extf %481 : vector<16x256xbf16> to vector<16x256xf32>
    %483 = vector.shape_cast %482 : vector<16x256xf32> to vector<1x16x256xf32>
    %484 = vector.broadcast %479 : vector<2x1x256xf32> to vector<2x16x256xf32>
    %485 = vector.broadcast %483 : vector<1x16x256xf32> to vector<2x16x256xf32>
    %486 = arith.mulf %484, %485 : vector<2x16x256xf32>
    %487 = arith.addf %478, %486 : vector<2x16x256xf32>
    %488 = vector.shape_cast %487 : vector<2x16x256xf32> to vector<32x256xf32>
    %489 = arith.truncf %488 : vector<32x256xf32> to vector<32x256xbf16>
    %c0_201 = arith.constant 0 : index
    %c0_202 = arith.constant 0 : index
    %490 = vector.load %arg5[%c0_201, %c0_202] : memref<256x256xbf16, #tpu.memory_space<vmem>>, vector<256x256xbf16>
    %cst_203 = arith.constant dense<0.000000e+00> : vector<32x256xf32>
    %491 = tpu.matmul %489, %490, %cst_203 {dimension_numbers = #tpu.dot_dimension_numbers<[1], [0], [0], [1], [0, 0, 1, 1], [], []>} : vector<32x256xbf16>, vector<256x256xbf16>, vector<32x256xf32> -> vector<32x256xf32>
    %c0_204 = arith.constant 0 : index
    %c0_205 = arith.constant 0 : index
    %492 = vector.load %arg6[%c0_204, %c0_205] : memref<1x256xf32, #tpu.memory_space<vmem>>, vector<1x256xf32>
    %493 = vector.broadcast %492 : vector<1x256xf32> to vector<32x256xf32>
    %494 = arith.addf %491, %493 : vector<32x256xf32>
    %495 = arith.mulf %48, %494 : vector<32x256xf32>
    %496 = arith.truncf %495 : vector<32x256xf32> to vector<32x256xbf16>
    %c0_206 = arith.constant 0 : index
    %c0_207 = arith.constant 0 : index
    %497 = vector.load %arg8[%c0_206, %c0_207] : memref<256x256xbf16, #tpu.memory_space<vmem>>, vector<256x256xbf16>
    %cst_208 = arith.constant dense<0.000000e+00> : vector<32x256xf32>
    %498 = tpu.matmul %496, %497, %cst_208 {dimension_numbers = #tpu.dot_dimension_numbers<[1], [0], [0], [1], [0, 0, 1, 1], [], []>} : vector<32x256xbf16>, vector<256x256xbf16>, vector<32x256xf32> -> vector<32x256xf32>
    %c0_209 = arith.constant 0 : index
    %c0_210 = arith.constant 0 : index
    %499 = vector.load %arg9[%c0_209, %c0_210] : memref<1x256xf32, #tpu.memory_space<vmem>>, vector<1x256xf32>
    %500 = vector.broadcast %499 : vector<1x256xf32> to vector<32x256xf32>
    %501 = arith.addf %498, %500 : vector<32x256xf32>
    %502 = arith.addf %501, %1 : vector<32x256xf32>
    %503 = vector.shape_cast %502 : vector<32x256xf32> to vector<2x16x256xf32>
    %c0_211 = arith.constant 0 : index
    %c0_212 = arith.constant 0 : index
    %c0_213 = arith.constant 0 : index
    %504 = vector.load %arg10[%c0_211, %c0_212, %c0_213] : memref<2x16x256xf32, #tpu.memory_space<vmem>>, vector<2x16x256xf32>
    tpu.vector_store %arg10[%c0_211, %c0_212, %c0_213], %503 {strides = array<i32>} : memref<2x16x256xf32, #tpu.memory_space<vmem>>, vector<2x16x256xf32>,
    return
  }
  func.func @transform_0(%arg0: i32) -> (i32, i32, i32) {
    %c0_i32 = arith.constant 0 : i32
    %c0_i32_0 = arith.constant 0 : i32
    %c0_i32_1 = arith.constant 0 : i32
    return %arg0, %c0_i32, %c0_i32_0 : i32, i32, i32
  }
  func.func @transform_1(%arg0: i32) -> (i32, i32) {
    %c0_i32 = arith.constant 0 : i32
    %c0_i32_0 = arith.constant 0 : i32
    %c0_i32_1 = arith.constant 0 : i32
    return %c0_i32, %c0_i32_0 : i32, i32
  }
  func.func @transform_2(%arg0: i32) -> (i32, i32, i32, i32) {
    %c0_i32 = arith.constant 0 : i32
    %c0_i32_0 = arith.constant 0 : i32
    %c0_i32_1 = arith.constant 0 : i32
    %c0_i32_2 = arith.constant 0 : i32
    %c0_i32_3 = arith.constant 0 : i32
    return %c0_i32, %c0_i32_0, %c0_i32_1, %c0_i32_2 : i32, i32, i32, i32
  }
  func.func @transform_3(%arg0: i32) -> (i32, i32) {
    %c0_i32 = arith.constant 0 : i32
    %c0_i32_0 = arith.constant 0 : i32
    %c0_i32_1 = arith.constant 0 : i32
    return %c0_i32, %c0_i32_0 : i32, i32
  }
  func.func @transform_4(%arg0: i32) -> (i32, i32) {
    %c0_i32 = arith.constant 0 : i32
    %c0_i32_0 = arith.constant 0 : i32
    %c0_i32_1 = arith.constant 0 : i32
    return %c0_i32, %c0_i32_0 : i32, i32
  }
  func.func @transform_5(%arg0: i32) -> (i32, i32) {
    %c0_i32 = arith.constant 0 : i32
    %c0_i32_0 = arith.constant 0 : i32
    %c0_i32_1 = arith.constant 0 : i32
    return %c0_i32, %c0_i32_0 : i32, i32
  }
  func.func @transform_6(%arg0: i32) -> (i32, i32) {
    %c0_i32 = arith.constant 0 : i32
    %c0_i32_0 = arith.constant 0 : i32
    %c0_i32_1 = arith.constant 0 : i32
    return %c0_i32, %c0_i32_0 : i32, i32
  }
  func.func @transform_7(%arg0: i32) -> (i32, i32) {
    %c0_i32 = arith.constant 0 : i32
    %c0_i32_0 = arith.constant 0 : i32
    %c0_i32_1 = arith.constant 0 : i32
    return %c0_i32, %c0_i32_0 : i32, i32
  }
  func.func @transform_8(%arg0: i32) -> (i32, i32) {
    %c0_i32 = arith.constant 0 : i32
    %c0_i32_0 = arith.constant 0 : i32
    %c0_i32_1 = arith.constant 0 : i32
    return %c0_i32, %c0_i32_0 : i32, i32
  }
  func.func @transform_9(%arg0: i32) -> (i32, i32, i32) {
    %c0_i32 = arith.constant 0 : i32
    %c0_i32_0 = arith.constant 0 : i32
    %c0_i32_1 = arith.constant 0 : i32
    return %arg0, %c0_i32, %c0_i32_0 : i32, i32, i32
  }
}

</mosaic_0001>

<bundles_post_ra>
// kernel: tile.39
= control target key start
LH: loop header
LB: loop body
LE: loop exit
PB: predicated region body
PF: predicated region fallthrough
CT: control target
= control target key end

     0   :  { %s28_s0 = inlined_call_operand.vmem [shape: f32[16], index: 0, kind: input, shape index: {}]   ;;  %s29_s1 = inlined_call_operand.vmem [shape: f32[16,16], index: 1, kind: output, shape index: {}]  }
   0x1   :  { %v4_v0 = vld [vmem:[%s28_s0] ss:$0 sm:$0xff] }
   0x2   :  { %5 = vst [vmem:[%s29_s1] sm:$0xff] %v4_v0 }
   0x3   :  { %8 = vst [vmem:[%s29_s1 + $0x8] sm:$0xff] %v4_v0 }

// kernel: tile.44
= control target key start
LH: loop header
LB: loop body
LE: loop exit
PB: predicated region body
PF: predicated region fallthrough
CT: control target
= control target key end

     0   :  { %2 = vsyncpa [#allocation1], 0  ;;  %s51_s8 = smov [#allocation0]   ;;  %s71_s0 = inlined_call_operand.hbm [shape: f32[16], index: 0, kind: input, shape index: {}]   ;;  %s72_s1 = inlined_call_operand.vmem [shape: f32[16,16], index: 1, kind: output, shape index: {}]  }
   0x1   :  { %s8_s0 = sshll.u32 %s71_s0, 4  ;;  %s10_s9 = sshll.u32 %s51_s8, 4  ;;  %s9_s0 = int_to_ptr.hbm [resolvable:$true] %s8_s0  ;;  %s11_s9 = int_to_ptr.vmem [resolvable:$true] %s10_s9 }
   0x2   :  { %13 = dma.hbm_to_vmem [thread:$0]  %s9_s0, 16, %s11_s9, [#allocation1]  }
   0x3   :  { %49 = dma.done.wait [#allocation1], 16  }
   0x4   :  { %50 = vsyncadd [#allocation1], 4294967280  ;;  %v18_v0 = vld [vmem:[#allocation0] ss:$0 sm:$0xff] }
   0x5   :  { %19 = vst [vmem:[%s72_s1] sm:$0xff] %v18_v0 }
   0x6   :  { %23 = vst [vmem:[%s72_s1 + $0x8] sm:$0xff] %v18_v0 }
   0x7   :  { %22 = vsyncpa [#allocation1], 1 }

// kernel: tile.45
= control target key start
LH: loop header
LB: loop body
LE: loop exit
PB: predicated region body
PF: predicated region fallthrough
CT: control target
= control target key end

     0   :  { %s7_s6 = smov 3  ;;  %s21_s9 = smov 3  ;;  %vm4_vm0 = vcmask 130048   ;;  %vm11_vm1 = vcmask 1048448   ;;  %vm18_vm2 = vcmask 917248   ;;  %vm25_vm3 = vcmask 786048   ;;  %s129_s0 = inlined_call_operand.vmem [shape: f32[16,16], index: 0, kind: input, shape index: {}]   ;;  %s130_s1 = inlined_call_operand.vmem [shape: f32[1,256], index: 1, kind: output, shape index: {}]  }
   0x1   :  { %v67_v0 = vld [vmem:[%s129_s0 + $0x7] ss:$8 sm:%s7_s6]   ;;  %s82_s10 = smov 112   ;;  %v69_v1 = vld [vmem:[%s129_s0 + $0x5] ss:$8 sm:%s21_s9]   ;;  %s83_s13 = smov 80  }
   0x2   :  { %9 = vrot.lane.b32.xlu0 %v67_v0, %s82_s10  ;;  %23 = vrot.lane.b32.xlu1 %v69_v1, %s83_s13  ;;  %s14_s14 = smov 3  ;;  %s28_s15 = smov 3  ;;  %vm32_vm4 = vcmask 654848   ;;  %vm39_vm5 = vcmask 523648   ;;  %vm46_vm6 = vcmask 392448   ;;  %vm53_vm7 = vcmask 261248  }
   0x3   :  { %s35_s16 = smov 3  ;;  %v68_v3 = vld [vmem:[%s129_s0 + $0x6] ss:$8 sm:%s14_s14]   ;;  %s84_s21 = smov 48   ;;  %v70_v4 = vld [vmem:[%s129_s0 + $0x4] ss:$8 sm:%s28_s15]  }
   0x4   :  { %v71_v2 = vld [vmem:[%s129_s0 + $0x3] ss:$8 sm:%s35_s16]   ;;  %s42_s24 = smov 3  ;;  %s85_s25 = smov 96  }
   0x5   :  { %37 = vrot.lane.b32.xlu2 %v71_v2, %s84_s21  ;;  %s86_s26 = smov 64   ;;  %s49_s27 = smov 3  ;;  %v72_v5 = vld [vmem:[%s129_s0 + $0x2] ss:$8 sm:%s42_s24]  }
   0x6   :  { %v73_v6 = vld [vmem:[%s129_s0 + $0x1] ss:$8 sm:%s49_s27]   ;;  %s87_s3 = smov 32   ;;  %s88_s4 = smov 16  }
   0x7   :  { %s2_s5 = smov 3 }
   0x8   :  { %v3_v7 = vld [vmem:[%s129_s0] ss:$8 sm:%s2_s5]  }
   0x9   :  { %5 = vst.msk [vmem:[#allocation0] ss:$8 sm:$0x3] %vm4_vm0, %v3_v7  }
   0xa   :  { %16 = vrot.lane.b32.xlu0 %v68_v3, %s85_s25  ;;  %30 = vrot.lane.b32.xlu1 %v70_v4, %s86_s26 }
   0xd   :  { %44 = vrot.lane.b32.xlu2 %v72_v5, %s87_s3 }
  0x12   :  { %51 = vrot.lane.b32.xlu0 %v73_v6, %s88_s4 }
  0x5f   :  { %v38_v8 = vpop.permute.xlu2 %37  }
  0x67   :  { %v45_v9 = vpop.permute.xlu2 %44  }
  0x74   :  { %v10_v10 = vpop.permute.xlu0 %9   ;;  %v24_v11 = vpop.permute.xlu1 %23  }
  0x75   :  { %12 = vst.msk [vmem:[#allocation0] ss:$8 sm:$0x3] %vm11_vm1, %v10_v10  }
  0x7c   :  { %v17_v12 = vpop.permute.xlu0 %16   ;;  %v31_v13 = vpop.permute.xlu1 %30  }
  0x7d   :  { %19 = vst.msk [vmem:[#allocation0] ss:$8 sm:$0x3] %vm18_vm2, %v17_v12  }
  0x7e   :  { %26 = vst.msk [vmem:[#allocation0] ss:$8 sm:$0x3] %vm25_vm3, %v24_v11  }
  0x7f   :  { %33 = vst.msk [vmem:[#allocation0] ss:$8 sm:$0x3] %vm32_vm4, %v31_v13  }
  0x80   :  { %40 = vst.msk [vmem:[#allocation0] ss:$8 sm:$0x3] %vm39_vm5, %v38_v8  }
  0x81   :  { %47 = vst.msk [vmem:[#allocation0] ss:$8 sm:$0x3] %vm46_vm6, %v45_v9  }
  0x84   :  { %v52_v14 = vpop.permute.xlu0 %51  }
  0x85   :  { %54 = vst.msk [vmem:[#allocation0] ss:$8 sm:$0x3] %vm53_vm7, %v52_v14  }
  0x8c   :  { %v57_v15 = vld [vmem:[#allocation0] sm:$0x1]  ;;  %v62_v16 = vld [vmem:[#allocation0 + $0x8] sm:$0x1] }
  0x8d   :  { %60 = vst [vmem:[%s130_s1] sm:$0x1] %v57_v15 }
  0x8e   :  { %74 = vst [vmem:[%s130_s1 + $0x1] sm:$0x1] %v62_v16 }

// kernel: tile.35
= control target key start
LH: loop header
LB: loop body
LE: loop exit
PB: predicated region body
PF: predicated region fallthrough
CT: control target
= control target key end

     0   :  { %s60_s6 = smov 3  ;;  %s63_s7 = smov 12  ;;  %vm65_vm0 = vcmask 1043458   ;;  %vm70_vm1 = vcmask 1045508   ;;  %vm75_vm2 = vcmask 1047558   ;;  %vm4_vm3 = vcmask 1047556   ;;  %s1502_s0 = inlined_call_operand.vmem [shape: f32[16,16,1,1,16], index: 0, kind: input, shape index: {}]   ;;  %s1503_s1 = inlined_call_operand.vmem [shape: f32[16,256], index: 1, kind: output, shape index: {}]  }
   0x1   :  { %v717_v0 = vld [vmem:[%s1502_s0 + $0x7] ss:$16 sm:%s60_s6]   ;;  %s68_s12 = smov 48  ;;  %s73_s13 = smov 192  ;;  %vm6_vm4 = vcmask 130048   ;;  %vm79_vm5 = vcmask 1048448  }
   0x2   :  { %v718_v1 = vld [vmem:[%s1502_s0 + $0x7] ss:$16 sm:%s63_s7]   ;;  %s105_s18 = smov 3  ;;  %s108_s21 = smov 12  ;;  %vm170_vm6 = vcmask 917248   ;;  %vm261_vm7 = vcmask 786048  }
   0x3   :  { %v66_v2 = vsel %vm65_vm0, %v718_v1, %v717_v0  ;;  %v719_v3 = vld [vmem:[%s1502_s0 + $0x7] ss:$16 sm:%s68_s12]   ;;  %s113_s22 = smov 48  ;;  %s118_s27 = smov 192  ;;  %vm352_vm8 = vcmask 654848   ;;  %vm443_vm9 = vcmask 523648  }
   0x4   :  { %v720_v4 = vld [vmem:[%s1502_s0 + $0x7] ss:$16 sm:%s73_s13]   ;;  %v71_v5 = vsel %vm70_vm1, %v719_v3, %v66_v2  ;;  %s82_s28 = smov 3  ;;  %s857_s29 = smov 112   ;;  %vm534_vm10 = vcmask 392448   ;;  %vm625_vm11 = vcmask 261248  }
   0x5   :  { %v726_v6 = vld [vmem:[%s1502_s0 + $0x87] ss:$16 sm:%s105_s18]   ;;  %v76_v7 = vsel %vm75_vm2, %v720_v4, %v71_v5  ;;  %s85_s3 = smov 12  ;;  %s90_s4 = smov 48  ;;  %v721_v13 = vld [vmem:[%s1502_s0 + $0xf] ss:$16 sm:%s82_s28]  }
   0x6   :  { %v727_v8 = vld [vmem:[%s1502_s0 + $0x87] ss:$16 sm:%s108_s21]   ;;  %77 = vrot.lane.b32.xlu0 %v76_v7, %s857_s29  ;;  %s95_s9 = smov 192  ;;  %s128_s10 = smov 3 }
   0x7   :  { %v728_v9 = vld [vmem:[%s1502_s0 + $0x87] ss:$16 sm:%s113_s22]   ;;  %v111_v10 = vsel %vm65_vm0, %v727_v8, %v726_v6  ;;  %v722_v14 = vld [vmem:[%s1502_s0 + $0xf] ss:$16 sm:%s85_s3]   ;;  %s131_s15 = smov 12  ;;  %s136_s16 = smov 48 }
   0x8   :  { %v729_v11 = vld [vmem:[%s1502_s0 + $0x87] ss:$16 sm:%s118_s27]   ;;  %v116_v12 = vsel %vm70_vm1, %v728_v9, %v111_v10  ;;  %v88_v16 = vsel %vm65_vm0, %v722_v14, %v721_v13  ;;  %v723_v17 = vld [vmem:[%s1502_s0 + $0xf] ss:$16 sm:%s90_s4]   ;;  %s141_s19 = smov 192  ;;  %s196_s24 = smov 3 }
   0x9   :  { %v121_v15 = vsel %vm75_vm2, %v729_v11, %v116_v12  ;;  %v724_v18 = vld [vmem:[%s1502_s0 + $0xf] ss:$16 sm:%s95_s9]   ;;  %v93_v19 = vsel %vm70_vm1, %v723_v17, %v88_v16  ;;  %s199_s25 = smov 12  ;;  %v745_v26 = vld [vmem:[%s1502_s0 + $0x86] ss:$16 sm:%s196_s24]   ;;  %s204_s2 = smov 48 }
   0xa   :  { %122 = vrot.lane.b32.xlu1 %v121_v15, %s857_s29  ;;  %v731_v20 = vld [vmem:[%s1502_s0 + $0x8f] ss:$16 sm:%s128_s10]   ;;  %v98_v23 = vsel %vm75_vm2, %v724_v18, %v93_v19  ;;  %s219_s5 = smov 3  ;;  %s222_s6 = smov 12 }
   0xb   :  { %v732_v21 = vld [vmem:[%s1502_s0 + $0x8f] ss:$16 sm:%s131_s15]   ;;  %v746_v28 = vld [vmem:[%s1502_s0 + $0x86] ss:$16 sm:%s199_s25]   ;;  %s209_s9 = smov 192  ;;  %s227_s12 = smov 48 }
   0xc   :  { %v733_v22 = vld [vmem:[%s1502_s0 + $0x8f] ss:$16 sm:%s136_s16]   ;;  %v134_v24 = vsel %vm65_vm0, %v732_v21, %v731_v20  ;;  %v202_v29 = vsel %vm65_vm0, %v746_v28, %v745_v26  ;;  %v747_v30 = vld [vmem:[%s1502_s0 + $0x86] ss:$16 sm:%s204_s2]   ;;  %s232_s15 = smov 192  ;;  %s264_s16 = smov 3 }
   0xd   :  { %v734_v25 = vld [vmem:[%s1502_s0 + $0x8f] ss:$16 sm:%s141_s19]   ;;  %v139_v27 = vsel %vm70_vm1, %v733_v22, %v134_v24  ;;  %v750_v31 = vld [vmem:[%s1502_s0 + $0x8e] ss:$16 sm:%s219_s5]   ;;  %s267_s17 = smov 12  ;;  %v207_v34 = vsel %vm70_vm1, %v747_v30, %v202_v29  ;;  %s272_s22 = smov 48 }
   0xe   :  { %99 = vrot.lane.b32.xlu0 %v98_v23, %s857_s29  ;;  %v144_v32 = vsel %vm75_vm2, %v734_v25, %v139_v27  ;;  %v751_v33 = vld [vmem:[%s1502_s0 + $0x8e] ss:$16 sm:%s222_s6]   ;;  %s151_s23 = smov 3  ;;  %s154_s27 = smov 12 }
   0xf   :  { %v748_v35 = vld [vmem:[%s1502_s0 + $0x86] ss:$16 sm:%s209_s9]   ;;  %v225_v36 = vsel %vm65_vm0, %v751_v33, %v750_v31  ;;  %v752_v37 = vld [vmem:[%s1502_s0 + $0x8e] ss:$16 sm:%s227_s12]   ;;  %s159_s28 = smov 48  ;;  %s164_s5 = smov 192 }
  0x10   :  { %v753_v38 = vld [vmem:[%s1502_s0 + $0x8e] ss:$16 sm:%s232_s15]   ;;  %v759_v39 = vld [vmem:[%s1502_s0 + $0xd] ss:$16 sm:%s264_s16]   ;;  %s287_s6 = smov 3  ;;  %v212_v42 = vsel %vm75_vm2, %v748_v35, %v207_v34  ;;  %v230_v43 = vsel %vm70_vm1, %v752_v37, %v225_v36  ;;  %s290_s11 = smov 12 }
  0x11   :  { %v760_v40 = vld [vmem:[%s1502_s0 + $0xd] ss:$16 sm:%s267_s17]   ;;  %v736_v41 = vld [vmem:[%s1502_s0 + $0x6] ss:$16 sm:%s151_s23]   ;;  %s277_s14 = smov 192  ;;  %s295_s21 = smov 48  ;;  %v235_v53 = vsel %vm75_vm2, %v753_v38, %v230_v43 }
  0x12   :  { %145 = vrot.lane.b32.xlu1 %v144_v32, %s857_s29  ;;  %v737_v44 = vld [vmem:[%s1502_s0 + $0x6] ss:$16 sm:%s154_s27]   ;;  %v270_v49 = vsel %vm65_vm0, %v760_v40, %v759_v39  ;;  %s858_s23 = smov 96   ;;  %s300_s29 = smov 192 }
  0x13   :  { %v738_v45 = vld [vmem:[%s1502_s0 + $0x6] ss:$16 sm:%s159_s28]   ;;  %v761_v46 = vld [vmem:[%s1502_s0 + $0xd] ss:$16 sm:%s272_s22]   ;;  %v157_v47 = vsel %vm65_vm0, %v737_v44, %v736_v41  ;;  %s333_s22 = smov 3  ;;  %s336_s24 = smov 12 }
  0x14   :  { %v739_v48 = vld [vmem:[%s1502_s0 + $0x6] ss:$16 sm:%s164_s5]   ;;  %v162_v50 = vsel %vm70_vm1, %v738_v45, %v157_v47  ;;  %v764_v51 = vld [vmem:[%s1502_s0 + $0x85] ss:$16 sm:%s287_s6]   ;;  %s173_s27 = smov 3  ;;  %s176_s28 = smov 12  ;;  %v275_v56 = vsel %vm70_vm1, %v761_v46, %v270_v49 }
  0x15   :  { %v765_v52 = vld [vmem:[%s1502_s0 + $0x85] ss:$16 sm:%s290_s11]   ;;  %v167_v54 = vsel %vm75_vm2, %v739_v48, %v162_v50  ;;  %v762_v55 = vld [vmem:[%s1502_s0 + $0xd] ss:$16 sm:%s277_s14]   ;;  %s181_s5 = smov 48  ;;  %s186_s6 = smov 192 }
  0x16   :  { %213 = vrot.lane.b32.xlu0 %v212_v42, %s858_s23  ;;  %168 = vrot.lane.b32.xlu2 %v167_v54, %s858_s23  ;;  %v293_v57 = vsel %vm65_vm0, %v765_v52, %v764_v51  ;;  %v766_v58 = vld [vmem:[%s1502_s0 + $0x85] ss:$16 sm:%s295_s21]   ;;  %s341_s11 = smov 48  ;;  %s355_s16 = smov 3  ;;  %v280_v0 = vsel %vm75_vm2, %v762_v55, %v275_v56 }
  0x17   :  { %v774_v59 = vld [vmem:[%s1502_s0 + $0x4] ss:$16 sm:%s333_s22]   ;;  %v767_v60 = vld [vmem:[%s1502_s0 + $0x85] ss:$16 sm:%s300_s29]   ;;  %s358_s17 = smov 12  ;;  %v298_v1 = vsel %vm70_vm1, %v766_v58, %v293_v57  ;;  %s346_s18 = smov 192 }
  0x18   :  { %v775_v61 = vld [vmem:[%s1502_s0 + $0x4] ss:$16 sm:%s336_s24]   ;;  %v740_v62 = vld [vmem:[%s1502_s0 + $0xe] ss:$16 sm:%s173_s27]   ;;  %s363_s25 = smov 48  ;;  %s401_s2 = smov 3  ;;  %v303_v11 = vsel %vm75_vm2, %v767_v60, %v298_v1 }
  0x19   :  { %v741_v63 = vld [vmem:[%s1502_s0 + $0xe] ss:$16 sm:%s176_s28]   ;;  %v776_v5 = vld [vmem:[%s1502_s0 + $0x4] ss:$16 sm:%s341_s11]   ;;  %v339_v7 = vsel %vm65_vm0, %v775_v61, %v774_v59  ;;  %s404_s3 = smov 12  ;;  %s859_s4 = smov 80  }
  0x1a   :  { %236 = vrot.lane.b32.xlu1 %v235_v53, %s858_s23  ;;  %v179_v2 = vsel %vm65_vm0, %v741_v63, %v740_v62  ;;  %v742_v3 = vld [vmem:[%s1502_s0 + $0xe] ss:$16 sm:%s181_s5]   ;;  %s242_s7 = smov 3  ;;  %s245_s9 = smov 12  ;;  %v344_v14 = vsel %vm70_vm1, %v776_v5, %v339_v7 }
  0x1b   :  { %v743_v4 = vld [vmem:[%s1502_s0 + $0xe] ss:$16 sm:%s186_s6]   ;;  %v184_v6 = vsel %vm70_vm1, %v742_v3, %v179_v2  ;;  %v778_v9 = vld [vmem:[%s1502_s0 + $0xc] ss:$16 sm:%s355_s16]   ;;  %s250_s10 = smov 48  ;;  %s368_s11 = smov 192 }
  0x1c   :  { %v189_v8 = vsel %vm75_vm2, %v743_v4, %v184_v6  ;;  %v779_v10 = vld [vmem:[%s1502_s0 + $0xc] ss:$16 sm:%s358_s17]   ;;  %v777_v12 = vld [vmem:[%s1502_s0 + $0x4] ss:$16 sm:%s346_s18]   ;;  %s255_s16 = smov 192  ;;  %s409_s17 = smov 48 }
  0x1d   :  { %v780_v13 = vld [vmem:[%s1502_s0 + $0xc] ss:$16 sm:%s363_s25]   ;;  %v361_v15 = vsel %vm65_vm0, %v779_v10, %v778_v9  ;;  %v755_v18 = vld [vmem:[%s1502_s0 + $0x5] ss:$16 sm:%s242_s7]   ;;  %s424_s24 = smov 3  ;;  %s427_s25 = smov 12  ;;  %v349_v21 = vsel %vm75_vm2, %v777_v12, %v344_v14 }
  0x1e   :  { %281 = vrot.lane.b32.xlu0 %v280_v0, %s859_s4  ;;  %190 = vrot.lane.b32.xlu2 %v189_v8, %s858_s23  ;;  %v788_v16 = vld [vmem:[%s1502_s0 + $0x8c] ss:$16 sm:%s401_s2]   ;;  %v366_v22 = vsel %vm70_vm1, %v780_v13, %v361_v15  ;;  %s414_s28 = smov 192  ;;  %s432_s6 = smov 48 }
  0x1f   :  { %v789_v17 = vld [vmem:[%s1502_s0 + $0x8c] ss:$16 sm:%s404_s3]   ;;  %v756_v19 = vld [vmem:[%s1502_s0 + $0x5] ss:$16 sm:%s245_s9]   ;;  %s469_s7 = smov 3  ;;  %s310_s12 = smov 3 }
  0x20   :  { %v757_v20 = vld [vmem:[%s1502_s0 + $0x5] ss:$16 sm:%s250_s10]   ;;  %v781_v23 = vld [vmem:[%s1502_s0 + $0xc] ss:$16 sm:%s368_s11]   ;;  %v248_v24 = vsel %vm65_vm0, %v756_v19, %v755_v18  ;;  %v407_v28 = vsel %vm65_vm0, %v789_v17, %v788_v16  ;;  %s472_s11 = smov 12  ;;  %s860_s13 = smov 64  }
  0x21   :  { %v758_v25 = vld [vmem:[%s1502_s0 + $0x5] ss:$16 sm:%s255_s16]   ;;  %v790_v26 = vld [vmem:[%s1502_s0 + $0x8c] ss:$16 sm:%s409_s17]   ;;  %v253_v27 = vsel %vm70_vm1, %v757_v20, %v248_v24  ;;  %v371_v32 = vsel %vm75_vm2, %v781_v23, %v366_v22  ;;  %s313_s16 = smov 12  ;;  %s318_s19 = smov 48 }
  0x22   :  { %304 = vrot.lane.b32.xlu1 %v303_v11, %s859_s4  ;;  %v258_v29 = vsel %vm75_vm2, %v758_v25, %v253_v27  ;;  %v793_v30 = vld [vmem:[%s1502_s0 + $0x3] ss:$16 sm:%s424_s24]   ;;  %s323_s20 = smov 192  ;;  %v412_v35 = vsel %vm70_vm1, %v790_v26, %v407_v28  ;;  %s437_s21 = smov 192 }
  0x23   :  { %v794_v31 = vld [vmem:[%s1502_s0 + $0x3] ss:$16 sm:%s427_s25]   ;;  %v791_v33 = vld [vmem:[%s1502_s0 + $0x8c] ss:$16 sm:%s414_s28]   ;;  %s477_s28 = smov 48  ;;  %s492_s23 = smov 3 }
  0x24   :  { %v795_v34 = vld [vmem:[%s1502_s0 + $0x3] ss:$16 sm:%s432_s6]   ;;  %v430_v36 = vsel %vm65_vm0, %v794_v31, %v793_v30  ;;  %v769_v39 = vld [vmem:[%s1502_s0 + $0x8d] ss:$16 sm:%s310_s12]   ;;  %s495_s8 = smov 12  ;;  %v417_v44 = vsel %vm75_vm2, %v791_v33, %v412_v35  ;;  %s500_s15 = smov 48 }
  0x25   :  { %v802_v37 = vld [vmem:[%s1502_s0 + $0x83] ss:$16 sm:%s469_s7]   ;;  %v770_v40 = vld [vmem:[%s1502_s0 + $0x8d] ss:$16 sm:%s313_s16]   ;;  %v435_v45 = vsel %vm70_vm1, %v795_v34, %v430_v36  ;;  %s537_s16 = smov 3  ;;  %s381_s22 = smov 12 }
  0x26   :  { %350 = vrot.lane.b32.xlu0 %v349_v21, %s860_s13  ;;  %259 = vrot.lane.b32.xlu2 %v258_v29, %s859_s4  ;;  %v803_v38 = vld [vmem:[%s1502_s0 + $0x83] ss:$16 sm:%s472_s11]   ;;  %v316_v41 = vsel %vm65_vm0, %v770_v40, %v769_v39  ;;  %s482_s11 = smov 192  ;;  %s386_s25 = smov 48 }
  0x27   :  { %v771_v42 = vld [vmem:[%s1502_s0 + $0x8d] ss:$16 sm:%s318_s19]   ;;  %v796_v46 = vld [vmem:[%s1502_s0 + $0x3] ss:$16 sm:%s437_s21]   ;;  %v475_v50 = vsel %vm65_vm0, %v803_v38, %v802_v37  ;;  %s378_s21 = smov 3  ;;  %s540_s27 = smov 12 }
  0x28   :  { %v772_v43 = vld [vmem:[%s1502_s0 + $0x8d] ss:$16 sm:%s323_s20]   ;;  %v321_v47 = vsel %vm70_vm1, %v771_v42, %v316_v41  ;;  %v804_v48 = vld [vmem:[%s1502_s0 + $0x83] ss:$16 sm:%s477_s28]   ;;  %v440_v53 = vsel %vm75_vm2, %v796_v46, %v435_v45  ;;  %s391_s28 = smov 192  ;;  %s505_s30 = smov 192 }
  0x29   :  { %v326_v49 = vsel %vm75_vm2, %v772_v43, %v321_v47  ;;  %v807_v51 = vld [vmem:[%s1502_s0 + $0x8b] ss:$16 sm:%s492_s23]   ;;  %v805_v54 = vld [vmem:[%s1502_s0 + $0x83] ss:$16 sm:%s482_s11]   ;;  %v480_v56 = vsel %vm70_vm1, %v804_v48, %v475_v50  ;;  %s545_s9 = smov 48  ;;  %s560_s17 = smov 3 }
  0x2a   :  { %372 = vrot.lane.b32.xlu1 %v371_v32, %s860_s13  ;;  %v808_v52 = vld [vmem:[%s1502_s0 + $0x8b] ss:$16 sm:%s495_s8]   ;;  %s861_s8 = smov 48   ;;  %s563_s18 = smov 12  ;;  %v485_v2 = vsel %vm75_vm2, %v805_v54, %v480_v56 }
  0x2b   :  { %v809_v55 = vld [vmem:[%s1502_s0 + $0x8b] ss:$16 sm:%s500_s15]   ;;  %v498_v57 = vsel %vm65_vm0, %v808_v52, %v807_v51  ;;  %v816_v58 = vld [vmem:[%s1502_s0 + $0xa] ss:$16 sm:%s537_s16]   ;;  %s454_s2 = smov 48  ;;  %s459_s23 = smov 192 }
  0x2c   :  { %v783_v59 = vld [vmem:[%s1502_s0 + $0x84] ss:$16 sm:%s378_s21]   ;;  %v817_v63 = vld [vmem:[%s1502_s0 + $0xa] ss:$16 sm:%s540_s27]   ;;  %v503_v3 = vsel %vm70_vm1, %v809_v55, %v498_v57  ;;  %s550_s21 = smov 192  ;;  %s573_s12 = smov 192 }
  0x2d   :  { %v784_v60 = vld [vmem:[%s1502_s0 + $0x84] ss:$16 sm:%s381_s22]   ;;  %v810_v4 = vld [vmem:[%s1502_s0 + $0x8b] ss:$16 sm:%s505_s30]   ;;  %s568_s22 = smov 48  ;;  %v543_v7 = vsel %vm65_vm0, %v817_v63, %v816_v58  ;;  %s449_s30 = smov 12 }
  0x2e   :  { %418 = vrot.lane.b32.xlu0 %v417_v44, %s860_s13  ;;  %327 = vrot.lane.b32.xlu2 %v326_v49, %s859_s4  ;;  %v384_v61 = vsel %vm65_vm0, %v784_v60, %v783_v59  ;;  %v785_v62 = vld [vmem:[%s1502_s0 + $0x84] ss:$16 sm:%s386_s25]   ;;  %s446_s25 = smov 3  ;;  %v508_v10 = vsel %vm75_vm2, %v810_v4, %v503_v3  ;;  %s631_s4 = smov 12 }
  0x2f   :  { %v389_v0 = vsel %vm70_vm1, %v785_v62, %v384_v61  ;;  %v786_v1 = vld [vmem:[%s1502_s0 + $0x84] ss:$16 sm:%s391_s28]   ;;  %v818_v5 = vld [vmem:[%s1502_s0 + $0xa] ss:$16 sm:%s545_s9]   ;;  %s609_s9 = smov 12  ;;  %s619_s28 = smov 192 }
  0x30   :  { %v394_v6 = vsel %vm75_vm2, %v786_v1, %v389_v0  ;;  %v821_v8 = vld [vmem:[%s1502_s0 + $0x82] ss:$16 sm:%s560_s17]   ;;  %v819_v11 = vld [vmem:[%s1502_s0 + $0xa] ss:$16 sm:%s550_s21]   ;;  %v548_v14 = vsel %vm70_vm1, %v818_v5, %v543_v7  ;;  %s518_s5 = smov 12  ;;  %s523_s10 = smov 48 }
  0x31   :  { %v822_v9 = vld [vmem:[%s1502_s0 + $0x82] ss:$16 sm:%s563_s18]   ;;  %v797_v13 = vld [vmem:[%s1502_s0 + $0xb] ss:$16 sm:%s446_s25]   ;;  %s614_s18 = smov 48  ;;  %s628_s25 = smov 3  ;;  %v553_v23 = vsel %vm75_vm2, %v819_v11, %v548_v14 }
  0x32   :  { %441 = vrot.lane.b32.xlu1 %v440_v53, %s861_s8  ;;  %v823_v12 = vld [vmem:[%s1502_s0 + $0x82] ss:$16 sm:%s568_s22]   ;;  %v566_v15 = vsel %vm65_vm0, %v822_v9, %v821_v8  ;;  %s862_s11 = smov 32   ;;  %s641_s15 = smov 192 }
  0x33   :  { %v798_v16 = vld [vmem:[%s1502_s0 + $0xb] ss:$16 sm:%s449_s30]   ;;  %v832_v21 = vld [vmem:[%s1502_s0 + $0x1] ss:$16 sm:%s609_s9]   ;;  %v571_v24 = vsel %vm70_vm1, %v823_v12, %v566_v15  ;;  %s515_s30 = smov 3  ;;  %s636_s9 = smov 48 }
  0x34   :  { %v799_v17 = vld [vmem:[%s1502_s0 + $0xb] ss:$16 sm:%s454_s2]   ;;  %v452_v18 = vsel %vm65_vm0, %v798_v16, %v797_v13  ;;  %v824_v25 = vld [vmem:[%s1502_s0 + $0x82] ss:$16 sm:%s573_s12]   ;;  %s677_s19 = smov 12  ;;  %s586_s26 = smov 12 }
  0x35   :  { %v800_v19 = vld [vmem:[%s1502_s0 + $0xb] ss:$16 sm:%s459_s23]   ;;  %v457_v22 = vsel %vm70_vm1, %v799_v17, %v452_v18  ;;  %v833_v26 = vld [vmem:[%s1502_s0 + $0x1] ss:$16 sm:%s614_s18]   ;;  %v576_v31 = vsel %vm75_vm2, %v824_v25, %v571_v24  ;;  %s528_s18 = smov 192  ;;  %s682_s23 = smov 48 }
  0x36   :  { %486 = vrot.lane.b32.xlu0 %v485_v2, %s861_s8  ;;  %395 = vrot.lane.b32.xlu2 %v394_v6, %s860_s13  ;;  %s606_s13 = smov 3  ;;  %v462_v27 = vsel %vm75_vm2, %v800_v19, %v457_v22  ;;  %v835_v29 = vld [vmem:[%s1502_s0 + $0x9] ss:$16 sm:%s628_s25]   ;;  %s591_s14 = smov 48 }
  0x37   :  { %v831_v20 = vld [vmem:[%s1502_s0 + $0x1] ss:$16 sm:%s606_s13]   ;;  %v836_v30 = vld [vmem:[%s1502_s0 + $0x9] ss:$16 sm:%s631_s4]   ;;  %s583_s4 = smov 3  ;;  %s687_s17 = smov 192 }
  0x38   :  { %v612_v28 = vsel %vm65_vm0, %v832_v21, %v831_v20  ;;  %v834_v32 = vld [vmem:[%s1502_s0 + $0x1] ss:$16 sm:%s619_s28]   ;;  %v812_v33 = vld [vmem:[%s1502_s0 + $0x2] ss:$16 sm:%s515_s30]   ;;  %v634_v36 = vsel %vm65_vm0, %v836_v30, %v835_v29  ;;  %s596_s20 = smov 192  ;;  %s651_s29 = smov 3 }
  0x39   :  { %v813_v34 = vld [vmem:[%s1502_s0 + $0x2] ss:$16 sm:%s518_s5]   ;;  %v617_v35 = vsel %vm70_vm1, %v833_v26, %v612_v28  ;;  %v837_v37 = vld [vmem:[%s1502_s0 + $0x9] ss:$16 sm:%s636_s9]   ;;  %s654_s24 = smov 12  ;;  %s659_s2 = smov 48 }
  0x3a   :  { %509 = vrot.lane.b32.xlu1 %v508_v10, %s861_s8  ;;  %v521_v38 = vsel %vm65_vm0, %v813_v34, %v812_v33  ;;  %v814_v39 = vld [vmem:[%s1502_s0 + $0x2] ss:$16 sm:%s523_s10]   ;;  %v622_v45 = vsel %vm75_vm2, %v834_v32, %v617_v35  ;;  %v639_v46 = vsel %vm70_vm1, %v837_v37, %v634_v36  ;;  %s664_s6 = smov 192  ;;  %v2_v4 = vld [vmem:[%s1502_s0] ss:$8 sm:$0xf]  }
  0x3b   :  { %v838_v40 = vld [vmem:[%s1502_s0 + $0x9] ss:$16 sm:%s641_s15]   ;;  %v526_v41 = vsel %vm70_vm1, %v814_v39, %v521_v38  ;;  %v815_v42 = vld [vmem:[%s1502_s0 + $0x2] ss:$16 sm:%s528_s18]   ;;  %s863_s18 = smov 16  }
  0x3c   :  { %v846_v44 = vld [vmem:[%s1502_s0 + $0x89] ss:$16 sm:%s677_s19]   ;;  %v826_v47 = vld [vmem:[%s1502_s0 + $0x8a] ss:$16 sm:%s583_s4]   ;;  %v531_v49 = vsel %vm75_vm2, %v815_v42, %v526_v41  ;;  %v644_v52 = vsel %vm75_vm2, %v838_v40, %v639_v46 }
  0x3d   :  { %v827_v48 = vld [vmem:[%s1502_s0 + $0x8a] ss:$16 sm:%s586_s26]   ;;  %v847_v51 = vld [vmem:[%s1502_s0 + $0x89] ss:$16 sm:%s682_s23]  }
  0x3e   :  { %554 = vrot.lane.b32.xlu0 %v553_v23, %s862_s11  ;;  %463 = vrot.lane.b32.xlu2 %v462_v27, %s861_s8  ;;  %s674_s8 = smov 3  ;;  %v589_v53 = vsel %vm65_vm0, %v827_v48, %v826_v47  ;;  %v828_v54 = vld [vmem:[%s1502_s0 + $0x8a] ss:$16 sm:%s591_s14]  }
  0x3f   :  { %v845_v43 = vld [vmem:[%s1502_s0 + $0x89] ss:$16 sm:%s674_s8]   ;;  %v594_v57 = vsel %vm70_vm1, %v828_v54, %v589_v53  ;;  %v829_v58 = vld [vmem:[%s1502_s0 + $0x8a] ss:$16 sm:%s596_s20]  }
  0x40   :  { %v680_v50 = vsel %vm65_vm0, %v846_v44, %v845_v43  ;;  %v848_v56 = vld [vmem:[%s1502_s0 + $0x89] ss:$16 sm:%s687_s17]   ;;  %v840_v60 = vld [vmem:[%s1502_s0 + $0x81] ss:$16 sm:%s651_s29]   ;;  %v599_v62 = vsel %vm75_vm2, %v829_v58, %v594_v57 }
  0x41   :  { %v685_v55 = vsel %vm70_vm1, %v847_v51, %v680_v50  ;;  %v841_v61 = vld [vmem:[%s1502_s0 + $0x81] ss:$16 sm:%s654_s24]   ;;  %v3_v5 = vld [vmem:[%s1502_s0] ss:$8 sm:$0xf0]  }
  0x42   :  { %577 = vrot.lane.b32.xlu1 %v576_v31, %s862_s11  ;;  %v690_v59 = vsel %vm75_vm2, %v848_v56, %v685_v55  ;;  %v657_v63 = vsel %vm65_vm0, %v841_v61, %v840_v60  ;;  %v842_v0 = vld [vmem:[%s1502_s0 + $0x81] ss:$16 sm:%s659_s2]   ;;  %v5_v6 = vsel %vm4_vm3, %v3_v5, %v2_v4  ;;  %v699_v7 = vld [vmem:[%s1502_s0 + $0x40] ss:$8 sm:$0xf]  }
  0x43   :  { %v662_v1 = vsel %vm70_vm1, %v842_v0, %v657_v63  ;;  %v843_v2 = vld [vmem:[%s1502_s0 + $0x81] ss:$16 sm:%s664_s6]   ;;  %7 = vst.msk [vmem:[%s1503_s1] ss:$8 sm:$0x3] %vm6_vm4, %v5_v6  }
  0x44   :  { %v667_v3 = vsel %vm75_vm2, %v843_v2, %v662_v1  ;;  %v700_v8 = vld [vmem:[%s1502_s0 + $0x40] ss:$8 sm:$0xf0]   ;;  %696 = vst.msk [vmem:[%s1503_s1 - $0xf] ss:$8 sm:$0xc] %vm6_vm4, %v5_v6  }
  0x45   :  { %v19_v9 = vsel %vm4_vm3, %v700_v8, %v699_v7  ;;  %697 = vst.msk [vmem:[%s1503_s1 - $0x1e] ss:$8 sm:$0x30] %vm6_vm4, %v5_v6   ;;  %v705_v10 = vld [vmem:[%s1502_s0 + $0x80] ss:$8 sm:$0xf]  }
  0x46   :  { %623 = vrot.lane.b32.xlu0 %v622_v45, %s863_s18  ;;  %532 = vrot.lane.b32.xlu2 %v531_v49, %s862_s11  ;;  %698 = vst.msk [vmem:[%s1503_s1 - $0x2d] ss:$8 sm:$0xc0] %vm6_vm4, %v5_v6   ;;  %v706_v11 = vld [vmem:[%s1502_s0 + $0x80] ss:$8 sm:$0xf0]  }
  0x47   :  { %701 = vst.msk [vmem:[%s1503_s1 + $0x4] ss:$8 sm:$0x3] %vm6_vm4, %v19_v9   ;;  %v34_v12 = vsel %vm4_vm3, %v706_v11, %v705_v10  ;;  %v711_v13 = vld [vmem:[%s1502_s0 + $0xc0] ss:$8 sm:$0xf]  }
  0x48   :  { %702 = vst.msk [vmem:[%s1503_s1 - $0xb] ss:$8 sm:$0xc] %vm6_vm4, %v19_v9   ;;  %v712_v14 = vld [vmem:[%s1502_s0 + $0xc0] ss:$8 sm:$0xf0]  }
  0x49   :  { %703 = vst.msk [vmem:[%s1503_s1 - $0x1a] ss:$8 sm:$0x30] %vm6_vm4, %v19_v9   ;;  %v49_v15 = vsel %vm4_vm3, %v712_v14, %v711_v13 }
  0x4a   :  { %645 = vrot.lane.b32.xlu1 %v644_v52, %s863_s18  ;;  %704 = vst.msk [vmem:[%s1503_s1 - $0x29] ss:$8 sm:$0xc0] %vm6_vm4, %v19_v9  }
  0x4b   :  { %707 = vst.msk [vmem:[%s1503_s1 + $0x10] ss:$8 sm:$0x3] %vm6_vm4, %v34_v12  }
  0x4c   :  { %708 = vst.msk [vmem:[%s1503_s1 + $0x1] ss:$8 sm:$0xc] %vm6_vm4, %v34_v12  }
  0x4d   :  { %709 = vst.msk [vmem:[%s1503_s1 - $0xe] ss:$8 sm:$0x30] %vm6_vm4, %v34_v12  }
  0x4e   :  { %691 = vrot.lane.b32.xlu0 %v690_v59, %s863_s18  ;;  %600 = vrot.lane.b32.xlu2 %v599_v62, %s862_s11  ;;  %710 = vst.msk [vmem:[%s1503_s1 - $0x1d] ss:$8 sm:$0xc0] %vm6_vm4, %v34_v12  }
  0x4f   :  { %713 = vst.msk [vmem:[%s1503_s1 + $0x14] ss:$8 sm:$0x3] %vm6_vm4, %v49_v15  }
  0x50   :  { %714 = vst.msk [vmem:[%s1503_s1 + $0x5] ss:$8 sm:$0xc] %vm6_vm4, %v49_v15  }
  0x51   :  { %715 = vst.msk [vmem:[%s1503_s1 - $0xa] ss:$8 sm:$0x30] %vm6_vm4, %v49_v15  }
  0x52   :  { %716 = vst.msk [vmem:[%s1503_s1 - $0x19] ss:$8 sm:$0xc0] %vm6_vm4, %v49_v15  }
  0x56   :  { %668 = vrot.lane.b32.xlu2 %v667_v3, %s863_s18 }
  0x70   :  { %v169_v16 = vpop.permute.xlu2 %168  }
  0x78   :  { %v78_v17 = vpop.permute.xlu0 %77   ;;  %v191_v18 = vpop.permute.xlu2 %190  }
  0x79   :  { %80 = vst.msk [vmem:[%s1503_s1] sm:$0xff] %vm79_vm5, %v78_v17  }
  0x7a   :  { %171 = vst.msk [vmem:[%s1503_s1] sm:$0xff] %vm170_vm6, %v169_v16  }
  0x7c   :  { %v123_v19 = vpop.permute.xlu1 %122  }
  0x7d   :  { %730 = vst.msk [vmem:[%s1503_s1 + $0x10] sm:$0xff] %vm79_vm5, %v123_v19  }
  0x80   :  { %v100_v20 = vpop.permute.xlu0 %99   ;;  %v260_v21 = vpop.permute.xlu2 %259  }
  0x81   :  { %725 = vst.msk [vmem:[%s1503_s1 + $0x8] sm:$0xff] %vm79_vm5, %v100_v20  }
  0x82   :  { %744 = vst.msk [vmem:[%s1503_s1 + $0x8] sm:$0xff] %vm170_vm6, %v191_v18  }
  0x83   :  { %262 = vst.msk [vmem:[%s1503_s1] sm:$0xff] %vm261_vm7, %v260_v21  }
  0x84   :  { %v146_v22 = vpop.permute.xlu1 %145  }
  0x85   :  { %735 = vst.msk [vmem:[%s1503_s1 + $0x18] sm:$0xff] %vm79_vm5, %v146_v22  }
  0x88   :  { %v214_v23 = vpop.permute.xlu0 %213   ;;  %v328_v24 = vpop.permute.xlu2 %327  }
  0x89   :  { %749 = vst.msk [vmem:[%s1503_s1 + $0x10] sm:$0xff] %vm170_vm6, %v214_v23  }
  0x8c   :  { %v237_v25 = vpop.permute.xlu1 %236  }
  0x8d   :  { %754 = vst.msk [vmem:[%s1503_s1 + $0x18] sm:$0xff] %vm170_vm6, %v237_v25  }
  0x8e   :  { %773 = vst.msk [vmem:[%s1503_s1 + $0x18] sm:$0xff] %vm261_vm7, %v328_v24  }
  0x90   :  { %v282_v26 = vpop.permute.xlu0 %281   ;;  %v396_v27 = vpop.permute.xlu2 %395  }
  0x91   :  { %763 = vst.msk [vmem:[%s1503_s1 + $0x8] sm:$0xff] %vm261_vm7, %v282_v26  }
  0x94   :  { %v305_v28 = vpop.permute.xlu1 %304  }
  0x95   :  { %768 = vst.msk [vmem:[%s1503_s1 + $0x10] sm:$0xff] %vm261_vm7, %v305_v28  }
  0x96   :  { %787 = vst.msk [vmem:[%s1503_s1 + $0x10] sm:$0xff] %vm352_vm8, %v396_v27  }
  0x98   :  { %v351_v29 = vpop.permute.xlu0 %350   ;;  %v464_v30 = vpop.permute.xlu2 %463  }
  0x99   :  { %353 = vst.msk [vmem:[%s1503_s1] sm:$0xff] %vm352_vm8, %v351_v29  }
  0x9c   :  { %v373_v31 = vpop.permute.xlu1 %372  }
  0x9d   :  { %782 = vst.msk [vmem:[%s1503_s1 + $0x8] sm:$0xff] %vm352_vm8, %v373_v31  }
  0x9e   :  { %801 = vst.msk [vmem:[%s1503_s1 + $0x8] sm:$0xff] %vm443_vm9, %v464_v30  }
  0xa0   :  { %v419_v32 = vpop.permute.xlu0 %418   ;;  %v533_v33 = vpop.permute.xlu2 %532  }
  0xa1   :  { %792 = vst.msk [vmem:[%s1503_s1 + $0x18] sm:$0xff] %vm352_vm8, %v419_v32  }
  0xa4   :  { %v442_v34 = vpop.permute.xlu1 %441  }
  0xa5   :  { %444 = vst.msk [vmem:[%s1503_s1] sm:$0xff] %vm443_vm9, %v442_v34  }
  0xa6   :  { %535 = vst.msk [vmem:[%s1503_s1] sm:$0xff] %vm534_vm10, %v533_v33  }
  0xa8   :  { %v487_v35 = vpop.permute.xlu0 %486   ;;  %v601_v36 = vpop.permute.xlu2 %600  }
  0xa9   :  { %806 = vst.msk [vmem:[%s1503_s1 + $0x10] sm:$0xff] %vm443_vm9, %v487_v35  }
  0xac   :  { %v510_v37 = vpop.permute.xlu1 %509  }
  0xad   :  { %811 = vst.msk [vmem:[%s1503_s1 + $0x18] sm:$0xff] %vm443_vm9, %v510_v37  }
  0xae   :  { %830 = vst.msk [vmem:[%s1503_s1 + $0x18] sm:$0xff] %vm534_vm10, %v601_v36  }
  0xb0   :  { %v555_v38 = vpop.permute.xlu0 %554   ;;  %v669_v39 = vpop.permute.xlu2 %668  }
  0xb1   :  { %820 = vst.msk [vmem:[%s1503_s1 + $0x8] sm:$0xff] %vm534_vm10, %v555_v38  }
  0xb4   :  { %v578_v40 = vpop.permute.xlu1 %577  }
  0xb5   :  { %825 = vst.msk [vmem:[%s1503_s1 + $0x10] sm:$0xff] %vm534_vm10, %v578_v40  }
  0xb6   :  { %844 = vst.msk [vmem:[%s1503_s1 + $0x10] sm:$0xff] %vm625_vm11, %v669_v39  }
  0xb8   :  { %v624_v41 = vpop.permute.xlu0 %623  }
  0xb9   :  { %626 = vst.msk [vmem:[%s1503_s1] sm:$0xff] %vm625_vm11, %v624_v41  }
  0xbc   :  { %v646_v42 = vpop.permute.xlu1 %645  }
  0xbd   :  { %839 = vst.msk [vmem:[%s1503_s1 + $0x8] sm:$0xff] %vm625_vm11, %v646_v42  }
  0xc0   :  { %v692_v43 = vpop.permute.xlu0 %691  }
  0xc1   :  { %849 = vst.msk [vmem:[%s1503_s1 + $0x18] sm:$0xff] %vm625_vm11, %v692_v43  }

// kernel: attention_forward.1
= control target key start
LH: loop header
LB: loop body
LE: loop exit
PB: predicated region body
PF: predicated region fallthrough
CT: control target
= control target key end

     0   :  { %s7923_s1 = inlined_call_operand.vmem [shape: bf16[256,1024], index: 1, kind: input, shape index: {}]   ;;  %s7924_s0 = inlined_call_operand.vmem [shape: f32[2,16,256], index: 0, kind: input, shape index: {}]   ;;  %s7925_s2 = inlined_call_operand.vmem [shape: bf16[3,16,16,256], index: 2, kind: input, shape index: {}]   ;;  %s7926_s3 = inlined_call_operand.vmem [shape: f32[16,256], index: 3, kind: input, shape index: {}]   ;;  %s7927_s4 = inlined_call_operand.vmem [shape: bf16[256,256], index: 4, kind: input, shape index: {}]   ;;  %s7928_s6 = inlined_call_operand.vmem [shape: f32[1,256], index: 6, kind: input, shape index: {}]   ;;  %s7929_s7 = inlined_call_operand.vmem [shape: bf16[256,256], index: 7, kind: input, shape index: {}]   ;;  %s7930_s5 = inlined_call_operand.vmem [shape: f32[1,256], index: 5, kind: input, shape index: {}]   ;;  %s7931_s8 = inlined_call_operand.vmem [shape: f32[1,256], index: 8, kind: input, shape index: {}]   ;;  %s7932_s9 = inlined_call_operand.vmem [shape: f32[2,16,256], index: 9, kind: output, shape index: {}]  }
   0x1   :  { %v3451_v0 = vld [vmem:[%s7923_s1 + $0x1c0] sm:$0xf]  ;;  %v4143_v5 = vld [vmem:[%s7923_s1 + $0x1c4] sm:$0xf] }
   0x2   :  { %v4147_v1 = vld [vmem:[%s7923_s1 + $0x1dc] sm:$0xf0]  ;;  %v3453_v6 = vld [vmem:[%s7923_s1 + $0x1e0] sm:$0xf0] }
   0x3   :  { %v3707_v2 = vld [vmem:[%s7923_s1 + $0x3c0] sm:$0xf]  ;;  %v3452_v3 = vor.u32 %v4147_v1, %v3451_v0  ;;  %v3456_v8 = vor.u32 %v4143_v5, %v3453_v6  ;;  %v4207_v9 = vld [vmem:[%s7923_s1 + $0x3c4] sm:$0xf] }
   0x4   :  { %v4211_v4 = vld [vmem:[%s7923_s1 + $0x3dc] sm:$0xf0]  ;;  %v3709_v10 = vld [vmem:[%s7923_s1 + $0x3e0] sm:$0xf0] }
   0x5   :  { %v3708_v7 = vor.u32 %v4211_v4, %v3707_v2  ;;  %v3419_v11 = vld [vmem:[%s7923_s1 + $0x180] sm:$0xf]  ;;  %812 = vmatpush.bf16.msra.mxu0 %v3452_v3  ;;  %v3712_v12 = vor.u32 %v4207_v9, %v3709_v10  ;;  %850 = vmatpush.bf16.msra.mxu2 %v3456_v8  ;;  %v4135_v18 = vld [vmem:[%s7923_s1 + $0x184] sm:$0xf] }
   0x6   :  { %v4139_v13 = vld [vmem:[%s7923_s1 + $0x19c] sm:$0xf0]  ;;  %v3421_v19 = vld [vmem:[%s7923_s1 + $0x1a0] sm:$0xf0] }
   0x7   :  { %v3675_v14 = vld [vmem:[%s7923_s1 + $0x380] sm:$0xf]  ;;  %831 = vmatpush.bf16.msra.mxu1 %v3708_v7  ;;  %v3420_v16 = vor.u32 %v4139_v13, %v3419_v11  ;;  %v4199_v20 = vld [vmem:[%s7923_s1 + $0x384] sm:$0xf]  ;;  %869 = vmatpush.bf16.msra.mxu3 %v3712_v12  ;;  %v3424_v21 = vor.u32 %v4135_v18, %v3421_v19 }
   0x8   :  { %v4203_v15 = vld [vmem:[%s7923_s1 + $0x39c] sm:$0xf0]  ;;  %v3677_v22 = vld [vmem:[%s7923_s1 + $0x3a0] sm:$0xf0] }
   0x9   :  { %v3676_v17 = vor.u32 %v4203_v15, %v3675_v14  ;;  %v3387_v23 = vld [vmem:[%s7923_s1 + $0x140] sm:$0xf]  ;;  %v3680_v25 = vor.u32 %v4199_v20, %v3677_v22  ;;  %v4127_v28 = vld [vmem:[%s7923_s1 + $0x144] sm:$0xf]  ;;  %813 = vmatpush.bf16.msra.mxu0 %v3420_v16  ;;  %851 = vmatpush.bf16.msra.mxu2 %v3424_v21 }
   0xa   :  { %v4131_v24 = vld [vmem:[%s7923_s1 + $0x15c] sm:$0xf0]  ;;  %v3389_v30 = vld [vmem:[%s7923_s1 + $0x160] sm:$0xf0] }
   0xb   :  { %v3643_v26 = vld [vmem:[%s7923_s1 + $0x340] sm:$0xf]  ;;  %v3388_v29 = vor.u32 %v4131_v24, %v3387_v23  ;;  %v4191_v31 = vld [vmem:[%s7923_s1 + $0x344] sm:$0xf]  ;;  %832 = vmatpush.bf16.msra.mxu1 %v3676_v17  ;;  %v3392_v34 = vor.u32 %v4127_v28, %v3389_v30  ;;  %870 = vmatpush.bf16.msra.mxu3 %v3680_v25  ;;  %v3461_v30 = vld [vmem:[%s7923_s1 + $0x1e8] sm:$0xf0] }
   0xc   :  { %v4195_v27 = vld [vmem:[%s7923_s1 + $0x35c] sm:$0xf0]  ;;  %v3645_v32 = vld [vmem:[%s7923_s1 + $0x360] sm:$0xf0] }
   0xd   :  { %v3644_v33 = vor.u32 %v4195_v27, %v3643_v26  ;;  %v3355_v35 = vld [vmem:[%s7923_s1 + $0x100] sm:$0xf]  ;;  %v3648_v38 = vor.u32 %v4191_v31, %v3645_v32  ;;  %v4119_v40 = vld [vmem:[%s7923_s1 + $0x104] sm:$0xf]  ;;  %814 = vmatpush.bf16.msra.mxu0 %v3388_v29  ;;  %852 = vmatpush.bf16.msra.mxu2 %v3392_v34  ;;  %v4144_v29 = vld [vmem:[%s7923_s1 + $0x1cc] sm:$0xf] }
   0xe   :  { %v4123_v36 = vld [vmem:[%s7923_s1 + $0x11c] sm:$0xf0]  ;;  %v3357_v41 = vld [vmem:[%s7923_s1 + $0x120] sm:$0xf0]  ;;  %v34_v32 = vld [vmem:[%s7924_s0 + $0x10] sm:$0xff] }
   0xf   :  { %v3611_v37 = vld [vmem:[%s7923_s1 + $0x300] sm:$0xf]  ;;  %v4183_v42 = vld [vmem:[%s7923_s1 + $0x304] sm:$0xf]  ;;  %v3356_v44 = vor.u32 %v4123_v36, %v3355_v35  ;;  %833 = vmatpush.bf16.msra.mxu1 %v3644_v33  ;;  %v3360_v46 = vor.u32 %v4119_v40, %v3357_v41  ;;  %871 = vmatpush.bf16.msra.mxu3 %v3648_v38  ;;  %v4208_v33 = vld [vmem:[%s7923_s1 + $0x3cc] sm:$0xf]  ;;  %v3464_v40 = vor.u32 %v4144_v29, %v3461_v30 }
  0x10   :  { %v4187_v39 = vld [vmem:[%s7923_s1 + $0x31c] sm:$0xf0]  ;;  %v3613_v43 = vld [vmem:[%s7923_s1 + $0x320] sm:$0xf0]  ;;  %v3717_v34 = vld [vmem:[%s7923_s1 + $0x3e8] sm:$0xf0] }
  0x11   :  { %v3612_v45 = vor.u32 %v4187_v39, %v3611_v37  ;;  %v3323_v47 = vld [vmem:[%s7923_s1 + $0xc0] sm:$0xf]  ;;  %v3616_v50 = vor.u32 %v4183_v42, %v3613_v43  ;;  %v4111_v52 = vld [vmem:[%s7923_s1 + $0xc4] sm:$0xf]  ;;  %815 = vmatpush.bf16.msra.mxu0 %v3356_v44  ;;  %853 = vmatpush.bf16.msra.mxu2 %v3360_v46  ;;  %v33_v37 = vld [vmem:[%s7924_s0 + $0x8] sm:$0xff] }
  0x12   :  { %v4115_v48 = vld [vmem:[%s7923_s1 + $0xdc] sm:$0xf0]  ;;  %v3325_v53 = vld [vmem:[%s7923_s1 + $0xe0] sm:$0xf0]  ;;  %v35_v38 = vld [vmem:[%s7924_s0 + $0x18] sm:$0xff] }
  0x13   :  { %v3579_v49 = vld [vmem:[%s7923_s1 + $0x2c0] sm:$0xf]  ;;  %v4175_v54 = vld [vmem:[%s7923_s1 + $0x2c4] sm:$0xf]  ;;  %v3324_v56 = vor.u32 %v4115_v48, %v3323_v47  ;;  %834 = vmatpush.bf16.msra.mxu1 %v3612_v45  ;;  %v3328_v58 = vor.u32 %v4111_v52, %v3325_v53  ;;  %872 = vmatpush.bf16.msra.mxu3 %v3616_v50  ;;  %v3459_v41 = vld [vmem:[%s7923_s1 + $0x1c8] sm:$0xf]  ;;  %v3720_v45 = vor.u32 %v4208_v33, %v3717_v34 }
  0x14   :  { %v4179_v51 = vld [vmem:[%s7923_s1 + $0x2dc] sm:$0xf0]  ;;  %v3581_v55 = vld [vmem:[%s7923_s1 + $0x2e0] sm:$0xf0]  ;;  %v4148_v42 = vld [vmem:[%s7923_s1 + $0x1e4] sm:$0xf0] }
  0x15   :  { %v3580_v57 = vor.u32 %v4179_v51, %v3579_v49  ;;  %v3291_v59 = vld [vmem:[%s7923_s1 + $0x80] sm:$0xf]  ;;  %v3584_v62 = vor.u32 %v4175_v54, %v3581_v55  ;;  %v4103_v0 = vld [vmem:[%s7923_s1 + $0x84] sm:$0xf]  ;;  %816 = vmatpush.bf16.msra.mxu0 %v3324_v56  ;;  %854 = vmatpush.bf16.msra.mxu2 %v3328_v58  ;;  %v3715_v43 = vld [vmem:[%s7923_s1 + $0x3c8] sm:$0xf]  ;;  %v4607_v49 = vpack.c.bf16 %v35_v38, %v33_v37 }
  0x16   :  { %v4107_v60 = vld [vmem:[%s7923_s1 + $0x9c] sm:$0xf0]  ;;  %v3293_v1 = vld [vmem:[%s7923_s1 + $0xa0] sm:$0xf0]  ;;  %v4212_v46 = vld [vmem:[%s7923_s1 + $0x3e4] sm:$0xf0]  ;;  %v3460_v52 = vor.u32 %v4148_v42, %v3459_v41 }
  0x17   :  { %v3547_v61 = vld [vmem:[%s7923_s1 + $0x280] sm:$0xf]  ;;  %v4167_v2 = vld [vmem:[%s7923_s1 + $0x284] sm:$0xf]  ;;  %v3292_v4 = vor.u32 %v4107_v60, %v3291_v59  ;;  %835 = vmatpush.bf16.msra.mxu1 %v3580_v57  ;;  %v3296_v6 = vor.u32 %v4103_v0, %v3293_v1  ;;  %873 = vmatpush.bf16.msra.mxu3 %v3584_v62  ;;  %v4136_v47 = vld [vmem:[%s7923_s1 + $0x18c] sm:$0xf]  ;;  %v3716_v53 = vor.u32 %v4212_v46, %v3715_v43 }
  0x18   :  { %v4171_v63 = vld [vmem:[%s7923_s1 + $0x29c] sm:$0xf0]  ;;  %v3549_v3 = vld [vmem:[%s7923_s1 + $0x2a0] sm:$0xf0]  ;;  %v3429_v48 = vld [vmem:[%s7923_s1 + $0x1a8] sm:$0xf0] }
  0x19   :  { %v3548_v5 = vor.u32 %v4171_v63, %v3547_v61  ;;  %v3259_v7 = vld [vmem:[%s7923_s1 + $0x40] sm:$0xf]  ;;  %v3552_v10 = vor.u32 %v4167_v2, %v3549_v3  ;;  %v4095_v12 = vld [vmem:[%s7923_s1 + $0x44] sm:$0xf]  ;;  %817 = vmatpush.bf16.msra.mxu0 %v3292_v4  ;;  %855 = vmatpush.bf16.msra.mxu2 %v3296_v6  ;;  %8121 = vst [vmem:[#allocation3_spill] sm:$0xff] %v4607_v49 }
  0x1a   :  { %v4099_v8 = vld [vmem:[%s7923_s1 + $0x5c] sm:$0xf0]  ;;  %v3261_v13 = vld [vmem:[%s7923_s1 + $0x60] sm:$0xf0]  ;;  %v4200_v50 = vld [vmem:[%s7923_s1 + $0x38c] sm:$0xf]  ;;  %v3432_v54 = vor.u32 %v4136_v47, %v3429_v48 }
  0x1b   :  { %v3515_v9 = vld [vmem:[%s7923_s1 + $0x240] sm:$0xf]  ;;  %v4159_v14 = vld [vmem:[%s7923_s1 + $0x244] sm:$0xf]  ;;  %v3260_v16 = vor.u32 %v4099_v8, %v3259_v7  ;;  %836 = vmatpush.bf16.msra.mxu1 %v3548_v5  ;;  %v3264_v20 = vor.u32 %v4095_v12, %v3261_v13  ;;  %874 = vmatpush.bf16.msra.mxu3 %v3552_v10  ;;  %v3685_v51 = vld [vmem:[%s7923_s1 + $0x3a8] sm:$0xf0] }
  0x1c   :  { %v4163_v11 = vld [vmem:[%s7923_s1 + $0x25c] sm:$0xf0]  ;;  %v3517_v15 = vld [vmem:[%s7923_s1 + $0x260] sm:$0xf0]  ;;  %v3427_v55 = vld [vmem:[%s7923_s1 + $0x188] sm:$0xf]  ;;  %v3688_v58 = vor.u32 %v4200_v50, %v3685_v51 }
  0x1d   :  { %v3227_v17 = vld [vmem:[%s7923_s1] sm:$0xf]  ;;  %v3516_v19 = vor.u32 %v4163_v11, %v3515_v9  ;;  %v4087_v23 = vld [vmem:[%s7923_s1 + $0x4] sm:$0xf]  ;;  %v3520_v24 = vor.u32 %v4159_v14, %v3517_v15  ;;  %818 = vmatpush.bf16.msra.mxu0 %v3260_v16  ;;  %856 = vmatpush.bf16.msra.mxu2 %v3264_v20  ;;  %v4140_v56 = vld [vmem:[%s7923_s1 + $0x1a4] sm:$0xf0] }
  0x1e   :  { %v4091_v18 = vld [vmem:[%s7923_s1 + $0x1c] sm:$0xf0]  ;;  %v3229_v25 = vld [vmem:[%s7923_s1 + $0x20] sm:$0xf0]  ;;  %v3683_v57 = vld [vmem:[%s7923_s1 + $0x388] sm:$0xf]  ;;  %v3428_v0 = vor.u32 %v4140_v56, %v3427_v55 }
  0x1f   :  { %v3483_v21 = vld [vmem:[%s7923_s1 + $0x200] sm:$0xf]  ;;  %v4151_v26 = vld [vmem:[%s7923_s1 + $0x204] sm:$0xf]  ;;  %v3228_v31 = vor.u32 %v4091_v18, %v3227_v17  ;;  %837 = vmatpush.bf16.msra.mxu1 %v3516_v19  ;;  %v3232_v36 = vor.u32 %v4087_v23, %v3229_v25  ;;  %875 = vmatpush.bf16.msra.mxu3 %v3520_v24  ;;  %v4204_v59 = vld [vmem:[%s7923_s1 + $0x3a4] sm:$0xf0] }
  0x20   :  { %v4155_v22 = vld [vmem:[%s7923_s1 + $0x21c] sm:$0xf0]  ;;  %v3485_v27 = vld [vmem:[%s7923_s1 + $0x220] sm:$0xf0]  ;;  %v4128_v60 = vld [vmem:[%s7923_s1 + $0x14c] sm:$0xf]  ;;  %v3684_v1 = vor.u32 %v4204_v59, %v3683_v57 }
  0x21   :  { %v32_v28 = vld [vmem:[%s7924_s0] sm:$0xff]  ;;  %v3484_v35 = vor.u32 %v4155_v22, %v3483_v21  ;;  %v3488_v39 = vor.u32 %v4151_v26, %v3485_v27  ;;  %819 = vmatpush.bf16.msra.mxu0 %v3228_v31  ;;  %857 = vmatpush.bf16.msra.mxu2 %v3232_v36  ;;  %v3397_v61 = vld [vmem:[%s7923_s1 + $0x168] sm:$0xf0]  ;;  %v3395_v3 = vld [vmem:[%s7923_s1 + $0x148] sm:$0xf] }
  0x22   :  { %v4596_v44 = vpack.c.bf16 %v34_v32, %v32_v28  ;;  %v4192_v62 = vld [vmem:[%s7923_s1 + $0x34c] sm:$0xf]  ;;  %v3400_v2 = vor.u32 %v4128_v60, %v3397_v61  ;;  %v4132_v4 = vld [vmem:[%s7923_s1 + $0x164] sm:$0xf0]  ;;  %v36_v20 = vld [vmem:[%s7924_s0 + $0x20] sm:$0xff] }
  0x23   :  { %838 = vmatpush.bf16.msra.mxu1 %v3484_v35  ;;  %876 = vmatpush.bf16.msra.mxu3 %v3488_v39  ;;  %v3653_v63 = vld [vmem:[%s7923_s1 + $0x368] sm:$0xf0]  ;;  %v3651_v5 = vld [vmem:[%s7923_s1 + $0x348] sm:$0xf]  ;;  %v3396_v12 = vor.u32 %v4132_v4, %v3395_v3  ;;  %v38_v23 = vld [vmem:[%s7924_s0 + $0x30] sm:$0xff] }
  0x24   :  { %8120 = vst [vmem:[#allocation2_spill] sm:$0xff] %v4596_v44  ;;  %820 = vmatmul.bf16.vlgmr.msra.gmra.mxu0 %v4596_v44  ;;  %858 = vmatmul.bf16.vlgmr.msra.gmra.mxu2 %v4596_v44  ;;  %v3656_v6 = vor.u32 %v4192_v62, %v3653_v63  ;;  %v4196_v7 = vld [vmem:[%s7923_s1 + $0x364] sm:$0xf0]  ;;  %v4120_v8 = vld [vmem:[%s7923_s1 + $0x10c] sm:$0xf]  ;;  %v39_v28 = vld [vmem:[%s7924_s0 + $0x38] sm:$0xff]  ;;  %v4712_v34 = vpack.c.bf16 %v38_v23, %v36_v20 }
  0x25   :  { %926 = vmatpush.bf16.msrb.mxu2 %v3464_v40  ;;  %888 = vmatpush.bf16.msrb.mxu0 %v3460_v52  ;;  %v3365_v9 = vld [vmem:[%s7923_s1 + $0x128] sm:$0xf0]  ;;  %v3363_v13 = vld [vmem:[%s7923_s1 + $0x108] sm:$0xf]  ;;  %v3652_v14 = vor.u32 %v4196_v7, %v3651_v5  ;;  %v4145_v4 = vld [vmem:[%s7923_s1 + $0x1d4] sm:$0xf] }
  0x26   :  { %839 = vmatmul.bf16.vlgmr.msra.gmra.mxu1 %v4607_v49  ;;  %877 = vmatmul.bf16.vlgmr.msra.gmra.mxu3 %v4607_v49  ;;  %v4184_v10 = vld [vmem:[%s7923_s1 + $0x30c] sm:$0xf]  ;;  %v3368_v15 = vor.u32 %v4120_v8, %v3365_v9  ;;  %v4124_v16 = vld [vmem:[%s7923_s1 + $0x124] sm:$0xf0]  ;;  %8122 = vst [vmem:[#allocation4_spill] sm:$0xff] %v4712_v34 }
  0x27   :  { %945 = vmatpush.bf16.msrb.mxu3 %v3720_v45  ;;  %907 = vmatpush.bf16.msrb.mxu1 %v3716_v53  ;;  %v3621_v11 = vld [vmem:[%s7923_s1 + $0x328] sm:$0xf0]  ;;  %v3619_v17 = vld [vmem:[%s7923_s1 + $0x308] sm:$0xf]  ;;  %v3364_v26 = vor.u32 %v4124_v16, %v3363_v13  ;;  %v3469_v5 = vld [vmem:[%s7923_s1 + $0x1f0] sm:$0xf0] }
  0x28   :  { %v4188_v18 = vld [vmem:[%s7923_s1 + $0x324] sm:$0xf0]  ;;  %v3624_v19 = vor.u32 %v4184_v10, %v3621_v11  ;;  %v4112_v21 = vld [vmem:[%s7923_s1 + $0xcc] sm:$0xf]  ;;  %v4209_v8 = vld [vmem:[%s7923_s1 + $0x3d4] sm:$0xf]  ;;  %v3472_v16 = vor.u32 %v4145_v4, %v3469_v5 }
  0x29   :  { %927 = vmatpush.bf16.msrb.mxu2 %v3432_v54  ;;  %889 = vmatpush.bf16.msrb.mxu0 %v3428_v0  ;;  %v3333_v22 = vld [vmem:[%s7923_s1 + $0xe8] sm:$0xf0]  ;;  %v3620_v29 = vor.u32 %v4188_v18, %v3619_v17  ;;  %v3331_v31 = vld [vmem:[%s7923_s1 + $0xc8] sm:$0xf]  ;;  %v3725_v9 = vld [vmem:[%s7923_s1 + $0x3f0] sm:$0xf0] }
  0x2a   :  { %v4176_v24 = vld [vmem:[%s7923_s1 + $0x2cc] sm:$0xf]  ;;  %v3336_v30 = vor.u32 %v4112_v21, %v3333_v22  ;;  %v4116_v32 = vld [vmem:[%s7923_s1 + $0xe4] sm:$0xf0]  ;;  %v3467_v17 = vld [vmem:[%s7923_s1 + $0x1d0] sm:$0xf]  ;;  %v3728_v20 = vor.u32 %v4209_v8, %v3725_v9 }
  0x2b   :  { %946 = vmatpush.bf16.msrb.mxu3 %v3688_v58  ;;  %908 = vmatpush.bf16.msrb.mxu1 %v3684_v1  ;;  %v3589_v25 = vld [vmem:[%s7923_s1 + $0x2e8] sm:$0xf0]  ;;  %v3587_v33 = vld [vmem:[%s7923_s1 + $0x2c8] sm:$0xf]  ;;  %v3332_v42 = vor.u32 %v4116_v32, %v3331_v31  ;;  %v4149_v18 = vld [vmem:[%s7923_s1 + $0x1ec] sm:$0xf0] }
  0x2c   :  { %v37_v27 = vld [vmem:[%s7924_s0 + $0x28] sm:$0xff]  ;;  %v3592_v35 = vor.u32 %v4176_v24, %v3589_v25  ;;  %v4213_v21 = vld [vmem:[%s7923_s1 + $0x3ec] sm:$0xf0]  ;;  %v4137_v22 = vld [vmem:[%s7923_s1 + $0x194] sm:$0xf] }
  0x2d   :  { %928 = vmatpush.bf16.msrb.mxu2 %v3400_v2  ;;  %890 = vmatpush.bf16.msrb.mxu0 %v3396_v12  ;;  %v4180_v36 = vld [vmem:[%s7923_s1 + $0x2e4] sm:$0xf0]  ;;  %v4104_v37 = vld [vmem:[%s7923_s1 + $0x8c] sm:$0xf]  ;;  %v4723_v39 = vpack.c.bf16 %v39_v28, %v37_v27  ;;  %v3437_v23 = vld [vmem:[%s7923_s1 + $0x1b0] sm:$0xf0] }
  0x2e   :  { %v3301_v38 = vld [vmem:[%s7923_s1 + $0xa8] sm:$0xf0]  ;;  %v3588_v43 = vor.u32 %v4180_v36, %v3587_v33  ;;  %v3299_v46 = vld [vmem:[%s7923_s1 + $0x88] sm:$0xf]  ;;  %v4201_v27 = vld [vmem:[%s7923_s1 + $0x394] sm:$0xf] }
  0x2f   :  { %947 = vmatpush.bf16.msrb.mxu3 %v3656_v6  ;;  %909 = vmatpush.bf16.msrb.mxu1 %v3652_v14  ;;  %8123 = vst [vmem:[#allocation5_spill] sm:$0xff] %v4723_v39  ;;  %v4168_v40 = vld [vmem:[%s7923_s1 + $0x28c] sm:$0xf]  ;;  %v3304_v45 = vor.u32 %v4104_v37, %v3301_v38  ;;  %v4108_v47 = vld [vmem:[%s7923_s1 + $0xa4] sm:$0xf0] }
  0x30   :  { %v3557_v41 = vld [vmem:[%s7923_s1 + $0x2a8] sm:$0xf0]  ;;  %v3555_v48 = vld [vmem:[%s7923_s1 + $0x288] sm:$0xf]  ;;  %v3300_v56 = vor.u32 %v4108_v47, %v3299_v46  ;;  %v3693_v28 = vld [vmem:[%s7923_s1 + $0x3b0] sm:$0xf0] }
  0x31   :  { %929 = vmatpush.bf16.msrb.mxu2 %v3368_v15  ;;  %891 = vmatpush.bf16.msrb.mxu0 %v3364_v26  ;;  %v3560_v50 = vor.u32 %v4168_v40, %v3557_v41  ;;  %v4172_v51 = vld [vmem:[%s7923_s1 + $0x2a4] sm:$0xf0]  ;;  %v4096_v52 = vld [vmem:[%s7923_s1 + $0x4c] sm:$0xf]  ;;  %v3468_v26 = vor.u32 %v4149_v18, %v3467_v17  ;;  %v3435_v31 = vld [vmem:[%s7923_s1 + $0x190] sm:$0xf]  ;;  %v3696_v38 = vor.u32 %v4201_v27, %v3693_v28 }
  0x32   :  { %v3269_v53 = vld [vmem:[%s7923_s1 + $0x68] sm:$0xf0]  ;;  %v3267_v57 = vld [vmem:[%s7923_s1 + $0x48] sm:$0xf]  ;;  %v3556_v58 = vor.u32 %v4172_v51, %v3555_v48  ;;  %v4141_v32 = vld [vmem:[%s7923_s1 + $0x1ac] sm:$0xf0] }
  0x33   :  { %948 = vmatpush.bf16.msrb.mxu3 %v3624_v19  ;;  %910 = vmatpush.bf16.msrb.mxu1 %v3620_v29  ;;  %v4160_v54 = vld [vmem:[%s7923_s1 + $0x24c] sm:$0xf]  ;;  %v3272_v59 = vor.u32 %v4096_v52, %v3269_v53  ;;  %v4100_v60 = vld [vmem:[%s7923_s1 + $0x64] sm:$0xf0]  ;;  %v3723_v19 = vld [vmem:[%s7923_s1 + $0x3d0] sm:$0xf]  ;;  %v3436_v40 = vor.u32 %v4141_v32, %v3435_v31 }
  0x34   :  { %825 = vmatmul.bf16.gmra.mxu0 %v4712_v34  ;;  %863 = vmatmul.bf16.gmra.mxu2 %v4712_v34  ;;  %v3525_v55 = vld [vmem:[%s7923_s1 + $0x268] sm:$0xf0]  ;;  %v3523_v61 = vld [vmem:[%s7923_s1 + $0x248] sm:$0xf]  ;;  %v3268_v6 = vor.u32 %v4100_v60, %v3267_v57  ;;  %v3724_v29 = vor.u32 %v4213_v21, %v3723_v19  ;;  %v3691_v33 = vld [vmem:[%s7923_s1 + $0x390] sm:$0xf] }
  0x35   :  { %930 = vmatpush.bf16.msrb.mxu2 %v3336_v30  ;;  %892 = vmatpush.bf16.msrb.mxu0 %v3332_v42  ;;  %v4164_v62 = vld [vmem:[%s7923_s1 + $0x264] sm:$0xf0]  ;;  %v3528_v63 = vor.u32 %v4160_v54, %v3525_v55  ;;  %v4088_v0 = vld [vmem:[%s7923_s1 + $0xc] sm:$0xf]  ;;  %v3440_v30 = vor.u32 %v4137_v22, %v3437_v23  ;;  %v4129_v36 = vld [vmem:[%s7923_s1 + $0x154] sm:$0xf] }
  0x36   :  { %844 = vmatmul.bf16.gmra.mxu1 %v4723_v39  ;;  %882 = vmatmul.bf16.gmra.mxu3 %v4723_v39  ;;  %v3237_v1 = vld [vmem:[%s7923_s1 + $0x28] sm:$0xf0]  ;;  %v3235_v7 = vld [vmem:[%s7923_s1 + $0x8] sm:$0xf]  ;;  %v3524_v10 = vor.u32 %v4164_v62, %v3523_v61  ;;  %v3405_v37 = vld [vmem:[%s7923_s1 + $0x170] sm:$0xf0] }
  0x37   :  { %949 = vmatpush.bf16.msrb.mxu3 %v3592_v35  ;;  %911 = vmatpush.bf16.msrb.mxu1 %v3588_v43  ;;  %v4152_v2 = vld [vmem:[%s7923_s1 + $0x20c] sm:$0xf]  ;;  %v3240_v11 = vor.u32 %v4088_v0, %v3237_v1  ;;  %v4092_v12 = vld [vmem:[%s7923_s1 + $0x24] sm:$0xf0]  ;;  %v4205_v35 = vld [vmem:[%s7923_s1 + $0x3ac] sm:$0xf0] }
  0x38   :  { %v3493_v3 = vld [vmem:[%s7923_s1 + $0x228] sm:$0xf0]  ;;  %v3491_v13 = vld [vmem:[%s7923_s1 + $0x208] sm:$0xf]  ;;  %v3236_v24 = vor.u32 %v4092_v12, %v3235_v7  ;;  %v4193_v41 = vld [vmem:[%s7923_s1 + $0x354] sm:$0xf]  ;;  %v3692_v43 = vor.u32 %v4205_v35, %v3691_v33 }
  0x39   :  { %931 = vmatpush.bf16.msrb.mxu2 %v3304_v45  ;;  %893 = vmatpush.bf16.msrb.mxu0 %v3300_v56  ;;  %v4156_v14 = vld [vmem:[%s7923_s1 + $0x224] sm:$0xf0]  ;;  %v3496_v15 = vor.u32 %v4152_v2, %v3493_v3  ;;  %v3661_v42 = vld [vmem:[%s7923_s1 + $0x370] sm:$0xf0]  ;;  %v3408_v45 = vor.u32 %v4129_v36, %v3405_v37  ;;  %v3403_v46 = vld [vmem:[%s7923_s1 + $0x150] sm:$0xf] }
  0x3a   :  { %v3492_v25 = vor.u32 %v4156_v14, %v3491_v13  ;;  %v4133_v47 = vld [vmem:[%s7923_s1 + $0x16c] sm:$0xf0]  ;;  %v4121_v51 = vld [vmem:[%s7923_s1 + $0x114] sm:$0xf]  ;;  %v3664_v53 = vor.u32 %v4193_v41, %v3661_v42 }
  0x3b   :  { %950 = vmatpush.bf16.msrb.mxu3 %v3560_v50  ;;  %912 = vmatpush.bf16.msrb.mxu1 %v3556_v58  ;;  %v3659_v48 = vld [vmem:[%s7923_s1 + $0x350] sm:$0xf]  ;;  %v3373_v52 = vld [vmem:[%s7923_s1 + $0x130] sm:$0xf0]  ;;  %v3404_v54 = vor.u32 %v4133_v47, %v3403_v46 }
  0x3c   :  { %v4197_v50 = vld [vmem:[%s7923_s1 + $0x36c] sm:$0xf0]  ;;  %v4185_v55 = vld [vmem:[%s7923_s1 + $0x314] sm:$0xf]  ;;  %v3376_v58 = vor.u32 %v4121_v51, %v3373_v52 }
  0x3d   :  { %932 = vmatpush.bf16.msrb.mxu2 %v3272_v59  ;;  %894 = vmatpush.bf16.msrb.mxu0 %v3268_v6  ;;  %v3629_v56 = vld [vmem:[%s7923_s1 + $0x330] sm:$0xf0]  ;;  %v3660_v57 = vor.u32 %v4197_v50, %v3659_v48  ;;  %v3371_v59 = vld [vmem:[%s7923_s1 + $0x110] sm:$0xf] }
  0x3e   :  { %v4125_v60 = vld [vmem:[%s7923_s1 + $0x12c] sm:$0xf0]  ;;  %v3341_v0 = vld [vmem:[%s7923_s1 + $0xf0] sm:$0xf0]  ;;  %v3632_v1 = vor.u32 %v4185_v55, %v3629_v56  ;;  %v3733_v55 = vld [vmem:[%s7923_s1 + $0x3f8] sm:$0xf0] }
  0x3f   :  { %951 = vmatpush.bf16.msrb.mxu3 %v3528_v63  ;;  %913 = vmatpush.bf16.msrb.mxu1 %v3524_v10  ;;  %v3627_v61 = vld [vmem:[%s7923_s1 + $0x310] sm:$0xf]  ;;  %v4113_v63 = vld [vmem:[%s7923_s1 + $0xd4] sm:$0xf]  ;;  %v3372_v2 = vor.u32 %v4125_v60, %v3371_v59  ;;  %v3475_v56 = vld [vmem:[%s7923_s1 + $0x1d8] sm:$0xf] }
  0x40   :  { %v4189_v62 = vld [vmem:[%s7923_s1 + $0x32c] sm:$0xf0]  ;;  %v4177_v3 = vld [vmem:[%s7923_s1 + $0x2d4] sm:$0xf]  ;;  %v3344_v6 = vor.u32 %v4113_v63, %v3341_v0  ;;  %v4214_v59 = vld [vmem:[%s7923_s1 + $0x3f4] sm:$0xf0] }
  0x41   :  { %933 = vmatpush.bf16.msrb.mxu2 %v3240_v11  ;;  %895 = vmatpush.bf16.msrb.mxu0 %v3236_v24  ;;  %v3597_v4 = vld [vmem:[%s7923_s1 + $0x2f0] sm:$0xf0]  ;;  %v3628_v5 = vor.u32 %v4189_v62, %v3627_v61  ;;  %v3339_v7 = vld [vmem:[%s7923_s1 + $0xd0] sm:$0xf]  ;;  %v4138_v62 = vld [vmem:[%s7923_s1 + $0x19c] sm:$0xf] }
  0x42   :  { %v4117_v8 = vld [vmem:[%s7923_s1 + $0xec] sm:$0xf0]  ;;  %v4105_v11 = vld [vmem:[%s7923_s1 + $0x94] sm:$0xf]  ;;  %v3600_v13 = vor.u32 %v4177_v3, %v3597_v4  ;;  %v3445_v63 = vld [vmem:[%s7923_s1 + $0x1b8] sm:$0xf0] }
  0x43   :  { %952 = vmatpush.bf16.msrb.mxu3 %v3496_v15  ;;  %914 = vmatpush.bf16.msrb.mxu1 %v3492_v25  ;;  %v3595_v9 = vld [vmem:[%s7923_s1 + $0x2d0] sm:$0xf]  ;;  %v3309_v12 = vld [vmem:[%s7923_s1 + $0xb0] sm:$0xf0]  ;;  %v3340_v14 = vor.u32 %v4117_v8, %v3339_v7  ;;  %v4202_v4 = vld [vmem:[%s7923_s1 + $0x39c] sm:$0xf] }
  0x44   :  { %896 = vmatmul.bf16.vlgmr.msrb.gmra.mxu0 %v4596_v44  ;;  %934 = vmatmul.bf16.vlgmr.msrb.gmra.mxu2 %v4596_v44  ;;  %v4181_v10 = vld [vmem:[%s7923_s1 + $0x2ec] sm:$0xf0]  ;;  %v4169_v15 = vld [vmem:[%s7923_s1 + $0x294] sm:$0xf]  ;;  %v3312_v18 = vor.u32 %v4105_v11, %v3309_v12  ;;  %v3443_v7 = vld [vmem:[%s7923_s1 + $0x198] sm:$0xf] }
  0x45   :  { %1002 = vmatpush.bf16.msra.mxu2 %v3472_v16  ;;  %964 = vmatpush.bf16.msra.mxu0 %v3468_v26  ;;  %v3565_v16 = vld [vmem:[%s7923_s1 + $0x2b0] sm:$0xf0]  ;;  %v3596_v17 = vor.u32 %v4181_v10, %v3595_v9  ;;  %v3307_v19 = vld [vmem:[%s7923_s1 + $0x90] sm:$0xf]  ;;  %v4142_v8 = vld [vmem:[%s7923_s1 + $0x1b4] sm:$0xf0] }
  0x46   :  { %915 = vmatmul.bf16.vlgmr.msrb.gmra.mxu1 %v4607_v49  ;;  %953 = vmatmul.bf16.vlgmr.msrb.gmra.mxu3 %v4607_v49  ;;  %v3563_v21 = vld [vmem:[%s7923_s1 + $0x290] sm:$0xf]  ;;  %v4097_v23 = vld [vmem:[%s7923_s1 + $0x54] sm:$0xf]  ;;  %v3568_v25 = vor.u32 %v4169_v15, %v3565_v16  ;;  %v3699_v10 = vld [vmem:[%s7923_s1 + $0x398] sm:$0xf]  ;;  %v3444_v16 = vor.u32 %v4142_v8, %v3443_v7 }
  0x47   :  { %1021 = vmatpush.bf16.msra.mxu3 %v3728_v20  ;;  %983 = vmatpush.bf16.msra.mxu1 %v3724_v29  ;;  %v4109_v20 = vld [vmem:[%s7923_s1 + $0xac] sm:$0xf0]  ;;  %v3277_v24 = vld [vmem:[%s7923_s1 + $0x70] sm:$0xf0]  ;;  %v4206_v11 = vld [vmem:[%s7923_s1 + $0x3b4] sm:$0xf0] }
  0x48   :  { %v4173_v22 = vld [vmem:[%s7923_s1 + $0x2ac] sm:$0xf0]  ;;  %v3308_v26 = vor.u32 %v4109_v20, %v3307_v19  ;;  %v4161_v27 = vld [vmem:[%s7923_s1 + $0x254] sm:$0xf]  ;;  %v4130_v12 = vld [vmem:[%s7923_s1 + $0x15c] sm:$0xf] }
  0x49   :  { %1003 = vmatpush.bf16.msra.mxu2 %v3440_v30  ;;  %965 = vmatpush.bf16.msra.mxu0 %v3436_v40  ;;  %v3533_v28 = vld [vmem:[%s7923_s1 + $0x270] sm:$0xf0]  ;;  %v3564_v29 = vor.u32 %v4173_v22, %v3563_v21  ;;  %v3280_v30 = vor.u32 %v4097_v23, %v3277_v24  ;;  %v3275_v31 = vld [vmem:[%s7923_s1 + $0x50] sm:$0xf]  ;;  %v3477_v40 = vld [vmem:[%s7923_s1 + $0x1f8] sm:$0xf0] }
  0x4a   :  { %v4101_v32 = vld [vmem:[%s7923_s1 + $0x6c] sm:$0xf0]  ;;  %v4089_v36 = vld [vmem:[%s7923_s1 + $0x14] sm:$0xf]  ;;  %v3536_v41 = vor.u32 %v4161_v27, %v3533_v28  ;;  %v3669_v15 = vld [vmem:[%s7923_s1 + $0x378] sm:$0xf0] }
  0x4b   :  { %1022 = vmatpush.bf16.msra.mxu3 %v3696_v38  ;;  %984 = vmatpush.bf16.msra.mxu1 %v3692_v43  ;;  %v3531_v33 = vld [vmem:[%s7923_s1 + $0x250] sm:$0xf]  ;;  %v3245_v37 = vld [vmem:[%s7923_s1 + $0x30] sm:$0xf0]  ;;  %v4146_v38 = vld [vmem:[%s7923_s1 + $0x1dc] sm:$0xf]  ;;  %v3276_v42 = vor.u32 %v4101_v32, %v3275_v31 }
  0x4c   :  { %v4165_v35 = vld [vmem:[%s7923_s1 + $0x26c] sm:$0xf0]  ;;  %v4153_v43 = vld [vmem:[%s7923_s1 + $0x214] sm:$0xf]  ;;  %v3248_v48 = vor.u32 %v4089_v36, %v3245_v37  ;;  %v3411_v20 = vld [vmem:[%s7923_s1 + $0x158] sm:$0xf] }
  0x4d   :  { %1004 = vmatpush.bf16.msra.mxu2 %v3408_v45  ;;  %966 = vmatpush.bf16.msra.mxu0 %v3404_v54  ;;  %v3501_v45 = vld [vmem:[%s7923_s1 + $0x230] sm:$0xf0]  ;;  %v3243_v46 = vld [vmem:[%s7923_s1 + $0x10] sm:$0xf]  ;;  %v3532_v47 = vor.u32 %v4165_v35, %v3531_v33  ;;  %v4210_v54 = vld [vmem:[%s7923_s1 + $0x3dc] sm:$0xf] }
  0x4e   :  { %v4093_v50 = vld [vmem:[%s7923_s1 + $0x2c] sm:$0xf0]  ;;  %v3504_v60 = vor.u32 %v4153_v43, %v3501_v45  ;;  %v4134_v21 = vld [vmem:[%s7923_s1 + $0x174] sm:$0xf0]  ;;  %v3605_v43 = vld [vmem:[%s7923_s1 + $0x2f8] sm:$0xf0] }
  0x4f   :  { %1023 = vmatpush.bf16.msra.mxu3 %v3664_v53  ;;  %985 = vmatpush.bf16.msra.mxu1 %v3660_v57  ;;  %v3499_v51 = vld [vmem:[%s7923_s1 + $0x210] sm:$0xf]  ;;  %v3480_v53 = vor.u32 %v4146_v38, %v3477_v40  ;;  %v4150_v57 = vld [vmem:[%s7923_s1 + $0x1f4] sm:$0xf0]  ;;  %v3244_v61 = vor.u32 %v4093_v50, %v3243_v46  ;;  %v3412_v23 = vor.u32 %v4134_v21, %v3411_v20  ;;  %v4114_v38 = vld [vmem:[%s7923_s1 + $0xdc] sm:$0xf] }
  0x50   :  { %v4157_v52 = vld [vmem:[%s7923_s1 + $0x22c] sm:$0xf0]  ;;  %v3667_v22 = vld [vmem:[%s7923_s1 + $0x358] sm:$0xf] }
  0x51   :  { %1005 = vmatpush.bf16.msra.mxu2 %v3376_v58  ;;  %967 = vmatpush.bf16.msra.mxu0 %v3372_v2  ;;  %v3731_v58 = vld [vmem:[%s7923_s1 + $0x3d8] sm:$0xf]  ;;  %v3500_v0 = vor.u32 %v4157_v52, %v3499_v51  ;;  %v3476_v2 = vor.u32 %v4150_v57, %v3475_v56  ;;  %v5124_v50 = vld [vmem:[%s7925_s2 + $0x10] sm:$0xff]  ;;  %v5134_v52 = vld [vmem:[%s7925_s2 + $0x20] sm:$0xff] }
  0x52   :  { %v3732_v3 = vor.u32 %v4214_v59, %v3731_v58  ;;  %v4198_v24 = vld [vmem:[%s7923_s1 + $0x374] sm:$0xf0]  ;;  %v5154_v56 = vld [vmem:[%s7925_s2 + $0x40] sm:$0xff]  ;;  %v5159_v57 = vld [vmem:[%s7925_s2 + $0x48] sm:$0xff] }
  0x53   :  { %1024 = vmatpush.bf16.msra.mxu3 %v3632_v1  ;;  %986 = vmatpush.bf16.msra.mxu1 %v3628_v5  ;;  %v3736_v1 = vor.u32 %v4210_v54, %v3733_v55  ;;  %v3701_v5 = vld [vmem:[%s7923_s1 + $0x3b8] sm:$0xf0]  ;;  %v3668_v27 = vor.u32 %v4198_v24, %v3667_v22  ;;  %v3379_v32 = vld [vmem:[%s7923_s1 + $0x118] sm:$0xf]  ;;  %v5144_v54 = vld [vmem:[%s7925_s2 + $0x30] sm:$0xff]  ;;  %v7943_v8 = vunpack.c.l.bf16 %v5154_v56 }
  0x54   :  { %901 = vmatmul.bf16.gmra.mxu0 %v4712_v34  ;;  %939 = vmatmul.bf16.gmra.mxu2 %v4712_v34  ;;  %v3704_v9 = vor.u32 %v4202_v4, %v3701_v5  ;;  %v4126_v33 = vld [vmem:[%s7923_s1 + $0x134] sm:$0xf0]  ;;  %v5165_v59 = vld [vmem:[%s7925_s2 + $0x50] sm:$0xff]  ;;  %v5223_v24 = vld [vmem:[%s7925_s2 + $0x80] sm:$0xff] }
  0x55   :  { %1006 = vmatpush.bf16.msra.mxu2 %v3344_v6  ;;  %968 = vmatpush.bf16.msra.mxu0 %v3340_v14  ;;  %v3448_v6 = vor.u32 %v4138_v62, %v3445_v63  ;;  %v4194_v14 = vld [vmem:[%s7923_s1 + $0x35c] sm:$0xf]  ;;  %v3380_v35 = vor.u32 %v4126_v33, %v3379_v32  ;;  %v3635_v36 = vld [vmem:[%s7923_s1 + $0x318] sm:$0xf]  ;;  %v7933_v63 = vunpack.c.l.bf16 %v5124_v50 }
  0x56   :  { %920 = vmatmul.bf16.gmra.mxu1 %v4723_v39  ;;  %958 = vmatmul.bf16.gmra.mxu3 %v4723_v39  ;;  %v3672_v19 = vor.u32 %v4194_v14, %v3669_v15  ;;  %v4190_v37 = vld [vmem:[%s7923_s1 + $0x334] sm:$0xf0] }
  0x57   :  { %1025 = vmatpush.bf16.msra.mxu3 %v3600_v13  ;;  %987 = vmatpush.bf16.msra.mxu1 %v3596_v17  ;;  %v3413_v13 = vld [vmem:[%s7923_s1 + $0x178] sm:$0xf0]  ;;  %v3700_v17 = vor.u32 %v4206_v11, %v3699_v10  ;;  %v3636_v40 = vor.u32 %v4190_v37, %v3635_v36  ;;  %v4118_v14 = vld [vmem:[%s7923_s1 + $0xf4] sm:$0xf0] }
  0x58   :  { %v5129_v51 = vld [vmem:[%s7925_s2 + $0x18] sm:$0xff] }
  0x59   :  { %1007 = vmatpush.bf16.msra.mxu2 %v3312_v18  ;;  %969 = vmatpush.bf16.msra.mxu0 %v3308_v26  ;;  %v3416_v18 = vor.u32 %v4130_v12, %v3413_v13  ;;  %v3381_v26 = vld [vmem:[%s7923_s1 + $0x138] sm:$0xf0]  ;;  %v8134_v12 = vunpack.c.l.bf16 %v5165_v59 }
  0x5a   :  { %v5149_v55 = vld [vmem:[%s7925_s2 + $0x38] sm:$0xff] }
  0x5b   :  { %1026 = vmatpush.bf16.msra.mxu3 %v3568_v25  ;;  %988 = vmatpush.bf16.msra.mxu1 %v3564_v29  ;;  %v4122_v25 = vld [vmem:[%s7923_s1 + $0x11c] sm:$0xf]  ;;  %v7942_v7 = vunpack.c.l.bf16 %v5149_v55 }
  0x5c   :  { %v3384_v28 = vor.u32 %v4122_v25, %v3381_v26  ;;  %v4186_v29 = vld [vmem:[%s7923_s1 + $0x31c] sm:$0xf]  ;;  %v4182_v25 = vld [vmem:[%s7923_s1 + $0x2f4] sm:$0xf0] }
  0x5d   :  { %1008 = vmatpush.bf16.msra.mxu2 %v3280_v30  ;;  %970 = vmatpush.bf16.msra.mxu0 %v3276_v42  ;;  %v3637_v30 = vld [vmem:[%s7923_s1 + $0x338] sm:$0xf0] }
  0x5e   :  { %v3640_v31 = vor.u32 %v4186_v29, %v3637_v30  ;;  %v4178_v42 = vld [vmem:[%s7923_s1 + $0x2dc] sm:$0xf]  ;;  %v5239_v30 = vld [vmem:[%s7925_s2 + $0x88] sm:$0xff] }
  0x5f   :  { %1027 = vmatpush.bf16.msra.mxu3 %v3536_v41  ;;  %989 = vmatpush.bf16.msra.mxu1 %v3532_v47  ;;  %v3349_v41 = vld [vmem:[%s7923_s1 + $0xf8] sm:$0xf0]  ;;  %v3608_v46 = vor.u32 %v4178_v42, %v3605_v43  ;;  %v5114_v47 = vld [vmem:[%s7925_s2] sm:$0xff]  ;;  %v3571_v42 = vld [vmem:[%s7923_s1 + $0x298] sm:$0xf] }
  0x60   :  { %v3352_v45 = vor.u32 %v4114_v38, %v3349_v41  ;;  %v7936_v58 = vunpack.c.l.bf16 %v5114_v47  ;;  %v5194_v4 = vld [vmem:[%s7925_s2 + $0x78] sm:$0xff]  ;;  %v5266_v43 = vld [vmem:[%s7925_s2 + $0xa0] sm:$0xff] }
  0x61   :  { %1009 = vmatpush.bf16.msra.mxu2 %v3248_v48  ;;  %971 = vmatpush.bf16.msra.mxu0 %v3244_v61  ;;  %v5119_v48 = vld [vmem:[%s7925_s2 + $0x8] sm:$0xff]  ;;  %v5175_v61 = vld [vmem:[%s7925_s2 + $0x60] sm:$0xff]  ;;  %v4106_v26 = vld [vmem:[%s7923_s1 + $0x9c] sm:$0xf]  ;;  %8125 = vst [vmem:[#allocation7_spill] sm:$0xff] %v5266_v43 }
  0x62   :  { %v7934_v62 = vunpack.c.l.bf16 %v5119_v48  ;;  %v5249_v32 = vld [vmem:[%s7925_s2 + $0x98] sm:$0xff] }
  0x63   :  { %1028 = vmatpush.bf16.msra.mxu3 %v3504_v60  ;;  %990 = vmatpush.bf16.msra.mxu1 %v3500_v0  ;;  %v5170_v60 = vld [vmem:[%s7925_s2 + $0x58] sm:$0xff]  ;;  %v7935_v0 = vunpack.c.l.bf16 %v5129_v51  ;;  %8124 = vst [vmem:[#allocation6_spill] sm:$0xff] %v5249_v32 }
  0x64   :  { %972 = vmatmul.bf16.vlgmr.msra.gmra.mxu0 %v4596_v44  ;;  %1010 = vmatmul.bf16.vlgmr.msra.gmra.mxu2 %v4596_v44  ;;  %v4170_v36 = vld [vmem:[%s7923_s1 + $0x29c] sm:$0xf]  ;;  %v3315_v38 = vld [vmem:[%s7923_s1 + $0x98] sm:$0xf]  ;;  %v8145_v44 = vunpack.c.h.bf16 %v5129_v51 }
  0x65   :  { %1078 = vmatpush.bf16.msrb.mxu2 %v3480_v53  ;;  %1040 = vmatpush.bf16.msrb.mxu0 %v3476_v2  ;;  %v5139_v53 = vld [vmem:[%s7925_s2 + $0x28] sm:$0xff]  ;;  %v3573_v37 = vld [vmem:[%s7923_s1 + $0x2b8] sm:$0xf0] }
  0x66   :  { %991 = vmatmul.bf16.vlgmr.msra.gmra.mxu1 %v4607_v49  ;;  %1029 = vmatmul.bf16.vlgmr.msra.gmra.mxu3 %v4607_v49  ;;  %v5184_v2 = vld [vmem:[%s7925_s2 + $0x68] sm:$0xff]  ;;  %v7938_v5 = vunpack.c.l.bf16 %v5139_v53  ;;  %v3541_v41 = vld [vmem:[%s7923_s1 + $0x278] sm:$0xf0] }
  0x67   :  { %1097 = vmatpush.bf16.msrb.mxu3 %v3736_v1  ;;  %1059 = vmatpush.bf16.msrb.mxu1 %v3732_v3  ;;  %v7937_v1 = vunpack.c.l.bf16 %v5134_v52  ;;  %v5189_v3 = vld [vmem:[%s7925_s2 + $0x70] sm:$0xff] }
  0x69   :  { %1079 = vmatpush.bf16.msrb.mxu2 %v3448_v6  ;;  %1041 = vmatpush.bf16.msrb.mxu0 %v3444_v16  ;;  %v7941_v6 = vunpack.c.l.bf16 %v5144_v54 }
  0x6b   :  { %1098 = vmatpush.bf16.msrb.mxu3 %v3704_v9  ;;  %1060 = vmatpush.bf16.msrb.mxu1 %v3700_v17  ;;  %v3347_v9 = vld [vmem:[%s7923_s1 + $0xd8] sm:$0xf] }
  0x6d   :  { %1080 = vmatpush.bf16.msrb.mxu2 %v3416_v18  ;;  %1042 = vmatpush.bf16.msrb.mxu0 %v3412_v23  ;;  %v3348_v18 = vor.u32 %v4118_v14, %v3347_v9  ;;  %v5281_v9 = vld [vmem:[%s7925_s2 + $0xb8] sm:$0xff]  ;;  %v3576_v14 = vor.u32 %v4170_v36, %v3573_v37 }
  0x6e   :  { %8128 = vst [vmem:[#allocation10_spill] sm:$0xff] %v5281_v9  ;;  %v4174_v36 = vld [vmem:[%s7923_s1 + $0x2b4] sm:$0xf0]  ;;  %v4098_v37 = vld [vmem:[%s7923_s1 + $0x5c] sm:$0xf] }
  0x6f   :  { %1099 = vmatpush.bf16.msrb.mxu3 %v3672_v19  ;;  %1061 = vmatpush.bf16.msrb.mxu1 %v3668_v27  ;;  %v3603_v19 = vld [vmem:[%s7923_s1 + $0x2d8] sm:$0xf]  ;;  %v3317_v27 = vld [vmem:[%s7923_s1 + $0xb8] sm:$0xf0] }
  0x70   :  { %v3604_v33 = vor.u32 %v4182_v25, %v3603_v19  ;;  %v5325_v25 = vld [vmem:[%s7925_s2 + $0xc8] sm:$0xff] }
  0x71   :  { %1081 = vmatpush.bf16.msrb.mxu2 %v3384_v28  ;;  %1043 = vmatpush.bf16.msrb.mxu0 %v3380_v35  ;;  %v3320_v35 = vor.u32 %v4106_v26, %v3317_v27  ;;  %8130 = vst [vmem:[#allocation12_spill] sm:$0xff] %v5325_v25  ;;  %v5330_v26 = vld [vmem:[%s7925_s2 + $0xd0] sm:$0xff]  ;;  %v5375_v28 = vld [vmem:[%s7925_s2 + $0xe8] sm:$0xff] }
  0x73   :  { %1100 = vmatpush.bf16.msrb.mxu3 %v3640_v31  ;;  %1062 = vmatpush.bf16.msrb.mxu1 %v3636_v40  ;;  %v5244_v31 = vld [vmem:[%s7925_s2 + $0x90] sm:$0xff] }
  0x74   :  { %977 = vmatmul.bf16.gmra.mxu0 %v4712_v34  ;;  %1015 = vmatmul.bf16.gmra.mxu2 %v4712_v34 }
  0x75   :  { %1082 = vmatpush.bf16.msrb.mxu2 %v3352_v45  ;;  %1044 = vmatpush.bf16.msrb.mxu0 %v3348_v18  ;;  %v5271_v45 = vld [vmem:[%s7925_s2 + $0xa8] sm:$0xff]  ;;  %v4110_v18 = vld [vmem:[%s7923_s1 + $0xb4] sm:$0xf0] }
  0x76   :  { %996 = vmatmul.bf16.gmra.mxu1 %v4723_v39  ;;  %1034 = vmatmul.bf16.gmra.mxu3 %v4723_v39  ;;  %8126 = vst [vmem:[#allocation8_spill] sm:$0xff] %v5271_v45  ;;  %v3316_v27 = vor.u32 %v4110_v18, %v3315_v38  ;;  %v3285_v38 = vld [vmem:[%s7923_s1 + $0x78] sm:$0xf0] }
  0x77   :  { %1101 = vmatpush.bf16.msrb.mxu3 %v3608_v46  ;;  %v5276_v46 = vld [vmem:[%s7925_s2 + $0xb0] sm:$0xff]  ;;  %1063 = vmatpush.bf16.msrb.mxu1 %v3604_v33  ;;  %v4162_v18 = vld [vmem:[%s7923_s1 + $0x25c] sm:$0xf] }
  0x78   :  { %8127 = vst [vmem:[#allocation9_spill] sm:$0xff] %v5276_v46 }
  0x79   :  { %1083 = vmatpush.bf16.msrb.mxu2 %v3320_v35  ;;  %v3572_v35 = vor.u32 %v4174_v36, %v3571_v42  ;;  %v5315_v42 = vld [vmem:[%s7925_s2 + $0xc0] sm:$0xff]  ;;  %1045 = vmatpush.bf16.msrb.mxu0 %v3316_v27  ;;  %v3544_v36 = vor.u32 %v4162_v18, %v3541_v41 }
  0x7a   :  { %8129 = vst [vmem:[#allocation11_spill] sm:$0xff] %v5315_v42  ;;  %v5348_v41 = vld [vmem:[%s7925_s2 + $0xe0] sm:$0xff] }
  0x7b   :  { %1102 = vmatpush.bf16.msrb.mxu3 %v3576_v14  ;;  %v3288_v14 = vor.u32 %v4098_v37, %v3285_v38  ;;  %1064 = vmatpush.bf16.msrb.mxu1 %v3572_v35  ;;  %v5353_v37 = vld [vmem:[%s7926_s3] sm:$0xff]  ;;  %v5358_v35 = vld [vmem:[%s7926_s3 + $0x10] sm:$0xff] }
  0x7c   :  { %8131 = vst [vmem:[#allocation13_spill] sm:$0xff] %v5353_v37 }
  0x7d   :  { %1084 = vmatpush.bf16.msrb.mxu2 %v3288_v14  ;;  %8132 = vst [vmem:[#allocation14_spill] sm:$0xff] %v5358_v35 }
  0x7f   :  { %1103 = vmatpush.bf16.msrb.mxu3 %v3544_v36 }
  0xa1   :  { %v821_v19 = vpop.f32.mrf.mxu0 }
  0xa3   :  { %v840_v40 = vpop.f32.mrf.mxu1 }
  0xa4   :  { %v5317_v33 = vadd.f32 %v840_v40, %v821_v19  ;;  %v5335_v40 = vld [vmem:[%s7925_s2 + $0xd8] sm:$0xff]  ;;  %v5380_v19 = vld [vmem:[%s7925_s2 + $0xf0] sm:$0xff] }
  0xa6   :  { %v1352_v38 = vperm.slane %v5317_v33, 0  ;;  %v1379_v18 = vperm.slane %v5317_v33, 1  ;;  %v1406_v23 = vperm.slane %v5317_v33, 2  ;;  %v1433_v14 = vperm.slane %v5317_v33, 3 }
  0xa7   :  { %v859_v16 = vpop.f32.mrf.mxu2  ;;  %v1541_v13 = vperm.slane %v5317_v33, 7 }
  0xa8   :  { %v1356_v36 = vmul.f32 %v1352_v38, %v7936_v58  ;;  %v1358_v29 = vmul.f32 %v1352_v38, %v7934_v62  ;;  %v1383_v22 = vmul.f32 %v1379_v18, %v7933_v63  ;;  %v1385_v21 = vmul.f32 %v1379_v18, %v7935_v0  ;;  %v5385_v38 = vld [vmem:[%s7925_s2 + $0xf8] sm:$0xff] }
  0xa9   :  { %v1460_v63 = vperm.slane %v5317_v33, 4  ;;  %v1487_v62 = vperm.slane %v5317_v33, 5  ;;  %v1514_v18 = vperm.slane %v5317_v33, 6  ;;  %v1410_v20 = vmul.f32 %v1406_v23, %v7937_v1  ;;  %v878_v15 = vpop.f32.mrf.mxu3  ;;  %v823_v0 = vpop.f32.mrf.mxu0 }
  0xaa   :  { %v1364_v58 = vadd.f32 %v1356_v36, %v5353_v37  ;;  %v1366_v27 = vadd.f32 %v1358_v29, %v5358_v35  ;;  %v1412_v17 = vmul.f32 %v1406_v23, %v7938_v5  ;;  %v1437_v29 = vmul.f32 %v1433_v14, %v7941_v6 }
  0xab   :  { %v1439_v1 = vmul.f32 %v1433_v14, %v7942_v7  ;;  %v1464_v23 = vmul.f32 %v1460_v63, %v7943_v8  ;;  %v8133_v5 = vunpack.c.l.bf16 %v5159_v57  ;;  %v1491_v39 = vmul.f32 %v1487_v62, %v8134_v12 }
  0xac   :  { %v1391_v10 = vadd.f32 %v1383_v22, %v1364_v58  ;;  %v1393_v36 = vadd.f32 %v1385_v21, %v1366_v27  ;;  %v5411_v11 = vadd.f32 %v878_v15, %v859_v16  ;;  %v842_v58 = vpop.f32.mrf.mxu1  ;;  %v8135_v27 = vunpack.c.l.bf16 %v5170_v60 }
  0xad   :  { %v1466_v33 = vmul.f32 %v1460_v63, %v8133_v5  ;;  %v8136_v14 = vunpack.c.l.bf16 %v5175_v61  ;;  %v8137_v8 = vunpack.c.l.bf16 %v5184_v2  ;;  %v8138_v63 = vunpack.c.l.bf16 %v5189_v3 }
  0xae   :  { %v1418_v21 = vadd.f32 %v1410_v20, %v1391_v10  ;;  %v1420_v22 = vadd.f32 %v1412_v17, %v1393_v36  ;;  %v1493_v6 = vmul.f32 %v1487_v62, %v8135_v27  ;;  %v1353_v12 = vperm.slane %v5411_v11, 0  ;;  %v5428_v62 = vld [vmem:[%s7926_s3 + $0x8] sm:$0xff] }
  0xaf   :  { %v1518_v7 = vmul.f32 %v1514_v18, %v8136_v14  ;;  %v1520_v34 = vmul.f32 %v1514_v18, %v8137_v8  ;;  %v1545_v5 = vmul.f32 %v1541_v13, %v8138_v63  ;;  %v1380_v15 = vperm.slane %v5411_v11, 1  ;;  %8140 = vst [vmem:[#allocation15_spill] sm:$0xff] %v5428_v62  ;;  %v5433_v8 = vld [vmem:[%s7926_s3 + $0x18] sm:$0xff] }
  0xb0   :  { %v1445_v16 = vadd.f32 %v1437_v29, %v1418_v21  ;;  %v1447_v49 = vadd.f32 %v1439_v1, %v1420_v22  ;;  %v8139_v10 = vunpack.c.l.bf16 %v5194_v4  ;;  %8141 = vst [vmem:[#allocation16_spill] sm:$0xff] %v5433_v8  ;;  %v5435_v20 = vadd.f32 %v842_v58, %v823_v0 }
  0xb1   :  { %v8142_v18 = vunpack.c.h.bf16 %v5114_v47  ;;  %v8143_v1 = vunpack.c.h.bf16 %v5119_v48  ;;  %v1434_v14 = vperm.slane %v5411_v11, 3  ;;  %v8144_v58 = vunpack.c.h.bf16 %v5124_v50 }
  0xb2   :  { %v1547_v17 = vmul.f32 %v1541_v13, %v8139_v10  ;;  %v1407_v13 = vperm.slane %v5411_v11, 2  ;;  %v1472_v22 = vadd.f32 %v1464_v23, %v1445_v16  ;;  %v1474_v27 = vadd.f32 %v1466_v33, %v1447_v49 }
  0xb3   :  { %v1357_v36 = vmul.f32 %v1353_v12, %v8142_v18  ;;  %v1359_v29 = vmul.f32 %v1353_v12, %v8143_v1  ;;  %v1384_v18 = vmul.f32 %v1380_v15, %v8144_v58  ;;  %v1386_v12 = vmul.f32 %v1380_v15, %v8145_v44 }
  0xb4   :  { %v1499_v1 = vadd.f32 %v1491_v39, %v1472_v22  ;;  %v1501_v35 = vadd.f32 %v1493_v6, %v1474_v27  ;;  %v1461_v21 = vperm.slane %v5411_v11, 4  ;;  %v1488_v49 = vperm.slane %v5411_v11, 5 }
  0xb5   :  { %v1365_v10 = vadd.f32 %v1357_v36, %v5428_v62  ;;  %v1367_v0 = vadd.f32 %v1359_v29, %v5433_v8  ;;  %v8146_v16 = vunpack.c.h.bf16 %v5134_v52  ;;  %v8147_v36 = vunpack.c.h.bf16 %v5139_v53 }
  0xb6   :  { %v1526_v8 = vadd.f32 %v1518_v7, %v1499_v1  ;;  %v1528_v62 = vadd.f32 %v1520_v34, %v1501_v35  ;;  %v8148_v58 = vunpack.c.h.bf16 %v5144_v54  ;;  %v8149_v44 = vunpack.c.h.bf16 %v5149_v55 }
  0xb7   :  { %v1392_v23 = vadd.f32 %v1384_v18, %v1365_v10  ;;  %v1394_v33 = vadd.f32 %v1386_v12, %v1367_v0  ;;  %v1411_v63 = vmul.f32 %v1407_v13, %v8146_v16  ;;  %v1413_v29 = vmul.f32 %v1407_v13, %v8147_v36 }
  0xb8   :  { %v1438_v37 = vmul.f32 %v1434_v14, %v8148_v58  ;;  %v1440_v39 = vmul.f32 %v1434_v14, %v8149_v44  ;;  %v1515_v22 = vperm.slane %v5411_v11, 6  ;;  %v1568_v27 = vperm.slane %v5435_v20, 0 }
  0xb9   :  { %v1419_v6 = vadd.f32 %v1411_v63, %v1392_v23  ;;  %v1421_v15 = vadd.f32 %v1413_v29, %v1394_v33  ;;  %v1553_v10 = vadd.f32 %v1545_v5, %v1526_v8  ;;  %v1555_v0 = vadd.f32 %v1547_v17, %v1528_v62 }
  0xba   :  { %v8150_v18 = vunpack.c.h.bf16 %v5154_v56  ;;  %v1595_v7 = vperm.slane %v5435_v20, 1  ;;  %v8151_v13 = vunpack.c.h.bf16 %v5159_v57  ;;  %v8152_v14 = vunpack.c.h.bf16 %v5165_v59 }
  0xbb   :  { %v1446_v34 = vadd.f32 %v1438_v37, %v1419_v6  ;;  %v1448_v35 = vadd.f32 %v1440_v39, %v1421_v15  ;;  %v8153_v23 = vunpack.c.h.bf16 %v5170_v60  ;;  %v1542_v16 = vperm.slane %v5411_v11, 7 }
  0xbc   :  { %v1465_v12 = vmul.f32 %v1461_v21, %v8150_v18  ;;  %v1467_v1 = vmul.f32 %v1461_v21, %v8151_v13  ;;  %v1492_v63 = vmul.f32 %v1488_v49, %v8152_v14  ;;  %v8154_v5 = vunpack.c.l.bf16 %v5223_v24 }
  0xbd   :  { %v1494_v33 = vmul.f32 %v1488_v49, %v8153_v23  ;;  %v8155_v62 = vunpack.c.l.bf16 %v5239_v30  ;;  %v8156_v29 = vunpack.c.h.bf16 %v5175_v61  ;;  %v1622_v21 = vperm.slane %v5435_v20, 2 }
  0xbe   :  { %v1572_v17 = vmul.f32 %v1568_v27, %v8154_v5  ;;  %v1473_v36 = vadd.f32 %v1465_v12, %v1446_v34  ;;  %v1475_v37 = vadd.f32 %v1467_v1, %v1448_v35  ;;  %v8157_v6 = vunpack.c.l.bf16 %v5244_v31 }
  0xbf   :  { %v1574_v8 = vmul.f32 %v1568_v27, %v8155_v62  ;;  %v1519_v58 = vmul.f32 %v1515_v22, %v8156_v29  ;;  %v8158_v11 = vunpack.c.l.bf16 %v5249_v32  ;;  %v8159_v14 = vunpack.c.h.bf16 %v5184_v2 }
  0xc0   :  { %v1580_v44 = vadd.f32 %v1572_v17, %v1553_v10  ;;  %v1599_v49 = vmul.f32 %v1595_v7, %v8157_v6  ;;  %v1500_v18 = vadd.f32 %v1492_v63, %v1473_v36  ;;  %v1502_v13 = vadd.f32 %v1494_v33, %v1475_v37  ;;  %v880_v63 = vpop.f32.mrf.mxu3 }
  0xc1   :  { %v1582_v39 = vadd.f32 %v1574_v8, %v1555_v0  ;;  %v1601_v15 = vmul.f32 %v1595_v7, %v8158_v11  ;;  %v1521_v27 = vmul.f32 %v1515_v22, %v8159_v14  ;;  %v1649_v12 = vperm.slane %v5435_v20, 3  ;;  %v861_v7 = vpop.f32.mrf.mxu2 }
  0xc2   :  { %v1607_v34 = vadd.f32 %v1599_v49, %v1580_v44  ;;  %v8160_v1 = vunpack.c.l.bf16 %v5266_v43  ;;  %v1676_v10 = vperm.slane %v5435_v20, 4  ;;  %v8161_v0 = vunpack.c.l.bf16 %v5271_v45 }
  0xc3   :  { %v1609_v35 = vadd.f32 %v1601_v15, %v1582_v39  ;;  %v1703_v17 = vperm.slane %v5435_v20, 5  ;;  %v7955_v33 = vunpack.c.h.bf16 %v5244_v31  ;;  %v7954_v22 = vunpack.c.h.bf16 %v5249_v32 }
  0xc4   :  { %v1626_v23 = vmul.f32 %v1622_v21, %v8160_v1  ;;  %v1628_v5 = vmul.f32 %v1622_v21, %v8161_v0  ;;  %v1527_v62 = vadd.f32 %v1519_v58, %v1500_v18  ;;  %v1529_v8 = vadd.f32 %v1521_v27, %v1502_v13 }
  0xc5   :  { %v8162_v36 = vunpack.c.h.bf16 %v5189_v3  ;;  %v8163_v44 = vunpack.c.h.bf16 %v5194_v4  ;;  %v8164_v21 = vunpack.c.l.bf16 %v5276_v46  ;;  %v1730_v11 = vperm.slane %v5435_v20, 6 }
  0xc6   :  { %v1634_v29 = vadd.f32 %v1626_v23, %v1607_v34  ;;  %v1636_v6 = vadd.f32 %v1628_v5, %v1609_v35  ;;  %v8165_v15 = vunpack.c.l.bf16 %v5281_v9  ;;  %v8166_v1 = vunpack.c.l.bf16 %v5315_v42 }
  0xc7   :  { %v1546_v37 = vmul.f32 %v1542_v16, %v8162_v36  ;;  %v1548_v39 = vmul.f32 %v1542_v16, %v8163_v44  ;;  %v1653_v49 = vmul.f32 %v1649_v12, %v8164_v21  ;;  %v8167_v18 = vunpack.c.l.bf16 %v5325_v25 }
  0xc8   :  { %v1655_v14 = vmul.f32 %v1649_v12, %v8165_v15  ;;  %v1680_v58 = vmul.f32 %v1676_v10, %v8166_v1  ;;  %v5508_v27 = vadd.f32 %v880_v63, %v861_v7  ;;  %v8168_v16 = vunpack.c.l.bf16 %v5330_v26 }
  0xc9   :  { %v1682_v13 = vmul.f32 %v1676_v10, %v8167_v18  ;;  %v1661_v34 = vadd.f32 %v1653_v49, %v1634_v29  ;;  %v8169_v23 = vunpack.c.l.bf16 %v5335_v40  ;;  %v1757_v5 = vperm.slane %v5435_v20, 7 }
  0xca   :  { %v1707_v35 = vmul.f32 %v1703_v17, %v8168_v16  ;;  %v1554_v36 = vadd.f32 %v1546_v37, %v1527_v62  ;;  %v1556_v44 = vadd.f32 %v1548_v39, %v1529_v8  ;;  %v1569_v12 = vperm.slane %v5508_v27, 0 }
  0xcb   :  { %v1709_v0 = vmul.f32 %v1703_v17, %v8169_v23  ;;  %v1596_v21 = vperm.slane %v5508_v27, 1  ;;  %v1663_v15 = vadd.f32 %v1655_v14, %v1636_v6  ;;  %v8170_v10 = vunpack.c.l.bf16 %v5348_v41 }
  0xcc   :  { %v8171_v63 = vunpack.c.l.bf16 %v5375_v28  ;;  %v7959_v49 = vunpack.c.h.bf16 %v5266_v43  ;;  %v8172_v17 = vunpack.c.h.bf16 %v5223_v24  ;;  %v8173_v20 = vunpack.c.h.bf16 %v5239_v30 }
  0xcd   :  { %v1734_v7 = vmul.f32 %v1730_v11, %v8170_v10  ;;  %v7958_v8 = vunpack.c.h.bf16 %v5271_v45  ;;  %v1623_v37 = vperm.slane %v5508_v27, 2  ;;  %v1688_v39 = vadd.f32 %v1680_v58, %v1661_v34 }
  0xce   :  { %v5521_v29 = vmul.f32 %v1730_v11, %v8171_v63  ;;  %v1573_v1 = vmul.f32 %v1569_v12, %v8172_v17  ;;  %v1575_v62 = vmul.f32 %v1569_v12, %v8173_v20  ;;  %v8174_v6 = vunpack.c.l.bf16 %v5380_v19 }
  0xcf   :  { %v7957_v11 = vunpack.c.h.bf16 %v5276_v46  ;;  %v7956_v18 = vunpack.c.h.bf16 %v5281_v9  ;;  %v1600_v10 = vmul.f32 %v1596_v21, %v7955_v33  ;;  %v1602_v12 = vmul.f32 %v1596_v21, %v7954_v22 }
  0xd0   :  { %v5532_v14 = vmul.f32 %v1757_v5, %v8174_v6  ;;  %v1581_v16 = vadd.f32 %v1573_v1, %v1554_v36  ;;  %v1583_v23 = vadd.f32 %v1575_v62, %v1556_v44  ;;  %v1650_v63 = vperm.slane %v5508_v27, 3 }
  0xd1   :  { %v1677_v17 = vperm.slane %v5508_v27, 4  ;;  %v1627_v36 = vmul.f32 %v1623_v37, %v7959_v49  ;;  %v1629_v44 = vmul.f32 %v1623_v37, %v7958_v8  ;;  %v1690_v1 = vadd.f32 %v1682_v13, %v1663_v15  ;;  %v3283_v37 = vld [vmem:[%s7923_s1 + $0x58] sm:$0xf]  ;;  %v3509_v8 = vld [vmem:[%s7923_s1 + $0x238] sm:$0xf0] }
  0xd2   :  { %v1608_v20 = vadd.f32 %v1600_v10, %v1581_v16  ;;  %v1610_v6 = vadd.f32 %v1602_v12, %v1583_v23  ;;  %v1715_v62 = vadd.f32 %v1707_v35, %v1688_v39  ;;  %v8175_v21 = vunpack.c.l.bf16 %v5385_v38  ;;  %v4102_v13 = vld [vmem:[%s7923_s1 + $0x74] sm:$0xf0] }
  0xd3   :  { %v1654_v33 = vmul.f32 %v1650_v63, %v7957_v11  ;;  %v1656_v16 = vmul.f32 %v1650_v63, %v7956_v18  ;;  %v3539_v35 = vld [vmem:[%s7923_s1 + $0x258] sm:$0xf]  ;;  %v8176_v15 = vunpack.c.h.bf16 %v5315_v42  ;;  %v8177_v10 = vunpack.c.h.bf16 %v5325_v25 }
  0xd4   :  { %v5550_v22 = vmul.f32 %v1757_v5, %v8175_v21  ;;  %v1635_v34 = vadd.f32 %v1627_v36, %v1608_v20  ;;  %v1637_v58 = vadd.f32 %v1629_v44, %v1610_v6  ;;  %v4166_v5 = vld [vmem:[%s7923_s1 + $0x274] sm:$0xf0]  ;;  %v1704_v20 = vperm.slane %v5508_v27, 5  ;;  %v826_v6 = vpop.f32.mrf.mxu0  ;;  %v845_v36 = vpop.f32.mrf.mxu1  ;;  %v4090_v44 = vld [vmem:[%s7923_s1 + $0x1c] sm:$0xf] }
  0xd5   :  { %v1681_v39 = vmul.f32 %v1677_v17, %v8176_v15  ;;  %v1683_v12 = vmul.f32 %v1677_v17, %v8177_v10  ;;  %v3253_v21 = vld [vmem:[%s7923_s1 + $0x38] sm:$0xf0]  ;;  %v1731_v17 = vperm.slane %v5508_v27, 6  ;;  %v1717_v49 = vadd.f32 %v1709_v0, %v1690_v1 }
  0xd6   :  { %v1662_v18 = vadd.f32 %v1654_v33, %v1635_v34  ;;  %v1664_v11 = vadd.f32 %v1656_v16, %v1637_v58  ;;  %v4154_v10 = vld [vmem:[%s7923_s1 + $0x21c] sm:$0xf]  ;;  %v1742_v63 = vadd.f32 %v1734_v7, %v1715_v62  ;;  %v1729_v23 = vunpack.c.h.bf16 %v5375_v28 }
  0xd7   :  { %v7975_v25 = vunpack.c.h.bf16 %v5380_v19  ;;  %v8178_v34 = vunpack.c.h.bf16 %v5330_v26  ;;  %v5593_v15 = vadd.f32 %v845_v36, %v826_v6  ;;  %v3284_v42 = vor.u32 %v4102_v13, %v3283_v37  ;;  %v3251_v36 = vld [vmem:[%s7923_s1 + $0x18] sm:$0xf] }
  0xd8   :  { %v1689_v33 = vadd.f32 %v1681_v39, %v1662_v18  ;;  %v1691_v58 = vadd.f32 %v1683_v12, %v1664_v11  ;;  %v3540_v9 = vor.u32 %v4166_v5, %v3539_v35  ;;  %v3256_v46 = vor.u32 %v4090_v44, %v3253_v21  ;;  %v8185_v44 = vld [vmem:[#allocation13_spill] sm:$0xff] }
  0xd9   :  { %v1708_v16 = vmul.f32 %v1704_v20, %v8178_v34  ;;  %v3512_v45 = vor.u32 %v4154_v10, %v3509_v8  ;;  %v8179_v43 = vunpack.c.h.bf16 %v5335_v40  ;;  %v8180_v7 = vunpack.c.h.bf16 %v5348_v41  ;;  %1046 = vmatpush.bf16.msrb.mxu0 %v3284_v42  ;;  %v8186_v10 = vld [vmem:[#allocation14_spill] sm:$0xff] }
  0xda   :  { %v1758_v62 = vperm.slane %v5508_v27, 7  ;;  %v1744_v11 = vadd.f32 %v5521_v29, %v1717_v49  ;;  %v1354_v18 = vperm.slane %v5593_v15, 0  ;;  %v1381_v39 = vperm.slane %v5593_v15, 1  ;;  %1065 = vmatpush.bf16.msrb.mxu1 %v3540_v9  ;;  %1085 = vmatpush.bf16.msrb.mxu2 %v3256_v46 }
  0xdb   :  { %v1710_v32 = vmul.f32 %v1704_v20, %v8179_v43  ;;  %v1716_v0 = vadd.f32 %v1708_v16, %v1689_v33  ;;  %v1735_v1 = vmul.f32 %v1731_v17, %v8180_v7  ;;  %v1408_v37 = vperm.slane %v5593_v15, 2  ;;  %1104 = vmatpush.bf16.msrb.mxu3 %v3512_v45  ;;  %v4094_v16 = vld [vmem:[%s7923_s1 + $0x34] sm:$0xf0] }
  0xdc   :  { %v7974_v43 = vunpack.c.h.bf16 %v5385_v38  ;;  %v1435_v35 = vperm.slane %v5593_v15, 3  ;;  %v8181_v27 = vunpack.c.l.bf16 %v5114_v47  ;;  %v8182_v29 = vunpack.c.l.bf16 %v5119_v48  ;;  %v4158_v7 = vld [vmem:[%s7923_s1 + $0x234] sm:$0xf0] }
  0xdd   :  { %v1718_v8 = vadd.f32 %v1710_v32, %v1691_v58  ;;  %v1743_v13 = vadd.f32 %v1735_v1, %v1716_v0  ;;  %v8183_v12 = vunpack.c.l.bf16 %v5124_v50  ;;  %v8184_v42 = vunpack.c.l.bf16 %v5129_v51  ;;  %v3507_v0 = vld [vmem:[%s7923_s1 + $0x218] sm:$0xf]  ;;  %v864_v1 = vpop.f32.mrf.mxu2 }
  0xde   :  { %v1360_v5 = vmul.f32 %v1354_v18, %v8181_v27  ;;  %v1362_v49 = vmul.f32 %v1354_v18, %v8182_v29  ;;  %v5615_v32 = vadd.f32 %v5532_v14, %v1742_v63  ;;  %v1737_v6 = vmul.f32 %v1731_v17, %v1729_v23  ;;  %v8189_v17 = vld [vmem:[#allocation2_spill] sm:$0xff]  ;;  %v883_v18 = vpop.f32.mrf.mxu3  ;;  %v8190_v29 = vld [vmem:[#allocation3_spill] sm:$0xff] }
  0xdf   :  { %v1387_v20 = vmul.f32 %v1381_v39, %v8183_v12  ;;  %v1389_v9 = vmul.f32 %v1381_v39, %v8184_v42  ;;  %v1762_v45 = vmul.f32 %v1758_v62, %v7975_v25  ;;  %v1462_v46 = vperm.slane %v5593_v15, 4  ;;  %1086 = vmatmul.bf16.vlgmr.msrb.gmra.mxu2 %v8189_v17  ;;  %1105 = vmatmul.bf16.vlgmr.msrb.gmra.mxu3 %v8190_v29 }
  0xe0   :  { %v1368_v21 = vadd.f32 %v1360_v5, %v8185_v44  ;;  %v1370_v33 = vadd.f32 %v1362_v49, %v8186_v10  ;;  %v8187_v58 = vunpack.c.l.bf16 %v5134_v52  ;;  %v8188_v63 = vunpack.c.l.bf16 %v5139_v53 }
  0xe1   :  { %v5642_v39 = vadd.f32 %v5550_v22, %v1744_v11  ;;  %v5648_v27 = vmul.f32 %v1758_v62, %v7974_v43  ;;  %v1489_v5 = vperm.slane %v5593_v15, 5  ;;  %v5652_v49 = vadd.f32 %v1762_v45, %v1743_v13 }
  0xe2   :  { %v1414_v14 = vmul.f32 %v1408_v37, %v8187_v58  ;;  %v1416_v34 = vmul.f32 %v1408_v37, %v8188_v63  ;;  %v5644_v37 = vadd.f32 %v1737_v6, %v1718_v8  ;;  %v1395_v12 = vadd.f32 %v1387_v20, %v1368_v21 }
  0xe3   :  { %v1397_v42 = vadd.f32 %v1389_v9, %v1370_v33  ;;  %v8191_v44 = vunpack.c.l.bf16 %v5144_v54  ;;  %v1516_v22 = vperm.slane %v5593_v15, 6  ;;  %v3252_v11 = vor.u32 %v4094_v16, %v3251_v36 }
  0xe4   :  { %v3508_v8 = vor.u32 %v4158_v7, %v3507_v0  ;;  %v5657_v6 = vadd.f32 %v883_v18, %v864_v1  ;;  %v1422_v58 = vadd.f32 %v1414_v14, %v1395_v12  ;;  %v8192_v63 = vunpack.c.l.bf16 %v5149_v55 }
  0xe5   :  { %v1441_v10 = vmul.f32 %v1435_v35, %v8191_v44  ;;  %v1424_v62 = vadd.f32 %v1416_v34, %v1397_v42  ;;  %v8193_v25 = vunpack.c.l.bf16 %v5154_v56  ;;  %v8194_v20 = vunpack.c.l.bf16 %v5159_v57  ;;  %1047 = vmatpush.bf16.msrb.mxu0 %v3252_v11 }
  0xe6   :  { %v1443_v43 = vmul.f32 %v1435_v35, %v8192_v63  ;;  %v8195_v45 = vunpack.c.l.bf16 %v5165_v59  ;;  %1066 = vmatpush.bf16.msrb.mxu1 %v3508_v8  ;;  %v1355_v36 = vperm.slane %v5657_v6, 0  ;;  %v1382_v33 = vperm.slane %v5657_v6, 1  ;;  %v8201_v8 = vld [vmem:[#allocation15_spill] sm:$0xff] }
  0xe7   :  { %v1468_v13 = vmul.f32 %v1462_v46, %v8193_v25  ;;  %v1470_v9 = vmul.f32 %v1462_v46, %v8194_v20  ;;  %v1449_v14 = vadd.f32 %v1441_v10, %v1422_v58  ;;  %v8196_v16 = vunpack.c.l.bf16 %v5170_v60 }
  0xe8   :  { %v1495_v21 = vmul.f32 %v1489_v5, %v8195_v45  ;;  %v1451_v34 = vadd.f32 %v1443_v43, %v1424_v62  ;;  %v1409_v0 = vperm.slane %v5657_v6, 2  ;;  %v8197_v25 = vunpack.c.l.bf16 %v5175_v61  ;;  %1048 = vmatmul.bf16.vlgmr.msrb.gmra.mxu0 %v8189_v17  ;;  %v8202_v62 = vld [vmem:[#allocation16_spill] sm:$0xff] }
  0xe9   :  { %v1497_v35 = vmul.f32 %v1489_v5, %v8196_v16  ;;  %v1543_v46 = vperm.slane %v5593_v15, 7  ;;  %v8198_v1 = vunpack.c.h.bf16 %v5114_v47  ;;  %v8199_v12 = vunpack.c.h.bf16 %v5119_v48  ;;  %1067 = vmatmul.bf16.vlgmr.msrb.gmra.mxu1 %v8190_v29 }
  0xea   :  { %v1522_v7 = vmul.f32 %v1516_v22, %v8197_v25  ;;  %v1476_v44 = vadd.f32 %v1468_v13, %v1449_v14  ;;  %v1478_v11 = vadd.f32 %v1470_v9, %v1451_v34  ;;  %v8200_v43 = vunpack.c.l.bf16 %v5184_v2  ;;  %v828_v13 = vpop.f32.mrf.mxu0  ;;  %v847_v9 = vpop.f32.mrf.mxu1 }
  0xeb   :  { %v1361_v18 = vmul.f32 %v1355_v36, %v8198_v1  ;;  %v1363_v42 = vmul.f32 %v1355_v36, %v8199_v12  ;;  %v1436_v5 = vperm.slane %v5657_v6, 3  ;;  %v8203_v15 = vunpack.c.h.bf16 %v5124_v50 }
  0xec   :  { %v1524_v10 = vmul.f32 %v1516_v22, %v8200_v43  ;;  %v8204_v20 = vunpack.c.h.bf16 %v5129_v51  ;;  %v1503_v45 = vadd.f32 %v1495_v21, %v1476_v44  ;;  %v1505_v22 = vadd.f32 %v1497_v35, %v1478_v11 }
  0xed   :  { %v1369_v58 = vadd.f32 %v1361_v18, %v8201_v8  ;;  %v1371_v63 = vadd.f32 %v1363_v42, %v8202_v62  ;;  %v1388_v47 = vmul.f32 %v1382_v33, %v8203_v15  ;;  %v8205_v36 = vunpack.c.h.bf16 %v5134_v52 }
  0xee   :  { %v1390_v48 = vmul.f32 %v1382_v33, %v8204_v20  ;;  %v1463_v17 = vperm.slane %v5657_v6, 4  ;;  %v8206_v25 = vunpack.c.h.bf16 %v5139_v53  ;;  %v1490_v1 = vperm.slane %v5657_v6, 5 }
  0xef   :  { %v1415_v14 = vmul.f32 %v1409_v0, %v8205_v36  ;;  %v1396_v34 = vadd.f32 %v1388_v47, %v1369_v58  ;;  %v1530_v51 = vadd.f32 %v1522_v7, %v1503_v45  ;;  %v1532_v33 = vadd.f32 %v1524_v10, %v1505_v22  ;;  %v8217_v22 = vld [vmem:[#allocation5_spill] sm:$0xff] }
  0xf0   :  { %v1398_v16 = vadd.f32 %v1390_v48, %v1371_v63  ;;  %v1417_v50 = vmul.f32 %v1409_v0, %v8206_v25  ;;  %v8207_v29 = vunpack.c.h.bf16 %v5144_v54  ;;  %v5698_v12 = vadd.f32 %v847_v9, %v828_v13  ;;  %1110 = vmatmul.bf16.gmra.mxu3 %v8217_v22 }
  0xf1   :  { %v1423_v21 = vadd.f32 %v1415_v14, %v1396_v34  ;;  %v8208_v52 = vunpack.c.h.bf16 %v5149_v55  ;;  %v1517_v44 = vperm.slane %v5657_v6, 6  ;;  %v8209_v11 = vunpack.c.l.bf16 %v5189_v3 }
  0xf2   :  { %v1442_v18 = vmul.f32 %v1436_v5, %v8207_v29  ;;  %v1425_v35 = vadd.f32 %v1417_v50, %v1398_v16  ;;  %v8210_v0 = vunpack.c.l.bf16 %v5194_v4  ;;  %v8211_v7 = vunpack.c.h.bf16 %v5154_v56 }
  0xf3   :  { %v1444_v42 = vmul.f32 %v1436_v5, %v8208_v52  ;;  %v1549_v53 = vmul.f32 %v1543_v46, %v8209_v11  ;;  %v1544_v54 = vperm.slane %v5657_v6, 7  ;;  %v8212_v62 = vunpack.c.h.bf16 %v5159_v57 }
  0xf4   :  { %v1551_v43 = vmul.f32 %v1543_v46, %v8210_v0  ;;  %v1469_v10 = vmul.f32 %v1463_v17, %v8211_v7  ;;  %v1450_v8 = vadd.f32 %v1442_v18, %v1423_v21  ;;  %v8213_v55 = vunpack.c.h.bf16 %v5165_v59  ;;  %v8214_v46 = vld [vmem:[#allocation4_spill] sm:$0xff]  ;;  %v8222_v18 = vld [vmem:[#allocation6_spill] sm:$0xff]  ;;  %v866_v0 = vpop.f32.mrf.mxu2 }
  0xf5   :  { %v1452_v58 = vadd.f32 %v1444_v42, %v1425_v35  ;;  %v1471_v63 = vmul.f32 %v1463_v17, %v8212_v62  ;;  %v1557_v15 = vadd.f32 %v1549_v53, %v1530_v51  ;;  %v1570_v20 = vperm.slane %v5698_v12, 0  ;;  %1091 = vmatmul.bf16.gmra.mxu2 %v8214_v46 }
  0xf6   :  { %v1496_v5 = vmul.f32 %v1490_v1, %v8213_v55  ;;  %v1559_v47 = vadd.f32 %v1551_v43, %v1532_v33  ;;  %v1597_v48 = vperm.slane %v5698_v12, 1  ;;  %v1477_v56 = vadd.f32 %v1469_v10, %v1450_v8  ;;  %v885_v43 = vpop.f32.mrf.mxu3  ;;  %v8225_v8 = vld [vmem:[#allocation7_spill] sm:$0xff] }
  0xf7   :  { %v1479_v13 = vadd.f32 %v1471_v63, %v1452_v58  ;;  %v8215_v6 = vunpack.c.h.bf16 %v5170_v60  ;;  %v8216_v45 = vunpack.c.h.bf16 %v5175_v61  ;;  %v8218_v59 = vunpack.c.h.bf16 %v5184_v2  ;;  %v8227_v63 = vld [vmem:[#allocation8_spill] sm:$0xff] }
  0xf8   :  { %v8219_v14 = vunpack.c.l.bf16 %v5223_v24  ;;  %v8220_v34 = vunpack.c.l.bf16 %v5239_v30  ;;  %v1624_v25 = vperm.slane %v5698_v12, 2  ;;  %v1504_v50 = vadd.f32 %v1496_v5, %v1477_v56  ;;  %1053 = vmatmul.bf16.gmra.mxu0 %v8214_v46 }
  0xf9   :  { %v1498_v9 = vmul.f32 %v1490_v1, %v8215_v6  ;;  %v1523_v57 = vmul.f32 %v1517_v44, %v8216_v45  ;;  %v1525_v36 = vmul.f32 %v1517_v44, %v8218_v59  ;;  %v1651_v60 = vperm.slane %v5698_v12, 3  ;;  %v8234_v45 = vld [vmem:[#allocation11_spill] sm:$0xff]  ;;  %1072 = vmatmul.bf16.gmra.mxu1 %v8217_v22 }
  0xfa   :  { %v1576_v17 = vmul.f32 %v1570_v20, %v8219_v14  ;;  %v1578_v16 = vmul.f32 %v1570_v20, %v8220_v34  ;;  %v1678_v61 = vperm.slane %v5698_v12, 4  ;;  %v8221_v29 = vunpack.c.l.bf16 %v5244_v31 }
  0xfb   :  { %v1506_v51 = vadd.f32 %v1498_v9, %v1479_v13  ;;  %v8223_v21 = vunpack.c.l.bf16 %v8222_v18  ;;  %v5737_v52 = vadd.f32 %v5648_v27, %v5644_v37  ;;  %v1531_v42 = vadd.f32 %v1523_v57, %v1504_v50  ;;  %v8230_v37 = vld [vmem:[#allocation9_spill] sm:$0xff] }
  0xfc   :  { %v1584_v1 = vadd.f32 %v1576_v17, %v1557_v15  ;;  %v1586_v33 = vadd.f32 %v1578_v16, %v1559_v47  ;;  %v1603_v2 = vmul.f32 %v1597_v48, %v8221_v29  ;;  %v8224_v11 = vunpack.c.h.bf16 %v5189_v3 }
  0xfd   :  { %v1605_v35 = vmul.f32 %v1597_v48, %v8223_v21  ;;  %v1533_v44 = vadd.f32 %v1525_v36, %v1506_v51  ;;  %v8226_v58 = vunpack.c.l.bf16 %v8225_v8  ;;  %v8228_v55 = vunpack.c.l.bf16 %v8227_v63  ;;  %v8232_v48 = vld [vmem:[#allocation10_spill] sm:$0xff] }
  0xfe   :  { %v1550_v53 = vmul.f32 %v1544_v54, %v8224_v11  ;;  %v1611_v7 = vadd.f32 %v1603_v2, %v1584_v1  ;;  %v8229_v15 = vunpack.c.h.bf16 %v5194_v4  ;;  %v8231_v27 = vunpack.c.l.bf16 %v8230_v37  ;;  %v897_v1 = vpop.f32.mrf.mxu0 }
  0xff   :  { %v1613_v10 = vadd.f32 %v1605_v35, %v1586_v33  ;;  %v1630_v62 = vmul.f32 %v1624_v25, %v8226_v58  ;;  %v1632_v5 = vmul.f32 %v1624_v25, %v8228_v55  ;;  %v8233_v56 = vunpack.c.l.bf16 %v8232_v48  ;;  %v916_v33 = vpop.f32.mrf.mxu1 }
 0x100   :  { %v1552_v47 = vmul.f32 %v1544_v54, %v8229_v15  ;;  %v1657_v20 = vmul.f32 %v1651_v60, %v8231_v27  ;;  %v1705_v13 = vperm.slane %v5698_v12, 5  ;;  %v8235_v57 = vunpack.c.l.bf16 %v8234_v45  ;;  %v8236_v54 = vld [vmem:[#allocation12_spill] sm:$0xff] }
 0x101   :  { %v1659_v3 = vmul.f32 %v1651_v60, %v8233_v56  ;;  %v1638_v6 = vadd.f32 %v1630_v62, %v1611_v7  ;;  %v1640_v9 = vadd.f32 %v1632_v5, %v1613_v10  ;;  %v5754_v36 = vadd.f32 %v885_v43, %v866_v0 }
 0x102   :  { %v1684_v59 = vmul.f32 %v1678_v61, %v8235_v57  ;;  %v1558_v14 = vadd.f32 %v1550_v53, %v1531_v42  ;;  %v1560_v4 = vadd.f32 %v1552_v47, %v1533_v44  ;;  %v8237_v17 = vunpack.c.l.bf16 %v8236_v54 }
 0x103   :  { %v1732_v16 = vperm.slane %v5698_v12, 6  ;;  %v1665_v25 = vadd.f32 %v1657_v20, %v1638_v6  ;;  %v1667_v50 = vadd.f32 %v1659_v3, %v1640_v9  ;;  %v1571_v51 = vperm.slane %v5754_v36, 0 }
 0x104   :  { %v1686_v34 = vmul.f32 %v1678_v61, %v8237_v17  ;;  %v1598_v60 = vperm.slane %v5754_v36, 1  ;;  %v8238_v29 = vunpack.c.l.bf16 %v5330_v26  ;;  %v8239_v2 = vunpack.c.l.bf16 %v5335_v40 }
 0x105   :  { %v1759_v61 = vperm.slane %v5698_v12, 7  ;;  %v1625_v35 = vperm.slane %v5754_v36, 2  ;;  %v1692_v42 = vadd.f32 %v1684_v59, %v1665_v25  ;;  %v8240_v44 = vunpack.c.h.bf16 %v5223_v24 }
 0x106   :  { %v1711_v46 = vmul.f32 %v1705_v13, %v8238_v29  ;;  %v1713_v21 = vmul.f32 %v1705_v13, %v8239_v2  ;;  %v1694_v22 = vadd.f32 %v1686_v34, %v1667_v50  ;;  %v8241_v53 = vunpack.c.h.bf16 %v5239_v30 }
 0x107   :  { %v1577_v11 = vmul.f32 %v1571_v51, %v8240_v44  ;;  %v8242_v43 = vunpack.c.l.bf16 %v5348_v41  ;;  %v1652_v10 = vperm.slane %v5754_v36, 3  ;;  %v1679_v58 = vperm.slane %v5754_v36, 4 }
 0x108   :  { %v1579_v0 = vmul.f32 %v1571_v51, %v8241_v53  ;;  %v5777_v62 = vadd.f32 %v916_v33, %v897_v1  ;;  %v8243_v5 = vunpack.c.h.bf16 %v5244_v31  ;;  %v8244_v24 = vunpack.c.h.bf16 %v8222_v18 }
 0x109   :  { %v1738_v7 = vmul.f32 %v1732_v16, %v8242_v43  ;;  %v1585_v12 = vadd.f32 %v1577_v11, %v1558_v14  ;;  %v1719_v27 = vadd.f32 %v1711_v46, %v1692_v42  ;;  %v1721_v30 = vadd.f32 %v1713_v21, %v1694_v22  ;;  %v5820_v46 = vld [vmem:[%s7925_s2 + $0x118] sm:$0xff]  ;;  %v5834_v22 = vld [vmem:[%s7925_s2 + $0x128] sm:$0xff] }
 0x10a   :  { %v1587_v55 = vadd.f32 %v1579_v0, %v1560_v4  ;;  %v1604_v15 = vmul.f32 %v1598_v60, %v8243_v5  ;;  %v1606_v47 = vmul.f32 %v1598_v60, %v8244_v24  ;;  %v8245_v20 = vunpack.c.l.bf16 %v5375_v28  ;;  %v5935_v28 = vld [vmem:[%s7925_s2 + $0x170] sm:$0xff] }
 0x10b   :  { %v1706_v3 = vperm.slane %v5754_v36, 5  ;;  %v8246_v9 = vunpack.c.h.bf16 %v8225_v8  ;;  %v8247_v59 = vunpack.c.h.bf16 %v8227_v63  ;;  %v8248_v31 = vunpack.c.l.bf16 %v5380_v19  ;;  %v5801_v8 = vld [vmem:[%s7925_s2 + $0x100] sm:$0xff]  ;;  %v5806_v63 = vld [vmem:[%s7925_s2 + $0x108] sm:$0xff] }
 0x10c   :  { %v1740_v56 = vmul.f32 %v1732_v16, %v8245_v20  ;;  %v1612_v13 = vadd.f32 %v1604_v15, %v1585_v12  ;;  %v1614_v6 = vadd.f32 %v1606_v47, %v1587_v55  ;;  %v8249_v18 = vunpack.c.l.bf16 %v5385_v38  ;;  %v5853_v15 = vld [vmem:[%s7925_s2 + $0x138] sm:$0xff] }
 0x10d   :  { %v1631_v57 = vmul.f32 %v1625_v35, %v8246_v9  ;;  %v1633_v14 = vmul.f32 %v1625_v35, %v8247_v59  ;;  %v1765_v4 = vmul.f32 %v1759_v61, %v8248_v31  ;;  %v8250_v34 = vunpack.c.h.bf16 %v8230_v37 }
 0x10e   :  { %v1767_v17 = vmul.f32 %v1759_v61, %v8249_v18  ;;  %v8251_v16 = vunpack.c.h.bf16 %v8232_v48  ;;  %v8252_v1 = vunpack.c.h.bf16 %v8234_v45  ;;  %v8253_v37 = vunpack.c.h.bf16 %v8236_v54  ;;  %v5815_v48 = vld [vmem:[%s7925_s2 + $0x110] sm:$0xff]  ;;  %v5829_v54 = vld [vmem:[%s7925_s2 + $0x120] sm:$0xff] }
 0x10f   :  { %v1658_v25 = vmul.f32 %v1652_v10, %v8250_v34  ;;  %v1639_v51 = vadd.f32 %v1631_v57, %v1612_v13  ;;  %v1641_v60 = vadd.f32 %v1633_v14, %v1614_v6  ;;  %v1746_v2 = vadd.f32 %v1738_v7, %v1719_v27  ;;  %v5875_v14 = vld [vmem:[%s7925_s2 + $0x140] sm:$0xff]  ;;  %v5893_v34 = vld [vmem:[%s7925_s2 + $0x150] sm:$0xff] }
 0x110   :  { %v1660_v50 = vmul.f32 %v1652_v10, %v8251_v16  ;;  %v1685_v33 = vmul.f32 %v1679_v58, %v8252_v1  ;;  %v1687_v29 = vmul.f32 %v1679_v58, %v8253_v37  ;;  %v1748_v21 = vadd.f32 %v1740_v56, %v1721_v30  ;;  %v5846_v10 = vld [vmem:[%s7925_s2 + $0x130] sm:$0xff] }
 0x111   :  { %v8254_v61 = vunpack.c.h.bf16 %v5330_v26  ;;  %v8255_v45 = vunpack.c.h.bf16 %v5335_v40  ;;  %v1666_v44 = vadd.f32 %v1658_v25, %v1639_v51  ;;  %v1733_v11 = vperm.slane %v5754_v36, 6 }
 0x112   :  { %v8019_v53 = vunpack.c.l.bf16 %v5801_v8  ;;  %v8014_v26 = vunpack.c.l.bf16 %v5806_v63  ;;  %v1784_v40 = vperm.slane %v5777_v62, 0  ;;  %v8012_v0 = vunpack.c.l.bf16 %v5815_v48 }
 0x113   :  { %v1712_v35 = vmul.f32 %v1706_v3, %v8254_v61  ;;  %v1714_v42 = vmul.f32 %v1706_v3, %v8255_v45  ;;  %v8011_v43 = vunpack.c.l.bf16 %v5820_v46  ;;  %v1811_v7 = vperm.slane %v5777_v62, 1  ;;  %v5911_v61 = vld [vmem:[%s7925_s2 + $0x160] sm:$0xff] }
 0x114   :  { %v1668_v58 = vadd.f32 %v1660_v50, %v1641_v60  ;;  %v1693_v12 = vadd.f32 %v1685_v33, %v1666_v44  ;;  %v8007_v55 = vunpack.c.l.bf16 %v5829_v54  ;;  %v8005_v5 = vunpack.c.l.bf16 %v5834_v22 }
 0x115   :  { %v1788_v24 = vmul.f32 %v1784_v40, %v8019_v53  ;;  %v1790_v47 = vmul.f32 %v1784_v40, %v8014_v26  ;;  %v1815_v27 = vmul.f32 %v1811_v7, %v8012_v0  ;;  %v1817_v30 = vmul.f32 %v1811_v7, %v8011_v43 }
 0x116   :  { %v5863_v20 = vadd.f32 %v1765_v4, %v1746_v2  ;;  %v1760_v56 = vperm.slane %v5754_v36, 7  ;;  %v1838_v3 = vperm.slane %v5777_v62, 2  ;;  %v8002_v13 = vunpack.c.l.bf16 %v5846_v10  ;;  %v5880_v36 = vld [vmem:[%s7925_s2 + $0x148] sm:$0xff] }
 0x117   :  { %v1796_v6 = vadd.f32 %v1788_v24, %v5615_v32  ;;  %v1798_v9 = vadd.f32 %v1790_v47, %v5642_v39  ;;  %v8001_v57 = vunpack.c.l.bf16 %v5853_v15  ;;  %v1865_v59 = vperm.slane %v5777_v62, 3 }
 0x118   :  { %v5882_v31 = vadd.f32 %v1767_v17, %v1748_v21  ;;  %v8256_v32 = vunpack.c.h.bf16 %v5348_v41  ;;  %v1842_v39 = vmul.f32 %v1838_v3, %v8007_v55  ;;  %v1844_v18 = vmul.f32 %v1838_v3, %v8005_v5  ;;  %v5898_v41 = vld [vmem:[%s7925_s2 + $0x158] sm:$0xff] }
 0x119   :  { %v1695_v25 = vadd.f32 %v1687_v29, %v1668_v58  ;;  %v1720_v16 = vadd.f32 %v1712_v35, %v1693_v12  ;;  %v1823_v50 = vadd.f32 %v1815_v27, %v1796_v6  ;;  %v1825_v51 = vadd.f32 %v1817_v30, %v1798_v9  ;;  %v5916_v35 = vld [vmem:[%s7925_s2 + $0x168] sm:$0xff] }
 0x11a   :  { %v1739_v4 = vmul.f32 %v1733_v11, %v8256_v32  ;;  %v1869_v17 = vmul.f32 %v1865_v59, %v8002_v13  ;;  %v1871_v60 = vmul.f32 %v1865_v59, %v8001_v57  ;;  %v7998_v1 = vunpack.c.l.bf16 %v5875_v14 }
 0x11b   :  { %v7996_v33 = vunpack.c.l.bf16 %v5880_v36  ;;  %v1850_v37 = vadd.f32 %v1842_v39, %v1823_v50  ;;  %v1852_v29 = vadd.f32 %v1844_v18, %v1825_v51  ;;  %v1892_v2 = vperm.slane %v5777_v62, 4 }
 0x11c   :  { %v7994_v21 = vunpack.c.l.bf16 %v5893_v34  ;;  %v1741_v45 = vmul.f32 %v1733_v11, %v1729_v23  ;;  %v8257_v44 = vunpack.c.h.bf16 %v5380_v19  ;;  %v7993_v7 = vunpack.c.l.bf16 %v5898_v41  ;;  %v935_v19 = vpop.f32.mrf.mxu2  ;;  %v954_v23 = vpop.f32.mrf.mxu3 }
 0x11d   :  { %v1919_v58 = vperm.slane %v5777_v62, 5  ;;  %v8258_v12 = vunpack.c.h.bf16 %v5385_v38  ;;  %v1877_v47 = vadd.f32 %v1869_v17, %v1850_v37  ;;  %v1879_v27 = vadd.f32 %v1871_v60, %v1852_v29 }
 0x11e   :  { %v5922_v40 = vmul.f32 %v1760_v56, %v8257_v44  ;;  %v1896_v30 = vmul.f32 %v1892_v2, %v7998_v1  ;;  %v1722_v11 = vadd.f32 %v1714_v42, %v1695_v25  ;;  %v5937_v3 = vadd.f32 %v1739_v4, %v1720_v16 }
 0x11f   :  { %v5928_v24 = vmul.f32 %v1760_v56, %v8258_v12  ;;  %v7991_v6 = vunpack.c.l.bf16 %v5911_v61  ;;  %v7976_v38 = vunpack.c.l.bf16 %v5916_v35  ;;  %v5944_v56 = vld [vmem:[%s7925_s2 + $0x178] sm:$0xff]  ;;  %v1898_v9 = vmul.f32 %v1892_v2, %v7996_v33 }
 0x120   :  { %v1904_v59 = vadd.f32 %v1896_v30, %v1877_v47  ;;  %v1923_v32 = vmul.f32 %v1919_v58, %v7994_v21  ;;  %v1946_v42 = vperm.slane %v5777_v62, 6  ;;  %v1925_v4 = vmul.f32 %v1919_v58, %v7993_v7 }
 0x121   :  { %v7983_v39 = vunpack.c.l.bf16 %v5935_v28  ;;  %v5954_v18 = vadd.f32 %v954_v23, %v935_v19  ;;  %v7977_v25 = vunpack.c.h.bf16 %v5801_v8  ;;  %v1906_v16 = vadd.f32 %v1898_v9, %v1879_v27 }
 0x122   :  { %v1931_v50 = vadd.f32 %v1923_v32, %v1904_v59  ;;  %v7986_v51 = vunpack.c.l.bf16 %v5944_v56  ;;  %v1973_v17 = vperm.slane %v5777_v62, 7  ;;  %v7978_v60 = vunpack.c.h.bf16 %v5806_v63 }
 0x123   :  { %v1785_v37 = vperm.slane %v5954_v18, 0  ;;  %v7982_v29 = vunpack.c.h.bf16 %v5815_v48  ;;  %v7981_v2 = vunpack.c.h.bf16 %v5820_v46  ;;  %v1950_v44 = vmul.f32 %v1946_v42, %v7991_v6 }
 0x124   :  { %v1952_v58 = vmul.f32 %v1946_v42, %v7976_v38  ;;  %v1812_v12 = vperm.slane %v5954_v18, 1  ;;  %v7980_v47 = vunpack.c.h.bf16 %v5829_v54  ;;  %v7979_v30 = vunpack.c.h.bf16 %v5834_v22 }
 0x125   :  { %v1789_v62 = vmul.f32 %v1785_v37, %v7977_v25  ;;  %v1791_v27 = vmul.f32 %v1785_v37, %v7978_v60  ;;  %v1839_v19 = vperm.slane %v5954_v18, 2  ;;  %v1933_v23 = vadd.f32 %v1925_v4, %v1906_v16 }
 0x126   :  { %v1958_v9 = vadd.f32 %v1950_v44, %v1931_v50  ;;  %v1816_v59 = vmul.f32 %v1812_v12, %v7982_v29  ;;  %v1818_v32 = vmul.f32 %v1812_v12, %v7981_v2  ;;  %v7989_v60 = vunpack.c.h.bf16 %v5846_v10 }
 0x127   :  { %v1797_v42 = vadd.f32 %v1789_v62, %v5652_v49  ;;  %v1799_v38 = vadd.f32 %v1791_v27, %v5737_v52  ;;  %v1843_v25 = vmul.f32 %v1839_v19, %v7980_v47  ;;  %v1845_v37 = vmul.f32 %v1839_v19, %v7979_v30 }
 0x128   :  { %v7987_v4 = vunpack.c.h.bf16 %v5853_v15  ;;  %v1866_v16 = vperm.slane %v5954_v18, 3  ;;  %v7985_v50 = vunpack.c.h.bf16 %v5875_v14  ;;  %v7984_v49 = vunpack.c.h.bf16 %v5880_v36 }
 0x129   :  { %v1824_v44 = vadd.f32 %v1816_v59, %v1797_v42  ;;  %v1826_v12 = vadd.f32 %v1818_v32, %v1799_v38  ;;  %v1893_v52 = vperm.slane %v5954_v18, 4  ;;  %v5991_v62 = vadd.f32 %v1741_v45, %v1722_v11 }
 0x12a   :  { %v1960_v27 = vadd.f32 %v1952_v58, %v1933_v23  ;;  %v1977_v19 = vmul.f32 %v1973_v17, %v7983_v39  ;;  %v1870_v30 = vmul.f32 %v1866_v16, %v7989_v60  ;;  %v1872_v29 = vmul.f32 %v1866_v16, %v7987_v4  ;;  %v899_v58 = vpop.f32.mrf.mxu0  ;;  %v918_v23 = vpop.f32.mrf.mxu1  ;;  %v6011_v16 = vld [vmem:[%s7925_s2 + $0x180] sm:$0xff] }
 0x12b   :  { %v1851_v47 = vadd.f32 %v1843_v25, %v1824_v44  ;;  %v1853_v2 = vadd.f32 %v1845_v37, %v1826_v12  ;;  %v7988_v38 = vunpack.c.h.bf16 %v5893_v34  ;;  %v1979_v59 = vmul.f32 %v1973_v17, %v7986_v51  ;;  %v6016_v17 = vld [vmem:[%s7925_s2 + $0x188] sm:$0xff]  ;;  %v6029_v44 = vld [vmem:[%s7925_s2 + $0x198] sm:$0xff]  ;;  %v6042_v4 = vld [vmem:[%s7925_s2 + $0x1a0] sm:$0xff] }
 0x12c   :  { %v1985_v32 = vadd.f32 %v1977_v19, %v1958_v9  ;;  %v7990_v45 = vunpack.c.h.bf16 %v5898_v41  ;;  %v1920_v11 = vperm.slane %v5954_v18, 5  ;;  %v1897_v25 = vmul.f32 %v1893_v52, %v7985_v50  ;;  %8259 = vst [vmem:[#allocation13_spill] sm:$0xff] %v6016_v17 }
 0x12d   :  { %v1878_v42 = vadd.f32 %v1870_v30, %v1851_v47  ;;  %v1880_v39 = vadd.f32 %v1872_v29, %v1853_v2  ;;  %v1899_v37 = vmul.f32 %v1893_v52, %v7984_v49  ;;  %v1987_v9 = vadd.f32 %v1979_v59, %v1960_v27  ;;  %v6024_v30 = vld [vmem:[%s7925_s2 + $0x190] sm:$0xff] }
 0x12e   :  { %v7992_v47 = vunpack.c.h.bf16 %v5911_v61  ;;  %v7995_v29 = vunpack.c.h.bf16 %v5916_v35  ;;  %v1947_v2 = vperm.slane %v5954_v18, 6  ;;  %v1924_v27 = vmul.f32 %v1920_v11, %v7988_v38 }
 0x12f   :  { %v1905_v12 = vadd.f32 %v1897_v25, %v1878_v42  ;;  %v1907_v52 = vadd.f32 %v1899_v37, %v1880_v39  ;;  %v6033_v19 = vadd.f32 %v918_v23, %v899_v58  ;;  %v7997_v59 = vunpack.c.h.bf16 %v5935_v28 }
 0x130   :  { %v1974_v49 = vperm.slane %v5954_v18, 7  ;;  %v8000_v50 = vunpack.c.l.bf16 %v6011_v16  ;;  %v7999_v51 = vunpack.c.l.bf16 %v6016_v17  ;;  %v1926_v39 = vmul.f32 %v1920_v11, %v7990_v45  ;;  %v6051_v18 = vld [vmem:[%s7925_s2 + $0x1a8] sm:$0xff]  ;;  %v6061_v11 = vld [vmem:[%s7925_s2 + $0x1b0] sm:$0xff] }
 0x131   :  { %v1932_v42 = vadd.f32 %v1924_v27, %v1905_v12  ;;  %v8004_v58 = vunpack.c.l.bf16 %v6024_v30  ;;  %v8003_v23 = vunpack.c.l.bf16 %v6029_v44  ;;  %8260 = vst [vmem:[#allocation14_spill] sm:$0xff] %v6051_v18  ;;  %v1951_v25 = vmul.f32 %v1947_v2, %v7992_v47  ;;  %v6070_v47 = vld [vmem:[%s7925_s2 + $0x1b8] sm:$0xff] }
 0x132   :  { %v8009_v37 = vunpack.c.h.bf16 %v5944_v56  ;;  %v2000_v38 = vperm.slane %v6033_v19, 0  ;;  %v2027_v60 = vperm.slane %v6033_v19, 1  ;;  %v1934_v12 = vadd.f32 %v1926_v39, %v1907_v52  ;;  %v6082_v39 = vld [vmem:[%s7925_s2 + $0x1c0] sm:$0xff]  ;;  %v921_v26 = vpop.f32.mrf.mxu1 }
 0x133   :  { %v1953_v27 = vmul.f32 %v1947_v2, %v7995_v29  ;;  %v8006_v45 = vunpack.c.l.bf16 %v6042_v4  ;;  %v2054_v6 = vperm.slane %v6033_v19, 2  ;;  %v1978_v7 = vmul.f32 %v1974_v49, %v7997_v59 }
 0x134   :  { %v2004_v21 = vmul.f32 %v2000_v38, %v8000_v50  ;;  %v2006_v52 = vmul.f32 %v2000_v38, %v7999_v51  ;;  %v8010_v2 = vunpack.c.l.bf16 %v6051_v18  ;;  %v1959_v29 = vadd.f32 %v1951_v25, %v1932_v42  ;;  %v6092_v38 = vld [vmem:[%s7925_s2 + $0x1c8] sm:$0xff]  ;;  %v6099_v42 = vld [vmem:[%s7925_s2 + $0x1d0] sm:$0xff] }
 0x135   :  { %v2031_v33 = vmul.f32 %v2027_v60, %v8004_v58  ;;  %v2033_v59 = vmul.f32 %v2027_v60, %v8003_v23  ;;  %v8008_v1 = vunpack.c.l.bf16 %v6061_v11  ;;  %v8013_v57 = vunpack.c.l.bf16 %v6070_v47 }
 0x136   :  { %v2012_v51 = vadd.f32 %v2004_v21, %v1985_v32  ;;  %v2014_v50 = vadd.f32 %v2006_v52, %v1987_v9  ;;  %v2081_v13 = vperm.slane %v6033_v19, 3  ;;  %v1961_v25 = vadd.f32 %v1953_v27, %v1934_v12  ;;  %v6108_v21 = vld [vmem:[%s7925_s2 + $0x1d8] sm:$0xff] }
 0x137   :  { %v2058_v60 = vmul.f32 %v2054_v6, %v8006_v45  ;;  %v8018_v23 = vunpack.c.l.bf16 %v6082_v39  ;;  %v2108_v58 = vperm.slane %v6033_v19, 4  ;;  %v2060_v52 = vmul.f32 %v2054_v6, %v8010_v2 }
 0x138   :  { %v2039_v32 = vadd.f32 %v2031_v33, %v2012_v51  ;;  %v2041_v9 = vadd.f32 %v2033_v59, %v2014_v50  ;;  %v8017_v5 = vunpack.c.l.bf16 %v6092_v38  ;;  %v1980_v12 = vmul.f32 %v1974_v49, %v8009_v37  ;;  %v6122_v33 = vld [vmem:[%s7925_s2 + $0x1e0] sm:$0xff]  ;;  %v6130_v49 = vld [vmem:[%s7925_s2 + $0x1e8] sm:$0xff]  ;;  %v956_v37 = vpop.f32.mrf.mxu3 }
 0x139   :  { %v2085_v27 = vmul.f32 %v2081_v13, %v8008_v1  ;;  %v8015_v45 = vunpack.c.l.bf16 %v6099_v42  ;;  %v2135_v55 = vperm.slane %v6033_v19, 5  ;;  %8261 = vst [vmem:[#allocation2_spill] sm:$0xff] %v6122_v33  ;;  %v2087_v6 = vmul.f32 %v2081_v13, %v8013_v57  ;;  %v937_v1 = vpop.f32.mrf.mxu2 }
 0x13a   :  { %v2066_v51 = vadd.f32 %v2058_v60, %v2039_v32  ;;  %v2068_v50 = vadd.f32 %v2060_v52, %v2041_v9  ;;  %v8016_v59 = vunpack.c.l.bf16 %v6108_v21  ;;  %8262 = vst [vmem:[#allocation3_spill] sm:$0xff] %v6130_v49  ;;  %v6134_v2 = vadd.f32 %v5922_v40, %v5937_v3  ;;  %v6147_v40 = vld [vmem:[%s7925_s2 + $0x1f0] sm:$0xff] }
 0x13b   :  { %v1986_v43 = vadd.f32 %v1978_v7, %v1959_v29  ;;  %v1988_v0 = vadd.f32 %v1980_v12, %v1961_v25  ;;  %v2112_v60 = vmul.f32 %v2108_v58, %v8018_v23  ;;  %v2114_v9 = vmul.f32 %v2108_v58, %v8017_v5  ;;  %8263 = vst [vmem:[#allocation15_spill] sm:$0xff] %v6147_v40  ;;  %v6152_v7 = vld [vmem:[%s7925_s2 + $0x1f8] sm:$0xff] }
 0x13c   :  { %v2093_v32 = vadd.f32 %v2085_v27, %v2066_v51  ;;  %v2095_v13 = vadd.f32 %v2087_v6, %v2068_v50  ;;  %v8024_v52 = vunpack.c.l.bf16 %v6122_v33  ;;  %v2139_v57 = vmul.f32 %v2135_v55, %v8015_v45 }
 0x13d   :  { %v6154_v3 = vadd.f32 %v956_v37, %v937_v1  ;;  %v8020_v29 = vunpack.c.h.bf16 %v6011_v16  ;;  %v2141_v12 = vmul.f32 %v2135_v55, %v8016_v59  ;;  %v2162_v27 = vperm.slane %v6033_v19, 6  ;;  %v902_v1 = vpop.f32.mrf.mxu0 }
 0x13e   :  { %v2120_v58 = vadd.f32 %v2112_v60, %v2093_v32  ;;  %v2122_v25 = vadd.f32 %v2114_v9, %v2095_v13  ;;  %v8021_v51 = vunpack.c.h.bf16 %v6016_v17  ;;  %v8025_v6 = vunpack.c.h.bf16 %v6024_v30 }
 0x13f   :  { %v2001_v50 = vperm.slane %v6154_v3, 0  ;;  %v2028_v60 = vperm.slane %v6154_v3, 1  ;;  %v2055_v59 = vperm.slane %v6154_v3, 2  ;;  %v2166_v53 = vmul.f32 %v2162_v27, %v8024_v52 }
 0x140   :  { %v2147_v5 = vadd.f32 %v2139_v57, %v2120_v58  ;;  %v2149_v23 = vadd.f32 %v2141_v12, %v2122_v25  ;;  %v2189_v37 = vperm.slane %v6033_v19, 7  ;;  %v8265_v9 = vunpack.c.h.bf16 %v6042_v4  ;;  %v959_v52 = vpop.f32.mrf.mxu3 }
 0x141   :  { %v2005_v55 = vmul.f32 %v2001_v50, %v8020_v29  ;;  %v2007_v13 = vmul.f32 %v2001_v50, %v8021_v51  ;;  %v2032_v29 = vmul.f32 %v2028_v60, %v8025_v6  ;;  %v8264_v50 = vunpack.c.h.bf16 %v6029_v44  ;;  %v940_v12 = vpop.f32.mrf.mxu2 }
 0x142   :  { %v2059_v17 = vmul.f32 %v2055_v59, %v8265_v9  ;;  %v8266_v57 = vunpack.c.h.bf16 %v6051_v18  ;;  %v2174_v6 = vadd.f32 %v2166_v53, %v2147_v5  ;;  %v8268_v19 = vunpack.c.h.bf16 %v6061_v11 }
 0x143   :  { %v2013_v32 = vadd.f32 %v2005_v55, %v1986_v43  ;;  %v2015_v45 = vadd.f32 %v2007_v13, %v1988_v0  ;;  %v2034_v51 = vmul.f32 %v2028_v60, %v8264_v50  ;;  %v2082_v55 = vperm.slane %v6154_v3, 3 }
 0x144   :  { %v2061_v58 = vmul.f32 %v2055_v59, %v8266_v57  ;;  %v8267_v60 = vunpack.c.l.bf16 %v6130_v49  ;;  %v2109_v59 = vperm.slane %v6154_v3, 4  ;;  %v8028_v13 = vunpack.c.h.bf16 %v6108_v21 }
 0x145   :  { %v2040_v43 = vadd.f32 %v2032_v29, %v2013_v32  ;;  %v2042_v0 = vadd.f32 %v2034_v51, %v2015_v45  ;;  %v2086_v18 = vmul.f32 %v2082_v55, %v8268_v19  ;;  %v8269_v29 = vunpack.c.h.bf16 %v6070_v47 }
 0x146   :  { %v2168_v50 = vmul.f32 %v2162_v27, %v8267_v60  ;;  %v8029_v32 = vunpack.c.h.bf16 %v6099_v42  ;;  %v2136_v27 = vperm.slane %v6154_v3, 5  ;;  %v8270_v53 = vunpack.c.l.bf16 %v6147_v40 }
 0x147   :  { %v2067_v57 = vadd.f32 %v2059_v17, %v2040_v43  ;;  %v2069_v25 = vadd.f32 %v2061_v58, %v2042_v0  ;;  %v2088_v45 = vmul.f32 %v2082_v55, %v8269_v29  ;;  %v8271_v17 = vunpack.c.h.bf16 %v6082_v39 }
 0x148   :  { %v2176_v51 = vadd.f32 %v2168_v50, %v2149_v23  ;;  %v2193_v5 = vmul.f32 %v2189_v37, %v8270_v53  ;;  %v8272_v19 = vunpack.c.l.bf16 %v6152_v7  ;;  %v2163_v55 = vperm.slane %v6154_v3, 6  ;;  %v923_v23 = vpop.f32.mrf.mxu1 }
 0x149   :  { %v2094_v60 = vadd.f32 %v2086_v18, %v2067_v57  ;;  %v2096_v9 = vadd.f32 %v2088_v45, %v2069_v25  ;;  %v2113_v58 = vmul.f32 %v2109_v59, %v8271_v17  ;;  %v1776_v50 = vadd.f32 %v5928_v24, %v5991_v62 }
 0x14a   :  { %v2195_v43 = vmul.f32 %v2189_v37, %v8272_v19  ;;  %v6211_v29 = vadd.f32 %v2193_v5, %v2174_v6  ;;  %v8274_v18 = vunpack.c.h.bf16 %v6092_v38  ;;  %v2140_v37 = vmul.f32 %v2136_v27, %v8029_v32  ;;  %v904_v19 = vpop.f32.mrf.mxu0 }
 0x14b   :  { %v2121_v57 = vadd.f32 %v2113_v58, %v2094_v60  ;;  %v2142_v53 = vmul.f32 %v2136_v27, %v8028_v13  ;;  %v6221_v17 = vadd.f32 %v921_v26, %v902_v1  ;;  %v8277_v5 = vunpack.c.h.bf16 %v6130_v49  ;;  %v942_v1 = vpop.f32.mrf.mxu2  ;;  %v961_v58 = vpop.f32.mrf.mxu3 }
 0x14c   :  { %8273 = vst [vmem:[#allocation16_spill] sm:$0xff] %v6211_v29  ;;  %v2115_v25 = vmul.f32 %v2109_v59, %v8274_v18  ;;  %v6215_v45 = vadd.f32 %v2195_v43, %v2176_v51  ;;  %v8276_v59 = vunpack.c.h.bf16 %v6122_v33  ;;  %v6235_v18 = vadd.f32 %v959_v52, %v940_v12 }
 0x14d   :  { %v6230_v60 = vmul.f32 %v2163_v55, %v8277_v5  ;;  %v1786_v27 = vperm.slane %v6221_v17, 0  ;;  %v1813_v26 = vperm.slane %v6221_v17, 1  ;;  %v1840_v43 = vperm.slane %v6221_v17, 2 }
 0x14e   :  { %8275 = vst [vmem:[#allocation4_spill] sm:$0xff] %v6215_v45  ;;  %v2123_v0 = vadd.f32 %v2115_v25, %v2096_v9  ;;  %v2167_v51 = vmul.f32 %v2163_v55, %v8276_v59  ;;  %v2148_v9 = vadd.f32 %v2140_v37, %v2121_v57  ;;  %v6237_v25 = vadd.f32 %v923_v23, %v904_v19 }
 0x14f   :  { %v8278_v13 = vunpack.c.l.bf16 %v5801_v8  ;;  %v8279_v32 = vunpack.c.l.bf16 %v5806_v63  ;;  %v8280_v5 = vunpack.c.l.bf16 %v5815_v48  ;;  %v8281_v6 = vunpack.c.l.bf16 %v5820_v46 }
 0x150   :  { %v6247_v45 = vadd.f32 %v2142_v53, %v2123_v0  ;;  %v8282_v57 = vunpack.c.h.bf16 %v6147_v40  ;;  %v8283_v52 = vperm.slane %v6154_v3, 7  ;;  %v1867_v23 = vperm.slane %v6221_v17, 3 }
 0x151   :  { %v1792_v59 = vmul.f32 %v1786_v27, %v8278_v13  ;;  %v1794_v55 = vmul.f32 %v1786_v27, %v8279_v32  ;;  %v1819_v62 = vmul.f32 %v1813_v26, %v8280_v5  ;;  %v1821_v24 = vmul.f32 %v1813_v26, %v8281_v6 }
 0x152   :  { %v6253_v12 = vmul.f32 %v8283_v52, %v8282_v57  ;;  %v6256_v13 = vadd.f32 %v961_v58, %v942_v1  ;;  %v8284_v19 = vunpack.c.l.bf16 %v5829_v54  ;;  %v8285_v0 = vunpack.c.l.bf16 %v5834_v22 }
 0x153   :  { %v1800_v32 = vadd.f32 %v1792_v59, %v5863_v20  ;;  %v1802_v37 = vadd.f32 %v1794_v55, %v5882_v31  ;;  %v6264_v6 = vadd.f32 %v2167_v51, %v2148_v9  ;;  %v1894_v26 = vperm.slane %v6221_v17, 4 }
 0x154   :  { %v1846_v27 = vmul.f32 %v1840_v43, %v8284_v19  ;;  %v1848_v53 = vmul.f32 %v1840_v43, %v8285_v0  ;;  %v1921_v5 = vperm.slane %v6221_v17, 5  ;;  %v1948_v57 = vperm.slane %v6221_v17, 6 }
 0x155   :  { %v1827_v1 = vadd.f32 %v1819_v62, %v1800_v32  ;;  %v1829_v58 = vadd.f32 %v1821_v24, %v1802_v37  ;;  %v1787_v20 = vperm.slane %v6235_v18, 0  ;;  %v1814_v31 = vperm.slane %v6235_v18, 1 }
 0x156   :  { %v8286_v59 = vunpack.c.l.bf16 %v5846_v10  ;;  %v8287_v52 = vunpack.c.l.bf16 %v5853_v15  ;;  %v8288_v51 = vunpack.c.l.bf16 %v5875_v14  ;;  %v1975_v19 = vperm.slane %v6221_v17, 7 }
 0x157   :  { %v1854_v0 = vadd.f32 %v1846_v27, %v1827_v1  ;;  %v1856_v29 = vadd.f32 %v1848_v53, %v1829_v58  ;;  %v8289_v62 = vunpack.c.l.bf16 %v5880_v36  ;;  %v8290_v32 = vunpack.c.l.bf16 %v5893_v34 }
 0x158   :  { %v1873_v55 = vmul.f32 %v1867_v23, %v8286_v59  ;;  %v1875_v43 = vmul.f32 %v1867_v23, %v8287_v52  ;;  %v1900_v9 = vmul.f32 %v1894_v26, %v8288_v51  ;;  %v8291_v40 = vunpack.c.l.bf16 %v5898_v41 }
 0x159   :  { %v1902_v24 = vmul.f32 %v1894_v26, %v8289_v62  ;;  %v1927_v37 = vmul.f32 %v1921_v5, %v8290_v32  ;;  %v8292_v59 = vunpack.c.l.bf16 %v5911_v61  ;;  %v8293_v23 = vunpack.c.h.bf16 %v5801_v8 }
 0x15a   :  { %v1929_v49 = vmul.f32 %v1921_v5, %v8291_v40  ;;  %v8294_v51 = vunpack.c.h.bf16 %v5806_v63  ;;  %v1881_v27 = vadd.f32 %v1873_v55, %v1854_v0  ;;  %v1883_v53 = vadd.f32 %v1875_v43, %v1856_v29 }
 0x15b   :  { %v1954_v33 = vmul.f32 %v1948_v57, %v8292_v59  ;;  %v1793_v52 = vmul.f32 %v1787_v20, %v8293_v23  ;;  %v8295_v1 = vunpack.c.h.bf16 %v5815_v48  ;;  %v8296_v58 = vunpack.c.h.bf16 %v5820_v46 }
 0x15c   :  { %v1795_v17 = vmul.f32 %v1787_v20, %v8294_v51  ;;  %v1841_v5 = vperm.slane %v6235_v18, 2  ;;  %v1868_v59 = vperm.slane %v6235_v18, 3  ;;  %v1908_v8 = vadd.f32 %v1900_v9, %v1881_v27 }
 0x15d   :  { %v1820_v26 = vmul.f32 %v1814_v31, %v8295_v1  ;;  %v1822_v62 = vmul.f32 %v1814_v31, %v8296_v58  ;;  %v1801_v32 = vadd.f32 %v1793_v52, %v6134_v2  ;;  %v1910_v23 = vadd.f32 %v1902_v24, %v1883_v53 }
 0x15e   :  { %v1803_v40 = vadd.f32 %v1795_v17, %v1776_v50  ;;  %v8297_v63 = vunpack.c.l.bf16 %v5916_v35  ;;  %v1895_v29 = vperm.slane %v6235_v18, 4  ;;  %v8298_v43 = vunpack.c.h.bf16 %v5829_v54 }
 0x15f   :  { %v1828_v55 = vadd.f32 %v1820_v26, %v1801_v32  ;;  %v8299_v31 = vunpack.c.h.bf16 %v5834_v22  ;;  %v1935_v50 = vadd.f32 %v1927_v37, %v1908_v8  ;;  %v1937_v0 = vadd.f32 %v1929_v49, %v1910_v23 }
 0x160   :  { %v1956_v20 = vmul.f32 %v1948_v57, %v8297_v63  ;;  %v1830_v48 = vadd.f32 %v1822_v62, %v1803_v40  ;;  %v1847_v46 = vmul.f32 %v1841_v5, %v8298_v43  ;;  %v8300_v52 = vunpack.c.l.bf16 %v5935_v28 }
 0x161   :  { %v1849_v2 = vmul.f32 %v1841_v5, %v8299_v31  ;;  %v1922_v9 = vperm.slane %v6235_v18, 5  ;;  %v8301_v57 = vunpack.c.h.bf16 %v5846_v10  ;;  %v8302_v53 = vunpack.c.h.bf16 %v5853_v15  ;;  %v8310_v31 = vld [vmem:[#allocation13_spill] sm:$0xff] }
 0x162   :  { %v1981_v51 = vmul.f32 %v1975_v19, %v8300_v52  ;;  %v1855_v24 = vadd.f32 %v1847_v46, %v1828_v55  ;;  %v1962_v54 = vadd.f32 %v1954_v33, %v1935_v50  ;;  %v1964_v26 = vadd.f32 %v1956_v20, %v1937_v0 }
 0x163   :  { %v1857_v17 = vadd.f32 %v1849_v2, %v1830_v48  ;;  %v1874_v27 = vmul.f32 %v1868_v59, %v8301_v57  ;;  %v1876_v1 = vmul.f32 %v1868_v59, %v8302_v53  ;;  %v8303_v22 = vunpack.c.l.bf16 %v5944_v56 }
 0x164   :  { %v8304_v49 = vunpack.c.h.bf16 %v5875_v14  ;;  %v8305_v40 = vunpack.c.h.bf16 %v5880_v36  ;;  %v1949_v8 = vperm.slane %v6235_v18, 6  ;;  %v1989_v10 = vadd.f32 %v1981_v51, %v1962_v54 }
 0x165   :  { %v1983_v58 = vmul.f32 %v1975_v19, %v8303_v22  ;;  %v1882_v62 = vadd.f32 %v1874_v27, %v1855_v24  ;;  %v1884_v32 = vadd.f32 %v1876_v1, %v1857_v17  ;;  %v2002_v15 = vperm.slane %v6237_v25, 0 }
 0x166   :  { %v1901_v37 = vmul.f32 %v1895_v29, %v8304_v49  ;;  %v1903_v5 = vmul.f32 %v1895_v29, %v8305_v40  ;;  %v2029_v33 = vperm.slane %v6237_v25, 1  ;;  %v8306_v19 = vunpack.c.h.bf16 %v5893_v34  ;;  %v8316_v49 = vld [vmem:[#allocation14_spill] sm:$0xff] }
 0x167   :  { %v1991_v23 = vadd.f32 %v1983_v58, %v1964_v26  ;;  %v8307_v14 = vunpack.c.h.bf16 %v5898_v41  ;;  %v8308_v48 = vunpack.c.h.bf16 %v5911_v61  ;;  %v1976_v29 = vperm.slane %v6235_v18, 7 }
 0x168   :  { %v1909_v59 = vadd.f32 %v1901_v37, %v1882_v62  ;;  %v1911_v63 = vadd.f32 %v1903_v5, %v1884_v32  ;;  %v1928_v20 = vmul.f32 %v1922_v9, %v8306_v19  ;;  %v8309_v43 = vunpack.c.l.bf16 %v6011_v16 }
 0x169   :  { %v1930_v55 = vmul.f32 %v1922_v9, %v8307_v14  ;;  %v1955_v36 = vmul.f32 %v1949_v8, %v8308_v48  ;;  %v8311_v2 = vunpack.c.l.bf16 %v8310_v31  ;;  %v8312_v51 = vunpack.c.h.bf16 %v5916_v35 }
 0x16a   :  { %v2008_v46 = vmul.f32 %v2002_v15, %v8309_v43  ;;  %v1936_v0 = vadd.f32 %v1928_v20, %v1909_v59  ;;  %v8313_v24 = vunpack.c.l.bf16 %v6024_v30  ;;  %v8314_v61 = vunpack.c.l.bf16 %v6029_v44 }
 0x16b   :  { %v2010_v50 = vmul.f32 %v2002_v15, %v8311_v2  ;;  %v1938_v52 = vadd.f32 %v1930_v55, %v1911_v63  ;;  %v1957_v34 = vmul.f32 %v1949_v8, %v8312_v51  ;;  %v2056_v18 = vperm.slane %v6237_v25, 2 }
 0x16c   :  { %v2035_v41 = vmul.f32 %v2029_v33, %v8313_v24  ;;  %v2016_v9 = vadd.f32 %v2008_v46, %v1989_v10  ;;  %v2037_v57 = vmul.f32 %v2029_v33, %v8314_v61  ;;  %v2177_v27 = vadd.f32 %v6230_v60, %v6247_v45 }
 0x16d   :  { %v2018_v17 = vadd.f32 %v2010_v50, %v1991_v23  ;;  %v1963_v53 = vadd.f32 %v1955_v36, %v1936_v0  ;;  %v1965_v1 = vadd.f32 %v1957_v34, %v1938_v52  ;;  %v2083_v54 = vperm.slane %v6237_v25, 3 }
 0x16e   :  { %v2043_v26 = vadd.f32 %v2035_v41, %v2016_v9  ;;  %v8315_v22 = vunpack.c.l.bf16 %v6042_v4  ;;  %v8317_v37 = vunpack.c.l.bf16 %v8316_v49  ;;  %v8318_v32 = vunpack.c.h.bf16 %v6152_v7 }
 0x16f   :  { %v2045_v35 = vadd.f32 %v2037_v57, %v2018_v17  ;;  %v8319_v40 = vperm.slane %v6154_v3, 7  ;;  %v6351_v45 = vadd.f32 %v6253_v12, %v6264_v6  ;;  %v8320_v60 = vunpack.c.h.bf16 %v5935_v28  ;;  %v8330_v57 = vld [vmem:[#allocation2_spill] sm:$0xff] }
 0x170   :  { %v2062_v58 = vmul.f32 %v2056_v18, %v8315_v22  ;;  %v2064_v62 = vmul.f32 %v2056_v18, %v8317_v37  ;;  %v2110_v10 = vperm.slane %v6237_v25, 4  ;;  %v8321_v23 = vunpack.c.h.bf16 %v5944_v56 }
 0x171   :  { %v2196_v5 = vmul.f32 %v8319_v40, %v8318_v32  ;;  %v1982_v8 = vmul.f32 %v1976_v29, %v8320_v60  ;;  %v2137_v63 = vperm.slane %v6237_v25, 5  ;;  %v8322_v3 = vunpack.c.l.bf16 %v6061_v11  ;;  %v8334_v32 = vld [vmem:[#allocation3_spill] sm:$0xff] }
 0x172   :  { %v1984_v15 = vmul.f32 %v1976_v29, %v8321_v23  ;;  %v2070_v33 = vadd.f32 %v2062_v58, %v2043_v26  ;;  %v2072_v59 = vadd.f32 %v2064_v62, %v2045_v35  ;;  %v8323_v12 = vunpack.c.l.bf16 %v6070_v47  ;;  %v992_v58 = vpop.f32.mrf.mxu1  ;;  %v8336_v60 = vld [vmem:[#allocation15_spill] sm:$0xff] }
 0x173   :  { %v6359_v19 = vadd.f32 %v2196_v5, %v2177_v27  ;;  %v2089_v20 = vmul.f32 %v2083_v54, %v8322_v3  ;;  %v2164_v28 = vperm.slane %v6237_v25, 6  ;;  %v1990_v14 = vadd.f32 %v1982_v8, %v1963_v53 }
 0x174   :  { %v2091_v6 = vmul.f32 %v2083_v54, %v8323_v12  ;;  %v1992_v55 = vadd.f32 %v1984_v15, %v1965_v1  ;;  %v2003_v48 = vperm.slane %v6256_v13, 0  ;;  %v2030_v56 = vperm.slane %v6256_v13, 1 }
 0x175   :  { %v2097_v36 = vadd.f32 %v2089_v20, %v2070_v33  ;;  %v8324_v43 = vunpack.c.l.bf16 %v6082_v39  ;;  %v2191_v2 = vperm.slane %v6237_v25, 7  ;;  %v8325_v50 = vunpack.c.l.bf16 %v6092_v38 }
 0x176   :  { %v2099_v29 = vadd.f32 %v2091_v6, %v2072_v59  ;;  %v8326_v52 = vunpack.c.l.bf16 %v6099_v42  ;;  %v8327_v34 = vunpack.c.h.bf16 %v6011_v16  ;;  %v8328_v41 = vunpack.c.h.bf16 %v8310_v31  ;;  %v973_v31 = vpop.f32.mrf.mxu0 }
 0x177   :  { %v2116_v46 = vmul.f32 %v2110_v10, %v8324_v43  ;;  %v2118_v0 = vmul.f32 %v2110_v10, %v8325_v50  ;;  %v8329_v17 = vunpack.c.l.bf16 %v6108_v21  ;;  %v8331_v18 = vunpack.c.l.bf16 %v8330_v57  ;;  %v1030_v43 = vpop.f32.mrf.mxu3 }
 0x178   :  { %v2143_v51 = vmul.f32 %v2137_v63, %v8326_v52  ;;  %v2009_v24 = vmul.f32 %v2003_v48, %v8327_v34  ;;  %v2011_v9 = vmul.f32 %v2003_v48, %v8328_v41  ;;  %v2057_v25 = vperm.slane %v6256_v13, 2 }
 0x179   :  { %v2145_v61 = vmul.f32 %v2137_v63, %v8329_v17  ;;  %v2170_v27 = vmul.f32 %v2164_v28, %v8331_v18  ;;  %v2084_v53 = vperm.slane %v6256_v13, 3  ;;  %v8332_v26 = vunpack.c.h.bf16 %v6024_v30  ;;  %v6402_v63 = vld [vmem:[%s7925_s2 + $0x200] sm:$0xff] }
 0x17a   :  { %v2017_v1 = vadd.f32 %v2009_v24, %v1990_v14  ;;  %v2019_v54 = vadd.f32 %v2011_v9, %v1992_v55  ;;  %v8333_v16 = vunpack.c.h.bf16 %v6029_v44  ;;  %v2124_v37 = vadd.f32 %v2116_v46, %v2097_v36  ;;  %8341 = vst [vmem:[#allocation6_spill] sm:$0xff] %v6402_v63  ;;  %v6419_v36 = vld [vmem:[%s7925_s2 + $0x208] sm:$0xff] }
 0x17b   :  { %v2036_v35 = vmul.f32 %v2030_v56, %v8332_v26  ;;  %v2126_v62 = vadd.f32 %v2118_v0, %v2099_v29  ;;  %v8335_v40 = vunpack.c.l.bf16 %v8334_v32  ;;  %v8337_v8 = vunpack.c.l.bf16 %v8336_v60  ;;  %8346 = vst [vmem:[#allocation8_spill] sm:$0xff] %v6419_v36  ;;  %v1011_v29 = vpop.f32.mrf.mxu2 }
 0x17c   :  { %v2038_v22 = vmul.f32 %v2030_v56, %v8333_v16  ;;  %v8339_v33 = vunpack.c.h.bf16 %v6042_v4  ;;  %v8340_v59 = vunpack.c.h.bf16 %v8316_v49  ;;  %v8342_v3 = vunpack.c.l.bf16 %v6152_v7 }
 0x17d   :  { %v2172_v5 = vmul.f32 %v2164_v28, %v8335_v40  ;;  %v6393_v10 = vmul.f32 %v2191_v2, %v8337_v8  ;;  %v2044_v23 = vadd.f32 %v2036_v35, %v2017_v1  ;;  %v8344_v12 = vunpack.c.h.bf16 %v6061_v11  ;;  %v6465_v8 = vpop.f32.mrf.mxu1 }
 0x17e   :  { %v2046_v15 = vadd.f32 %v2038_v22, %v2019_v54  ;;  %v2063_v30 = vmul.f32 %v2057_v25, %v8339_v33  ;;  %v2065_v44 = vmul.f32 %v2057_v25, %v8340_v59  ;;  %v6406_v20 = vmul.f32 %v2191_v2, %v8342_v3  ;;  %v6463_v40 = vpop.f32.mrf.mxu0  ;;  %v6478_v3 = vld [vmem:[%s7925_s2 + $0x230] sm:$0xff] }
 0x17f   :  { %8338 = vst [vmem:[#allocation5_spill] sm:$0xff] %v6393_v10  ;;  %v2090_v6 = vmul.f32 %v2084_v53, %v8344_v12  ;;  %v2111_v28 = vperm.slane %v6256_v13, 4  ;;  %v2138_v4 = vperm.slane %v6256_v13, 5  ;;  %v8345_v49 = vunpack.c.h.bf16 %v6070_v47  ;;  %v6426_v47 = vld [vmem:[%s7925_s2 + $0x210] sm:$0xff]  ;;  %v6838_v10 = vld [vmem:[%s7927_s4 + $0xa8] sm:$0xf0] }
 0x180   :  { %8343 = vst [vmem:[#allocation7_spill] sm:$0xff] %v6406_v20  ;;  %v2071_v14 = vadd.f32 %v2063_v30, %v2044_v23  ;;  %v2073_v55 = vadd.f32 %v2065_v44, %v2046_v15  ;;  %v6414_v56 = vadd.f32 %v992_v58, %v973_v31  ;;  %v2151_v11 = vadd.f32 %v2143_v51, %v2124_v37  ;;  %v6435_v51 = vld [vmem:[%s7925_s2 + $0x218] sm:$0xff]  ;;  %v6459_v31 = vld [vmem:[%s7925_s2 + $0x228] sm:$0xff] }
 0x181   :  { %v2092_v48 = vmul.f32 %v2084_v53, %v8345_v49  ;;  %v2153_v46 = vadd.f32 %v2145_v61, %v2126_v62  ;;  %v2165_v2 = vperm.slane %v6256_v13, 6  ;;  %v8049_v50 = vunpack.c.l.bf16 %v6402_v63  ;;  %8347 = vst [vmem:[#allocation9_spill] sm:$0xff] %v6426_v47 }
 0x182   :  { %v2098_v0 = vadd.f32 %v2090_v6, %v2071_v14  ;;  %v8348_v34 = vunpack.c.h.bf16 %v6082_v39  ;;  %v8349_v41 = vunpack.c.h.bf16 %v6092_v38  ;;  %8350 = vst [vmem:[#allocation10_spill] sm:$0xff] %v6435_v51  ;;  %v8351_v17 = vunpack.c.h.bf16 %v6099_v42  ;;  %v6445_v39 = vld [vmem:[%s7925_s2 + $0x220] sm:$0xff] }
 0x183   :  { %v2100_v52 = vadd.f32 %v2092_v48, %v2073_v55  ;;  %v2192_v18 = vperm.slane %v6256_v13, 7  ;;  %v8048_v25 = vunpack.c.l.bf16 %v6419_v36  ;;  %v2216_v53 = vperm.slane %v6414_v56, 0  ;;  %8352 = vst [vmem:[#allocation11_spill] sm:$0xff] %v6445_v39  ;;  %v8367_v55 = vld [vmem:[#allocation4_spill] sm:$0xff] }
 0x184   :  { %v2117_v24 = vmul.f32 %v2111_v28, %v8348_v34  ;;  %v2119_v9 = vmul.f32 %v2111_v28, %v8349_v41  ;;  %v2144_v61 = vmul.f32 %v2138_v4, %v8351_v17  ;;  %v8353_v54 = vunpack.c.h.bf16 %v6108_v21  ;;  %8354 = vst [vmem:[#allocation12_spill] sm:$0xff] %v6459_v31 }
 0x185   :  { %v8044_v35 = vunpack.c.l.bf16 %v6426_v47  ;;  %v2220_v42 = vmul.f32 %v2216_v53, %v8049_v50  ;;  %v2222_v13 = vmul.f32 %v2216_v53, %v8048_v25  ;;  %v8043_v16 = vunpack.c.l.bf16 %v6435_v51  ;;  %8359 = vst [vmem:[#allocation2_spill] sm:$0xff] %v6478_v3  ;;  %v6663_v25 = vld [vmem:[%s7927_s4 + $0x44] sm:$0xf0] }
 0x186   :  { %v2125_v38 = vadd.f32 %v2117_v24, %v2098_v0  ;;  %v2127_v1 = vadd.f32 %v2119_v9, %v2100_v52  ;;  %v2146_v26 = vmul.f32 %v2138_v4, %v8353_v54  ;;  %v2243_v22 = vperm.slane %v6414_v56, 1  ;;  %v6511_v0 = vpop.f32.mrf.mxu2  ;;  %v6513_v52 = vpop.f32.mrf.mxu3 }
 0x187   :  { %v8042_v37 = vunpack.c.l.bf16 %v6445_v39  ;;  %v2270_v62 = vperm.slane %v6414_v56, 2  ;;  %v6467_v23 = vadd.f32 %v2170_v27, %v2151_v11  ;;  %v6469_v15 = vadd.f32 %v2172_v5, %v2153_v46  ;;  %v8364_v5 = vld [vmem:[#allocation16_spill] sm:$0xff] }
 0x188   :  { %v2152_v58 = vadd.f32 %v2144_v61, %v2125_v38  ;;  %v2154_v21 = vadd.f32 %v2146_v26, %v2127_v1  ;;  %v8357_v33 = vunpack.c.h.bf16 %v8330_v57  ;;  %v8358_v59 = vunpack.c.h.bf16 %v8334_v32  ;;  %v6493_v32 = vld [vmem:[%s7925_s2 + $0x238] sm:$0xff] }
 0x189   :  { %8355 = vst [vmem:[#allocation13_spill] sm:$0xff] %v6467_v23  ;;  %v8360_v12 = vunpack.c.h.bf16 %v8336_v60  ;;  %v8362_v27 = vunpack.c.h.bf16 %v6152_v7  ;;  %v2228_v4 = vadd.f32 %v2220_v42, %v8364_v5  ;;  %v8040_v57 = vunpack.c.l.bf16 %v6459_v31  ;;  %v4230_v26 = vld [vmem:[%s7927_s4 + $0x74] sm:$0xf0]  ;;  %v4229_v42 = vld [vmem:[%s7927_s4 + $0x74] sm:$0xf] }
 0x18a   :  { %8356 = vst [vmem:[#allocation14_spill] sm:$0xff] %v6469_v15  ;;  %v2171_v30 = vmul.f32 %v2165_v2, %v8357_v33  ;;  %v2173_v44 = vmul.f32 %v2165_v2, %v8358_v59  ;;  %v2230_v49 = vadd.f32 %v2222_v13, %v8367_v55  ;;  %v2247_v60 = vmul.f32 %v2243_v22, %v8044_v35  ;;  %v6553_v33 = vld [vmem:[%s7927_s4 + $0x60] sm:$0xf]  ;;  %v6573_v5 = vld [vmem:[%s7927_s4 + $0x64] sm:$0xf] }
 0x18b   :  { %v6482_v6 = vmul.f32 %v2192_v18, %v8360_v12  ;;  %v6486_v28 = vmul.f32 %v2192_v18, %v8362_v27  ;;  %8365 = vst [vmem:[#allocation16_spill] sm:$0xff] %v6493_v32  ;;  %v2249_v7 = vmul.f32 %v2243_v22, %v8043_v16  ;;  %v6506_v11 = vmul.f32 %v2270_v62, %v8042_v37  ;;  %v3889_v18 = vld [vmem:[%s7927_s4 + $0x70] sm:$0xf]  ;;  %v4245_v55 = vld [vmem:[%s7927_s4 + $0xf4] sm:$0xf] }
 0x18c   :  { %v6495_v14 = vadd.f32 %v2171_v30, %v2152_v58  ;;  %v6502_v48 = vadd.f32 %v2173_v44, %v2154_v21  ;;  %v8039_v46 = vunpack.c.l.bf16 %v6478_v3  ;;  %v6509_v2 = vadd.f32 %v1030_v43, %v1011_v29  ;;  %v6558_v30 = vld [vmem:[%s7927_s4 + $0x64] sm:$0xf0]  ;;  %v6607_v35 = vld [vmem:[%s7927_s4 + $0x50] sm:$0xf]  ;;  %v6612_v27 = vld [vmem:[%s7927_s4 + $0x54] sm:$0xf0] }
 0x18d   :  { %8361 = vst [vmem:[#allocation3_spill] sm:$0xff] %v6482_v6  ;;  %v8038_v34 = vunpack.c.l.bf16 %v6493_v32  ;;  %v2297_v24 = vperm.slane %v6414_v56, 3  ;;  %v8037_v41 = vunpack.c.h.bf16 %v6402_v63  ;;  %v8036_v9 = vunpack.c.h.bf16 %v6419_v36  ;;  %v6638_v12 = vld [vmem:[%s7927_s4 + $0x58] sm:$0xf0]  ;;  %v6833_v15 = vld [vmem:[%s7927_s4 + $0xa4] sm:$0xf] }
 0x18e   :  { %8363 = vst [vmem:[#allocation15_spill] sm:$0xff] %v6486_v28  ;;  %v6521_v17 = vmul.f32 %v2270_v62, %v8040_v57  ;;  %v2217_v61 = vperm.slane %v6509_v2, 0  ;;  %v8041_v29 = vunpack.c.h.bf16 %v6426_v47  ;;  %v2244_v43 = vperm.slane %v6509_v2, 1  ;;  %v3891_v62 = vld [vmem:[%s7927_s4 + $0x78] sm:$0xf0]  ;;  %v1016_v50 = vpop.f32.mrf.mxu2  ;;  %v1035_v28 = vpop.f32.mrf.mxu3 }
 0x18f   :  { %8366 = vst [vmem:[#allocation17_spill] sm:$0xff] %v6495_v14  ;;  %v6529_v53 = vadd.f32 %v2247_v60, %v2228_v4  ;;  %v8046_v38 = vunpack.c.h.bf16 %v6435_v51  ;;  %v8045_v1 = vunpack.c.h.bf16 %v6445_v39  ;;  %v2271_v54 = vperm.slane %v6509_v2, 2  ;;  %v6578_v4 = vld [vmem:[%s7927_s4 + $0x68] sm:$0xf0]  ;;  %v6737_v14 = vld [vmem:[%s7927_s4 + $0xc4] sm:$0xf] }
 0x190   :  { %8368 = vst [vmem:[#allocation4_spill] sm:$0xff] %v6502_v48  ;;  %v6540_v13 = vadd.f32 %v2249_v7, %v2230_v49  ;;  %v2221_v22 = vmul.f32 %v2217_v61, %v8037_v41  ;;  %v2223_v58 = vmul.f32 %v2217_v61, %v8036_v9  ;;  %v8047_v21 = vunpack.c.h.bf16 %v6459_v31  ;;  %v3955_v49 = vld [vmem:[%s7927_s4 + $0xf8] sm:$0xf0]  ;;  %v978_v9 = vpop.f32.mrf.mxu0  ;;  %v997_v41 = vpop.f32.mrf.mxu1  ;;  %v6698_v48 = vld [vmem:[%s7927_s4 + $0xd0] sm:$0xf] }
 0x191   :  { %8369 = vst [vmem:[#allocation18_spill] sm:$0xff] %v6509_v2  ;;  %v6562_v59 = vmul.f32 %v2297_v24, %v8039_v46  ;;  %v6566_v44 = vmul.f32 %v2297_v24, %v8038_v34  ;;  %v2248_v60 = vmul.f32 %v2244_v43, %v8041_v29  ;;  %v8050_v7 = vunpack.c.h.bf16 %v6478_v3  ;;  %v3953_v34 = vld [vmem:[%s7927_s4 + $0xf0] sm:$0xf]  ;;  %v4246_v46 = vld [vmem:[%s7927_s4 + $0xf4] sm:$0xf0] }
 0x192   :  { %v8051_v24 = vunpack.c.h.bf16 %v6493_v32  ;;  %v2298_v61 = vperm.slane %v6509_v2, 3  ;;  %v2229_v57 = vadd.f32 %v2221_v22, %v6351_v45  ;;  %v2250_v29 = vmul.f32 %v2244_v43, %v8046_v38  ;;  %v6617_v45 = vld [vmem:[%s7927_s4 + $0xe4] sm:$0xf]  ;;  %v6622_v43 = vld [vmem:[%s7927_s4 + $0xe8] sm:$0xf0] }
 0x193   :  { %v6602_v37 = vmul.f32 %v2271_v54, %v8045_v1  ;;  %v3890_v16 = vor.u32 %v4230_v26, %v3889_v18  ;;  %v2231_v18 = vadd.f32 %v2223_v58, %v6359_v19  ;;  %v6627_v26 = vmul.f32 %v2271_v54, %v8047_v21  ;;  %v6633_v38 = vld [vmem:[%s7927_s4 + $0x54] sm:$0xf]  ;;  %v6643_v19 = vld [vmem:[%s7927_s4 + $0xe0] sm:$0xf]  ;;  %v6648_v54 = vld [vmem:[%s7927_s4 + $0xe4] sm:$0xf0] }
 0x194   :  { %v3894_v1 = vor.u32 %v4229_v42, %v3891_v62  ;;  %v3882_v58 = vor.u32 %v6558_v30, %v6553_v33  ;;  %v3958_v62 = vor.u32 %v4245_v55, %v3955_v49  ;;  %v6653_v21 = vadd.f32 %v997_v41, %v978_v9  ;;  %v6658_v22 = vld [vmem:[%s7927_s4 + $0x40] sm:$0xf]  ;;  %v6673_v41 = vld [vmem:[%s7927_s4 + $0x48] sm:$0xf0]  ;;  %v6678_v9 = vld [vmem:[%s7927_s4 + $0xd4] sm:$0xf] }
 0x195   :  { %2843 = vmatpush.bf16.msra.mxu0 %v3890_v16  ;;  %v6668_v16 = vld [vmem:[%s7927_s4 + $0x44] sm:$0xf]  ;;  %v6683_v33 = vld [vmem:[%s7927_s4 + $0xd8] sm:$0xf0]  ;;  %v6687_v30 = vmul.f32 %v2298_v61, %v8050_v7  ;;  %v6691_v55 = vmul.f32 %v2298_v61, %v8051_v24  ;;  %v3886_v49 = vor.u32 %v6573_v5, %v6578_v4  ;;  %v3954_v42 = vor.u32 %v4246_v46, %v3953_v34  ;;  %v6703_v7 = vld [vmem:[%s7927_s4 + $0xd4] sm:$0xf0] }
 0x196   :  { %8370 = vst [vmem:[#allocation19_spill] sm:$0xff] %v6653_v21  ;;  %2881 = vmatpush.bf16.msra.mxu2 %v3894_v1  ;;  %v6708_v1 = vld [vmem:[%s7927_s4 + $0x30] sm:$0xf]  ;;  %v6713_v46 = vld [vmem:[%s7927_s4 + $0x34] sm:$0xf0]  ;;  %v6725_v4 = vadd.f32 %v2248_v60, %v2229_v57  ;;  %v6729_v61 = vadd.f32 %v6465_v8, %v6463_v40  ;;  %2900 = vmatpush.bf16.msra.mxu3 %v3958_v62  ;;  %v2218_v24 = vperm.slane %v6653_v21, 0 }
 0x197   :  { %v6718_v34 = vld [vmem:[%s7927_s4 + $0x34] sm:$0xf]  ;;  %v6723_v5 = vld [vmem:[%s7927_s4 + $0x38] sm:$0xf0]  ;;  %v3950_v6 = vor.u32 %v6617_v45, %v6622_v43  ;;  %v6742_v57 = vld [vmem:[%s7927_s4 + $0xc8] sm:$0xf0]  ;;  %v6774_v32 = vadd.f32 %v2250_v29, %v2231_v18  ;;  %v6778_v3 = vadd.f32 %v6513_v52, %v6511_v0  ;;  %2862 = vmatpush.bf16.msra.mxu1 %v3954_v42  ;;  %v3874_v31 = vor.u32 %v6612_v27, %v6607_v35 }
 0x198   :  { %v6747_v40 = vld [vmem:[%s7927_s4 + $0xc0] sm:$0xf]  ;;  %v6752_v8 = vld [vmem:[%s7927_s4 + $0xc4] sm:$0xf0]  ;;  %v6767_v43 = vld [vmem:[%s7927_s4 + $0x24] sm:$0xf]  ;;  %v3946_v39 = vor.u32 %v6648_v54, %v6643_v19  ;;  %v3878_v47 = vor.u32 %v6633_v38, %v6638_v12  ;;  %v6828_v20 = vadd.f32 %v1035_v28, %v1016_v50  ;;  %v8373_v38 = vunpack.c.l.bf16 %v6402_v63 }
 0x199   :  { %v6757_v60 = vld [vmem:[%s7927_s4 + $0x20] sm:$0xf]  ;;  %v6762_v45 = vld [vmem:[%s7927_s4 + $0x24] sm:$0xf0]  ;;  %v6772_v62 = vld [vmem:[%s7927_s4 + $0x28] sm:$0xf0]  ;;  %2844 = vmatpush.bf16.msra.mxu0 %v3882_v58  ;;  %v3866_v28 = vor.u32 %v6663_v25, %v6658_v22  ;;  %v3870_v12 = vor.u32 %v6668_v16, %v6673_v41  ;;  %v3942_v42 = vor.u32 %v6678_v9, %v6683_v33  ;;  %v8375_v22 = vunpack.c.l.bf16 %v6419_v36 }
 0x19a   :  { %8371 = vst [vmem:[#allocation20_spill] sm:$0xff] %v6778_v3  ;;  %v6787_v51 = vld [vmem:[%s7927_s4 + $0xb4] sm:$0xf]  ;;  %v6792_v29 = vld [vmem:[%s7927_s4 + $0xb8] sm:$0xf0]  ;;  %2882 = vmatpush.bf16.msra.mxu2 %v3886_v49  ;;  %v6847_v50 = vmul.f32 %v2218_v24, %v8373_v38  ;;  %2901 = vmatpush.bf16.msra.mxu3 %v3950_v6  ;;  %v3938_v41 = vor.u32 %v6703_v7, %v6698_v48  ;;  %v6898_v48 = vld [vmem:[%s7925_s2 + $0x240] sm:$0xff] }
 0x19b   :  { %v6797_v0 = vld [vmem:[%s7927_s4 + $0xb0] sm:$0xf]  ;;  %v6802_v35 = vld [vmem:[%s7927_s4 + $0xb4] sm:$0xf0]  ;;  %v6817_v18 = vld [vmem:[%s7927_s4 + $0x14] sm:$0xf]  ;;  %v6872_v16 = vmul.f32 %v2218_v24, %v8375_v22  ;;  %2863 = vmatpush.bf16.msra.mxu1 %v3946_v39  ;;  %v3934_v7 = vor.u32 %v6737_v14, %v6742_v57  ;;  %v3930_v22 = vor.u32 %v6752_v8, %v6747_v40  ;;  %v3926_v57 = vor.u32 %v6787_v51, %v6792_v29 }
 0x19c   :  { %v6807_v52 = vld [vmem:[%s7927_s4 + $0x10] sm:$0xf]  ;;  %v6812_v27 = vld [vmem:[%s7927_s4 + $0x14] sm:$0xf0]  ;;  %v6822_v19 = vld [vmem:[%s7927_s4 + $0x18] sm:$0xf0]  ;;  %v2282_v40 = vadd.f32 %v6506_v11, %v6529_v53  ;;  %v2284_v29 = vadd.f32 %v6521_v17, %v6540_v13  ;;  %v8388_v2 = vor.u32 %v6718_v34, %v6723_v5  ;;  %v8390_v5 = vor.u32 %v6802_v35, %v6797_v0 }
 0x19d   :  { %8372 = vst [vmem:[#allocation21_spill] sm:$0xff] %v6828_v20  ;;  %v6843_v58 = vld [vmem:[%s7927_s4 + $0xa0] sm:$0xf]  ;;  %v6858_v54 = vld [vmem:[%s7927_s4 + $0xa4] sm:$0xf0]  ;;  %2845 = vmatpush.bf16.msra.mxu0 %v3874_v31  ;;  %v6939_v31 = vld [vmem:[%s7925_s2 + $0x250] sm:$0xff]  ;;  %v8069_v20 = vunpack.c.l.bf16 %v6898_v48  ;;  %v8394_v0 = vor.u32 %v6762_v45, %v6757_v60 }
 0x19e   :  { %8374 = vst [vmem:[#allocation22_spill] sm:$0xff] %v6847_v50  ;;  %v6863_v49 = vld [vmem:[%s7927_s4] sm:$0xf]  ;;  %v6868_v25 = vld [vmem:[%s7927_s4 + $0x4] sm:$0xf0]  ;;  %v6944_v51 = vld [vmem:[%s7925_s2 + $0x258] sm:$0xff]  ;;  %2883 = vmatpush.bf16.msra.mxu2 %v3878_v47  ;;  %2902 = vmatpush.bf16.msra.mxu3 %v3942_v42  ;;  %v8071_v50 = vunpack.c.l.bf16 %v6939_v31  ;;  %v2309_v17 = vadd.f32 %v6562_v59, %v2282_v40  ;;  %v2311_v53 = vadd.f32 %v6566_v44, %v2284_v29 }
 0x19f   :  { %8376 = vst [vmem:[#allocation23_spill] sm:$0xff] %v6872_v16  ;;  %v6883_v38 = vld [vmem:[%s7927_s4 + $0x4] sm:$0xf]  ;;  %v6888_v24 = vld [vmem:[%s7927_s4 + $0x8] sm:$0xf0]  ;;  %2864 = vmatpush.bf16.msra.mxu1 %v3938_v41  ;;  %v6979_v9 = vld [vmem:[%s7925_s2 + $0x270] sm:$0xff]  ;;  %v8382_v13 = vunpack.c.l.bf16 %v6944_v51 }
 0x1a0   :  { %v6893_v6 = vld [vmem:[%s7927_s4 + $0x94] sm:$0xf]  ;;  %v6911_v36 = vld [vmem:[%s7927_s4 + $0x98] sm:$0xf0]  ;;  %v6916_v39 = vld [vmem:[%s7927_s4 + $0x90] sm:$0xf] }
 0x1a1   :  { %v6921_v14 = vld [vmem:[%s7927_s4 + $0x94] sm:$0xf0]  ;;  %v6934_v33 = vld [vmem:[%s7925_s2 + $0x248] sm:$0xff]  ;;  %8377 = vst [vmem:[#allocation24_spill] sm:$0xff] %v6939_v31  ;;  %v6957_v63 = vld [vmem:[%s7925_s2 + $0x260] sm:$0xff]  ;;  %2846 = vmatpush.bf16.msra.mxu0 %v3866_v28  ;;  %v8379_v59 = vperm.slane %v6414_v56, 4 }
 0x1a2   :  { %8378 = vst [vmem:[#allocation25_spill] sm:$0xff] %v6944_v51  ;;  %v6962_v47 = vld [vmem:[%s7925_s2 + $0x268] sm:$0xff]  ;;  %v8072_v16 = vunpack.c.l.bf16 %v6934_v33  ;;  %v6984_v11 = vld [vmem:[%s7925_s2 + $0x278] sm:$0xff]  ;;  %v6993_v8 = vld [vmem:[%s7925_s2 + $0x280] sm:$0xff]  ;;  %2884 = vmatpush.bf16.msra.mxu2 %v3870_v12  ;;  %v8381_v29 = vperm.slane %v6414_v56, 5  ;;  %2903 = vmatpush.bf16.msra.mxu3 %v3934_v7  ;;  %v2378_v23 = vperm.slane %v6414_v56, 6 }
 0x1a3   :  { %v6998_v42 = vld [vmem:[%s7925_s2 + $0x288] sm:$0xff]  ;;  %v2328_v44 = vmul.f32 %v8379_v59, %v8069_v20  ;;  %v8380_v28 = vmov %v8379_v59  ;;  %v8080_v59 = vunpack.c.l.bf16 %v6979_v9  ;;  %v8079_v20 = vunpack.c.l.bf16 %v6984_v11  ;;  %2865 = vmatpush.bf16.msra.mxu1 %v3930_v22  ;;  %v7030_v7 = vld [vmem:[%s7925_s2 + $0x298] sm:$0xff]  ;;  %v7106_v45 = vld [vmem:[%s7925_s2 + $0x2d0] sm:$0xff] }
 0x1a4   :  { %v2330_v40 = vmul.f32 %v8380_v28, %v8072_v16  ;;  %v2355_v41 = vmul.f32 %v8381_v29, %v8071_v50  ;;  %v8383_v21 = vmov %v8381_v29  ;;  %v2405_v3 = vperm.slane %v6414_v56, 7  ;;  %v7023_v28 = vld [vmem:[%s7925_s2 + $0x290] sm:$0xff]  ;;  %v7035_v56 = vld [vmem:[%s7925_s2 + $0x2a0] sm:$0xff]  ;;  %v7040_v22 = vld [vmem:[%s7925_s2 + $0x2a8] sm:$0xff] }
 0x1a5   :  { %v2357_v12 = vmul.f32 %v8383_v21, %v8382_v13  ;;  %v2336_v29 = vadd.f32 %v2328_v44, %v2309_v17  ;;  %8384 = vst [vmem:[#allocation26_spill] sm:$0xff] %v7040_v22  ;;  %v8385_v17 = vor.u32 %v6713_v46, %v6708_v1  ;;  %v8387_v44 = vunpack.c.l.bf16 %v6962_v47  ;;  %v7070_v34 = vld [vmem:[%s7925_s2 + $0x2b8] sm:$0xff] }
 0x1a6   :  { %v2338_v50 = vadd.f32 %v2330_v40, %v2311_v53  ;;  %v8386_v53 = vunpack.c.l.bf16 %v6957_v63  ;;  %v2409_v21 = vmul.f32 %v2405_v3, %v8080_v59  ;;  %v2411_v16 = vmul.f32 %v2405_v3, %v8079_v20  ;;  %2885 = vmatpush.bf16.msra.mxu2 %v8388_v2  ;;  %2904 = vmatpush.bf16.msra.mxu3 %v3926_v57  ;;  %v7082_v20 = vld [vmem:[%s7925_s2 + $0x2c0] sm:$0xff]  ;;  %v7087_v59 = vld [vmem:[%s7925_s2 + $0x2c8] sm:$0xff] }
 0x1a7   :  { %2847 = vmatpush.bf16.msra.mxu0 %v8385_v17  ;;  %v2384_v40 = vmul.f32 %v2378_v23, %v8387_v44  ;;  %v2363_v51 = vadd.f32 %v2355_v41, %v2336_v29  ;;  %v2432_v1 = vperm.slane %v6729_v61, 0  ;;  %v2455_v46 = vunpack.c.l.bf16 %v7023_v28  ;;  %8389 = vst [vmem:[#allocation27_spill] sm:$0xff] %v7070_v34  ;;  %2866 = vmatpush.bf16.msra.mxu1 %v8390_v5 }
 0x1a8   :  { %v2382_v13 = vmul.f32 %v2378_v23, %v8386_v53  ;;  %v2365_v31 = vadd.f32 %v2357_v12, %v2338_v50  ;;  %v7061_v23 = vld [vmem:[%s7925_s2 + $0x2b0] sm:$0xff]  ;;  %v8083_v17 = vunpack.c.l.bf16 %v7030_v7  ;;  %v2459_v3 = vperm.slane %v6729_v61, 1  ;;  %8393 = vst [vmem:[#allocation28_spill] sm:$0xff] %v7082_v20 }
 0x1a9   :  { %v8082_v53 = vunpack.c.l.bf16 %v7035_v56  ;;  %v8081_v2 = vunpack.c.l.bf16 %v7040_v22  ;;  %v8391_v57 = vunpack.c.l.bf16 %v6993_v8  ;;  %v8392_v29 = vunpack.c.l.bf16 %v6998_v42 }
 0x1aa   :  { %v2390_v50 = vadd.f32 %v2382_v13, %v2363_v51  ;;  %v2392_v41 = vadd.f32 %v2384_v40, %v2365_v31  ;;  %v2463_v35 = vmul.f32 %v2459_v3, %v2455_v46  ;;  %v2465_v31 = vmul.f32 %v2459_v3, %v8083_v17  ;;  %v7111_v3 = vld [vmem:[%s7925_s2 + $0x2d8] sm:$0xff] }
 0x1ab   :  { %v2436_v12 = vmul.f32 %v2432_v1, %v8391_v57  ;;  %v2438_v44 = vmul.f32 %v2432_v1, %v8392_v29  ;;  %2848 = vmatpush.bf16.msra.mxu0 %v8394_v0  ;;  %v2486_v51 = vperm.slane %v6729_v61, 2  ;;  %v8085_v13 = vunpack.c.l.bf16 %v7061_v23 }
 0x1ac   :  { %v8395_v40 = vor.u32 %v6767_v43, %v6772_v62  ;;  %v2417_v1 = vadd.f32 %v2409_v21, %v2390_v50  ;;  %v2419_v5 = vadd.f32 %v2411_v16, %v2392_v41  ;;  %v8084_v57 = vunpack.c.l.bf16 %v7070_v34  ;;  %v7125_v41 = vld [vmem:[%s7925_s2 + $0x2e0] sm:$0xff] }
 0x1ad   :  { %v2513_v60 = vperm.slane %v6729_v61, 3  ;;  %v8396_v43 = vor.u32 %v6833_v15, %v6838_v10  ;;  %v2490_v62 = vmul.f32 %v2486_v51, %v8082_v53  ;;  %v2492_v16 = vmul.f32 %v2486_v51, %v8081_v2  ;;  %v7130_v10 = vld [vmem:[%s7925_s2 + $0x2e8] sm:$0xff] }
 0x1ae   :  { %2886 = vmatpush.bf16.msra.mxu2 %v8395_v40  ;;  %v2536_v21 = vunpack.c.l.bf16 %v7082_v20  ;;  %v8087_v50 = vunpack.c.l.bf16 %v7087_v59  ;;  %v8397_v15 = vor.u32 %v6858_v54, %v6843_v58  ;;  %v2444_v29 = vadd.f32 %v2436_v12, %v2417_v1  ;;  %v7149_v58 = vld [vmem:[%s7925_s2 + $0x2f0] sm:$0xff]  ;;  %v7154_v12 = vld [vmem:[%s7925_s2 + $0x2f8] sm:$0xff] }
 0x1af   :  { %2905 = vmatpush.bf16.msra.mxu3 %v8396_v43  ;;  %v2446_v0 = vadd.f32 %v2438_v44, %v2419_v5  ;;  %v2517_v51 = vmul.f32 %v2513_v60, %v8085_v13  ;;  %v2519_v40 = vmul.f32 %v2513_v60, %v8084_v57  ;;  %v8398_v43 = vor.u32 %v6812_v27, %v6807_v52  ;;  %v4231_v52 = vld [vmem:[%s7927_s4 + $0x84] sm:$0xf]  ;;  %v4232_v57 = vld [vmem:[%s7927_s4 + $0x84] sm:$0xf0] }
 0x1b0   :  { %2867 = vmatpush.bf16.msra.mxu1 %v8397_v15  ;;  %v2540_v2 = vperm.slane %v6729_v61, 4  ;;  %v8086_v53 = vunpack.c.l.bf16 %v7106_v45  ;;  %v8116_v17 = vunpack.c.l.bf16 %v7111_v3  ;;  %v2567_v54 = vperm.slane %v6729_v61, 5  ;;  %v3899_v15 = vld [vmem:[%s7927_s4 + $0x88] sm:$0xf0] }
 0x1b1   :  { %2849 = vmatpush.bf16.msra.mxu0 %v8398_v43  ;;  %v8399_v27 = vor.u32 %v6817_v18, %v6822_v19  ;;  %v2471_v44 = vadd.f32 %v2463_v35, %v2444_v29  ;;  %v2473_v1 = vadd.f32 %v2465_v31, %v2446_v0  ;;  %v8114_v5 = vunpack.c.l.bf16 %v7125_v41  ;;  %v3897_v43 = vld [vmem:[%s7927_s4 + $0x80] sm:$0xf] }
 0x1b2   :  { %v8112_v60 = vunpack.c.l.bf16 %v7130_v10  ;;  %v8400_v18 = vor.u32 %v6893_v6, %v6911_v36  ;;  %v2544_v19 = vmul.f32 %v2540_v2, %v2536_v21  ;;  %v2546_v35 = vmul.f32 %v2540_v2, %v8087_v50 }
 0x1b3   :  { %2887 = vmatpush.bf16.msra.mxu2 %v8399_v27  ;;  %v2571_v31 = vmul.f32 %v2567_v54, %v8086_v53  ;;  %v2573_v29 = vmul.f32 %v2567_v54, %v8116_v17  ;;  %v8401_v0 = vor.u32 %v6921_v14, %v6916_v39  ;;  %v2498_v27 = vadd.f32 %v2490_v62, %v2471_v44 }
 0x1b4   :  { %2906 = vmatpush.bf16.msra.mxu3 %v8400_v18  ;;  %v2500_v13 = vadd.f32 %v2492_v16, %v2473_v1  ;;  %v2594_v36 = vperm.slane %v6729_v61, 6  ;;  %v8107_v6 = vunpack.c.l.bf16 %v7149_v58  ;;  %v8402_v18 = vor.u32 %v6868_v25, %v6863_v49  ;;  %v8404_v1 = vld [vmem:[#allocation24_spill] sm:$0xff] }
 0x1b5   :  { %2868 = vmatpush.bf16.msra.mxu1 %v8401_v0  ;;  %v8102_v2 = vunpack.c.l.bf16 %v7154_v12  ;;  %v2621_v53 = vperm.slane %v6729_v61, 7  ;;  %v3902_v50 = vor.u32 %v4231_v52, %v3899_v15  ;;  %v3898_v54 = vor.u32 %v4232_v57, %v3897_v43 }
 0x1b6   :  { %2850 = vmatpush.bf16.msra.mxu0 %v8402_v18  ;;  %v8403_v39 = vor.u32 %v6883_v38, %v6888_v24  ;;  %v2525_v14 = vadd.f32 %v2517_v51, %v2498_v27  ;;  %v2527_v62 = vadd.f32 %v2519_v40, %v2500_v13  ;;  %v2598_v16 = vmul.f32 %v2594_v36, %v8114_v5  ;;  %v8434_v5 = vld [vmem:[#allocation16_spill] sm:$0xff] }
 0x1b7   :  { %v2600_v44 = vmul.f32 %v2594_v36, %v8112_v60  ;;  %v2625_v49 = vmul.f32 %v2621_v53, %v8107_v6  ;;  %v2627_v61 = vmul.f32 %v2621_v53, %v8102_v2  ;;  %v2283_v25 = vadd.f32 %v6602_v37, %v6725_v4 }
 0x1b8   :  { %2888 = vmatpush.bf16.msra.mxu2 %v8403_v39  ;;  %2907 = vmatpush.bf16.msra.mxu3 %v3902_v50  ;;  %v2285_v38 = vadd.f32 %v6627_v26, %v6774_v32  ;;  %v2552_v24 = vadd.f32 %v2544_v19, %v2525_v14  ;;  %v2554_v13 = vadd.f32 %v2546_v35, %v2527_v62  ;;  %v8113_v57 = vunpack.c.h.bf16 %v6898_v48  ;;  %v8405_v50 = vld [vmem:[#allocation25_spill] sm:$0xff]  ;;  %v8406_v32 = vld [vmem:[#allocation18_spill] sm:$0xff] }
 0x1b9   :  { %2869 = vmatpush.bf16.msra.mxu1 %v3898_v54  ;;  %v8111_v51 = vunpack.c.h.bf16 %v6934_v33  ;;  %v2310_v40 = vadd.f32 %v6687_v30, %v2283_v25  ;;  %v8109_v53 = vunpack.c.h.bf16 %v8404_v1  ;;  %v8106_v15 = vunpack.c.h.bf16 %v8405_v50 }
 0x1ba   :  { %v2312_v52 = vadd.f32 %v6691_v55, %v2285_v38  ;;  %v2579_v43 = vadd.f32 %v2571_v31, %v2552_v24  ;;  %v2581_v37 = vadd.f32 %v2573_v29, %v2554_v13  ;;  %v8407_v26 = vperm.slane %v8406_v32, 4 }
 0x1bb   :  { %v8409_v30 = vperm.slane %v8406_v32, 5  ;;  %v8103_v0 = vunpack.c.h.bf16 %v6957_v63  ;;  %v8101_v27 = vunpack.c.h.bf16 %v6962_v47  ;;  %v2379_v14 = vperm.slane %v8406_v32, 6 }
 0x1bc   :  { %v2329_v4 = vmul.f32 %v8407_v26, %v8113_v57  ;;  %v8408_v19 = vmov %v8407_v26  ;;  %v2606_v36 = vadd.f32 %v2598_v16, %v2579_v43  ;;  %v2608_v18 = vadd.f32 %v2600_v44, %v2581_v37 }
 0x1bd   :  { %v2331_v35 = vmul.f32 %v8408_v19, %v8111_v51  ;;  %v2356_v55 = vmul.f32 %v8409_v30, %v8109_v53  ;;  %v8410_v31 = vmov %v8409_v30  ;;  %v8099_v62 = vunpack.c.h.bf16 %v6979_v9 }
 0x1be   :  { %v2358_v29 = vmul.f32 %v8410_v31, %v8106_v15  ;;  %v2337_v54 = vadd.f32 %v2329_v4, %v2310_v40  ;;  %v8098_v25 = vunpack.c.h.bf16 %v6984_v11  ;;  %v2406_v38 = vperm.slane %v8406_v32, 7  ;;  %v980_v32 = vpop.f32.mrf.mxu0  ;;  %v999_v4 = vpop.f32.mrf.mxu1  ;;  %v8421_v15 = vld [vmem:[#allocation10_spill] sm:$0xff] }
 0x1bf   :  { %v2339_v39 = vadd.f32 %v2331_v35, %v2312_v52  ;;  %v2633_v24 = vadd.f32 %v2625_v49, %v2606_v36  ;;  %v2635_v13 = vadd.f32 %v2627_v61, %v2608_v18  ;;  %v2383_v30 = vmul.f32 %v2379_v14, %v8103_v0  ;;  %v8411_v61 = vld [vmem:[#allocation20_spill] sm:$0xff] }
 0x1c0   :  { %v2364_v26 = vadd.f32 %v2356_v55, %v2337_v54  ;;  %v2385_v16 = vmul.f32 %v2379_v14, %v8101_v27  ;;  %v2410_v44 = vmul.f32 %v2406_v38, %v8099_v62  ;;  %v2412_v40 = vmul.f32 %v2406_v38, %v8098_v25  ;;  %v8418_v27 = vld [vmem:[#allocation19_spill] sm:$0xff] }
 0x1c1   :  { %v2366_v19 = vadd.f32 %v2358_v29, %v2339_v39  ;;  %v2641_v52 = vpack.c.bf16 %v2635_v13, %v2633_v24  ;;  %v8092_v43 = vunpack.c.h.bf16 %v6993_v8  ;;  %v8088_v49 = vunpack.c.h.bf16 %v6998_v42 }
 0x1c2   :  { %v2433_v37 = vperm.slane %v8411_v61, 0  ;;  %v2391_v35 = vadd.f32 %v2383_v30, %v2364_v26  ;;  %v8089_v31 = vunpack.c.h.bf16 %v7023_v28  ;;  %v8091_v29 = vunpack.c.h.bf16 %v7030_v7 }
 0x1c3   :  { %v2393_v55 = vadd.f32 %v2385_v16, %v2366_v19  ;;  %2851 = vmatmul.bf16.vlgmr.msra.gmra.mxu0 %v2641_v52  ;;  %2889 = vmatmul.bf16.vlgmr.msra.gmra.mxu2 %v2641_v52  ;;  %v2460_v54 = vperm.slane %v8411_v61, 1  ;;  %v8090_v39 = vunpack.c.h.bf16 %v7035_v56  ;;  %v8097_v24 = vunpack.c.h.bf16 %v7040_v22 }
 0x1c4   :  { %v2437_v36 = vmul.f32 %v2433_v37, %v8092_v43  ;;  %v2439_v18 = vmul.f32 %v2433_v37, %v8088_v49  ;;  %v2418_v14 = vadd.f32 %v2410_v44, %v2391_v35  ;;  %v2487_v13 = vperm.slane %v8411_v61, 2 }
 0x1c5   :  { %v2420_v38 = vadd.f32 %v2412_v40, %v2393_v55  ;;  %v7258_v26 = vadd.f32 %v999_v4, %v980_v32  ;;  %v2464_v19 = vmul.f32 %v2460_v54, %v8089_v31  ;;  %v8094_v30 = vunpack.c.h.bf16 %v7061_v23 }
 0x1c6   :  { %v8093_v16 = vunpack.c.h.bf16 %v7070_v34  ;;  %v2445_v52 = vadd.f32 %v2437_v36, %v2418_v14  ;;  %v2466_v49 = vmul.f32 %v2460_v54, %v8091_v29  ;;  %v2491_v44 = vmul.f32 %v2487_v13, %v8090_v39 }
 0x1c7   :  { %v2447_v37 = vadd.f32 %v2439_v18, %v2420_v38  ;;  %v2514_v40 = vperm.slane %v8411_v61, 3  ;;  %v8095_v32 = vunpack.c.h.bf16 %v7082_v20  ;;  %v8096_v4 = vunpack.c.h.bf16 %v7087_v59 }
 0x1c8   :  { %v2541_v35 = vperm.slane %v8411_v61, 4  ;;  %v2472_v55 = vadd.f32 %v2464_v19, %v2445_v52  ;;  %v2493_v36 = vmul.f32 %v2487_v13, %v8097_v24  ;;  %v8100_v18 = vunpack.c.h.bf16 %v7106_v45 }
 0x1c9   :  { %v2474_v31 = vadd.f32 %v2466_v49, %v2447_v37  ;;  %v2518_v54 = vmul.f32 %v2514_v40, %v8094_v30  ;;  %v2520_v14 = vmul.f32 %v2514_v40, %v8093_v16  ;;  %v8105_v39 = vunpack.c.h.bf16 %v7111_v3 }
 0x1ca   :  { %v2545_v38 = vmul.f32 %v2541_v35, %v8095_v32  ;;  %v2499_v29 = vadd.f32 %v2491_v44, %v2472_v55  ;;  %v2568_v49 = vperm.slane %v8411_v61, 5  ;;  %v8104_v19 = vunpack.c.h.bf16 %v7125_v41 }
 0x1cb   :  { %v2501_v43 = vadd.f32 %v2493_v36, %v2474_v31  ;;  %v2547_v13 = vmul.f32 %v2541_v35, %v8096_v4  ;;  %v8108_v52 = vunpack.c.h.bf16 %v7130_v10  ;;  %v2595_v37 = vperm.slane %v8411_v61, 6  ;;  %v8412_v36 = vld [vmem:[#allocation13_spill] sm:$0xff] }
 0x1cc   :  { %v8110_v40 = vunpack.c.h.bf16 %v7149_v58  ;;  %v2526_v16 = vadd.f32 %v2518_v54, %v2499_v29  ;;  %v2572_v32 = vmul.f32 %v2568_v49, %v8100_v18  ;;  %v8115_v31 = vunpack.c.h.bf16 %v7154_v12  ;;  %v8413_v4 = vld [vmem:[#allocation5_spill] sm:$0xff]  ;;  %v8414_v29 = vld [vmem:[#allocation14_spill] sm:$0xff] }
 0x1cd   :  { %v2528_v30 = vadd.f32 %v2520_v14, %v2501_v43  ;;  %v2574_v44 = vmul.f32 %v2568_v49, %v8105_v39  ;;  %v2599_v55 = vmul.f32 %v2595_v37, %v8104_v19  ;;  %v2622_v35 = vperm.slane %v8411_v61, 7  ;;  %v8415_v43 = vld [vmem:[#allocation7_spill] sm:$0xff]  ;;  %v8416_v14 = vld [vmem:[#allocation9_spill] sm:$0xff]  ;;  %v8420_v61 = vld [vmem:[#allocation22_spill] sm:$0xff] }
 0x1ce   :  { %v2205_v24 = vadd.f32 %v8413_v4, %v8412_v36  ;;  %v2553_v25 = vadd.f32 %v2545_v38, %v2526_v16  ;;  %v2207_v54 = vadd.f32 %v8415_v43, %v8414_v29  ;;  %v8417_v18 = vunpack.c.l.bf16 %v8416_v14  ;;  %v8424_v36 = vld [vmem:[#allocation23_spill] sm:$0xff] }
 0x1cf   :  { %v2555_v62 = vadd.f32 %v2547_v13, %v2528_v30  ;;  %v8419_v2 = vperm.slane %v8418_v27, 1  ;;  %v2601_v49 = vmul.f32 %v2595_v37, %v8108_v52  ;;  %v2626_v19 = vmul.f32 %v2622_v35, %v8110_v40  ;;  %v8425_v43 = vld [vmem:[#allocation11_spill] sm:$0xff]  ;;  %v8428_v52 = vld [vmem:[#allocation12_spill] sm:$0xff] }
 0x1d0   :  { %v2232_v39 = vadd.f32 %v8420_v61, %v2205_v24  ;;  %v8422_v4 = vunpack.c.l.bf16 %v8421_v15  ;;  %v2580_v38 = vadd.f32 %v2572_v32, %v2553_v25  ;;  %v2234_v29 = vadd.f32 %v8424_v36, %v2207_v54 }
 0x1d1   :  { %v2251_v0 = vmul.f32 %v8419_v2, %v8417_v18  ;;  %v8423_v30 = vmov %v8419_v2  ;;  %v2582_v13 = vadd.f32 %v2574_v44, %v2555_v62  ;;  %v8426_v6 = vunpack.c.l.bf16 %v8425_v43  ;;  %v8431_v44 = vld [vmem:[#allocation21_spill] sm:$0xff] }
 0x1d2   :  { %v2253_v16 = vmul.f32 %v8423_v30, %v8422_v4  ;;  %v8427_v2 = vperm.slane %v8418_v27, 2  ;;  %v8429_v53 = vunpack.c.l.bf16 %v8428_v52  ;;  %v2299_v61 = vperm.slane %v8418_v27, 3 }
 0x1d3   :  { %v2259_v37 = vadd.f32 %v2251_v0, %v2232_v39  ;;  %v2326_v51 = vperm.slane %v8418_v27, 4  ;;  %v2607_v4 = vadd.f32 %v2599_v55, %v2580_v38  ;;  %v2609_v25 = vadd.f32 %v2601_v49, %v2582_v13 }
 0x1d4   :  { %v2278_v18 = vmul.f32 %v8427_v2, %v8426_v6  ;;  %v8430_v40 = vmov %v8427_v2  ;;  %v2628_v62 = vmul.f32 %v2622_v35, %v8115_v31  ;;  %v2261_v32 = vadd.f32 %v2253_v16, %v2234_v29  ;;  %v8432_v6 = vld [vmem:[#allocation2_spill] sm:$0xff]  ;;  %v1018_v2 = vpop.f32.mrf.mxu2 }
 0x1d5   :  { %v2280_v24 = vmul.f32 %v8430_v40, %v8429_v53  ;;  %v2219_v54 = vperm.slane %v8431_v44, 0  ;;  %v8433_v0 = vunpack.c.l.bf16 %v8432_v6  ;;  %v2353_v36 = vperm.slane %v8418_v27, 5  ;;  %v1037_v53 = vpop.f32.mrf.mxu3 }
 0x1d6   :  { %v2286_v30 = vadd.f32 %v2278_v18, %v2259_v37  ;;  %v2634_v40 = vadd.f32 %v2626_v19, %v2607_v4  ;;  %v2636_v60 = vadd.f32 %v2628_v62, %v2609_v25  ;;  %v8435_v55 = vunpack.c.l.bf16 %v8434_v5 }
 0x1d7   :  { %v2305_v39 = vmul.f32 %v2299_v61, %v8433_v0  ;;  %v2288_v57 = vadd.f32 %v2280_v24, %v2261_v32  ;;  %v2246_v38 = vperm.slane %v8431_v44, 1  ;;  %v8436_v16 = vunpack.c.l.bf16 %v6898_v48  ;;  %v8439_v32 = vld [vmem:[#allocation6_spill] sm:$0xff] }
 0x1d8   :  { %v2307_v49 = vmul.f32 %v2299_v61, %v8435_v55  ;;  %v2380_v29 = vperm.slane %v8418_v27, 6  ;;  %v2642_v18 = vpack.c.bf16 %v2636_v60, %v2634_v40  ;;  %v8437_v0 = vunpack.c.l.bf16 %v6934_v33 }
 0x1d9   :  { %v2313_v35 = vadd.f32 %v2305_v39, %v2286_v30  ;;  %v2332_v13 = vmul.f32 %v2326_v51, %v8436_v16  ;;  %v2407_v19 = vperm.slane %v8418_v27, 7  ;;  %v7340_v4 = vadd.f32 %v1037_v53, %v1018_v2  ;;  %v8442_v27 = vld [vmem:[#allocation8_spill] sm:$0xff] }
 0x1da   :  { %v2315_v37 = vadd.f32 %v2307_v49, %v2288_v57  ;;  %v2334_v31 = vmul.f32 %v2326_v51, %v8437_v0  ;;  %v8438_v61 = vunpack.c.l.bf16 %v8404_v1  ;;  %v2434_v62 = vperm.slane %v7258_v26, 0  ;;  %2870 = vmatmul.bf16.vlgmr.msra.gmra.mxu1 %v2642_v18  ;;  %2908 = vmatmul.bf16.vlgmr.msra.gmra.mxu3 %v2642_v18 }
 0x1db   :  { %v2340_v24 = vadd.f32 %v2332_v13, %v2313_v35  ;;  %v8440_v30 = vunpack.c.h.bf16 %v8439_v32  ;;  %v2273_v55 = vperm.slane %v8431_v44, 2  ;;  %v8441_v57 = vunpack.c.l.bf16 %v8405_v50 }
 0x1dc   :  { %v2359_v25 = vmul.f32 %v2353_v36, %v8438_v61  ;;  %v2342_v60 = vadd.f32 %v2334_v31, %v2315_v37  ;;  %v8443_v2 = vunpack.c.h.bf16 %v8442_v27  ;;  %v8444_v49 = vunpack.c.l.bf16 %v6957_v63  ;;  %v8450_v27 = vld [vmem:[#allocation17_spill] sm:$0xff] }
 0x1dd   :  { %v2225_v39 = vmul.f32 %v2219_v54, %v8440_v30  ;;  %v2361_v51 = vmul.f32 %v2353_v36, %v8441_v57  ;;  %v2461_v16 = vperm.slane %v7258_v26, 1  ;;  %v8445_v0 = vunpack.c.l.bf16 %v6962_v47 }
 0x1de   :  { %v2227_v53 = vmul.f32 %v2219_v54, %v8443_v2  ;;  %v2367_v40 = vadd.f32 %v2359_v25, %v2340_v24  ;;  %v2386_v35 = vmul.f32 %v2380_v29, %v8444_v49  ;;  %v8446_v32 = vunpack.c.l.bf16 %v6979_v9  ;;  %v8451_v2 = vld [vmem:[#allocation3_spill] sm:$0xff] }
 0x1df   :  { %v2369_v13 = vadd.f32 %v2361_v51, %v2342_v60  ;;  %v2388_v61 = vmul.f32 %v2380_v29, %v8445_v0  ;;  %v2488_v31 = vperm.slane %v7258_v26, 2  ;;  %v8447_v36 = vunpack.c.l.bf16 %v6984_v11 }
 0x1e0   :  { %v2413_v18 = vmul.f32 %v2407_v19, %v8446_v32  ;;  %v2394_v37 = vadd.f32 %v2386_v35, %v2367_v40  ;;  %v8448_v54 = vunpack.c.l.bf16 %v6993_v8  ;;  %v2515_v25 = vperm.slane %v7258_v26, 3 }
 0x1e1   :  { %v2415_v30 = vmul.f32 %v2407_v19, %v8447_v36  ;;  %v2396_v57 = vadd.f32 %v2388_v61, %v2369_v13  ;;  %v8449_v60 = vunpack.c.l.bf16 %v6998_v42  ;;  %v2542_v29 = vperm.slane %v7258_v26, 4 }
 0x1e2   :  { %v2440_v24 = vmul.f32 %v2434_v62, %v8448_v54  ;;  %v2206_v49 = vadd.f32 %v8451_v2, %v8450_v27  ;;  %v2421_v0 = vadd.f32 %v2413_v18, %v2394_v37  ;;  %v2467_v40 = vmul.f32 %v2461_v16, %v2455_v46 }
 0x1e3   :  { %v2442_v51 = vmul.f32 %v2434_v62, %v8449_v60  ;;  %v8452_v19 = vunpack.c.l.bf16 %v7030_v7  ;;  %v2569_v32 = vperm.slane %v7258_v26, 5  ;;  %v2423_v36 = vadd.f32 %v2415_v30, %v2396_v57  ;;  %v8457_v57 = vld [vmem:[#allocation4_spill] sm:$0xff] }
 0x1e4   :  { %v8453_v13 = vunpack.c.l.bf16 %v7035_v56  ;;  %v8454_v62 = vunpack.c.l.bf16 %v7040_v22  ;;  %v2596_v60 = vperm.slane %v7258_v26, 6  ;;  %v2448_v17 = vadd.f32 %v2440_v24, %v2421_v0 }
 0x1e5   :  { %v2469_v35 = vmul.f32 %v2461_v16, %v8452_v19  ;;  %v8455_v18 = vunpack.c.l.bf16 %v7061_v23  ;;  %v8456_v46 = vunpack.c.l.bf16 %v7070_v34  ;;  %v2623_v16 = vperm.slane %v7258_v26, 7  ;;  %v8458_v19 = vld [vmem:[#allocation15_spill] sm:$0xff] }
 0x1e6   :  { %v2494_v61 = vmul.f32 %v2488_v31, %v8453_v13  ;;  %v2496_v54 = vmul.f32 %v2488_v31, %v8454_v62  ;;  %v2450_v2 = vadd.f32 %v2442_v51, %v2423_v36  ;;  %v2548_v30 = vmul.f32 %v2542_v29, %v2536_v21 }
 0x1e7   :  { %v2521_v37 = vmul.f32 %v2515_v25, %v8455_v18  ;;  %v2523_v27 = vmul.f32 %v2515_v25, %v8456_v46  ;;  %v2208_v13 = vadd.f32 %v8458_v19, %v8457_v57  ;;  %v2233_v22 = vadd.f32 %v2225_v39, %v2206_v49 }
 0x1e8   :  { %v2475_v31 = vadd.f32 %v2467_v40, %v2448_v17  ;;  %v8459_v62 = vunpack.c.l.bf16 %v7087_v59  ;;  %v8460_v0 = vunpack.c.l.bf16 %v7106_v45  ;;  %v8461_v34 = vunpack.c.h.bf16 %v8416_v14 }
 0x1e9   :  { %v2477_v46 = vadd.f32 %v2469_v35, %v2450_v2  ;;  %v2235_v26 = vadd.f32 %v2227_v53, %v2208_v13  ;;  %v8462_v51 = vunpack.c.h.bf16 %v8421_v15  ;;  %v2300_v21 = vperm.slane %v8431_v44, 3 }
 0x1ea   :  { %v2550_v24 = vmul.f32 %v2542_v29, %v8459_v62  ;;  %v2575_v18 = vmul.f32 %v2569_v32, %v8460_v0  ;;  %v2252_v25 = vmul.f32 %v2246_v38, %v8461_v34  ;;  %v2502_v20 = vadd.f32 %v2494_v61, %v2475_v31 }
 0x1eb   :  { %v2254_v36 = vmul.f32 %v2246_v38, %v8462_v51  ;;  %v8463_v17 = vunpack.c.h.bf16 %v8425_v43  ;;  %v2327_v29 = vperm.slane %v8431_v44, 4  ;;  %v2504_v49 = vadd.f32 %v2496_v54, %v2477_v46 }
 0x1ec   :  { %v2260_v57 = vadd.f32 %v2252_v25, %v2233_v22  ;;  %v8464_v40 = vunpack.c.l.bf16 %v7111_v3  ;;  %v8465_v34 = vunpack.c.h.bf16 %v8428_v52  ;;  %v2529_v35 = vadd.f32 %v2521_v37, %v2502_v20 }
 0x1ed   :  { %v2279_v39 = vmul.f32 %v2273_v55, %v8463_v17  ;;  %v2262_v14 = vadd.f32 %v2254_v36, %v2235_v26  ;;  %v8466_v38 = vunpack.c.h.bf16 %v8432_v6  ;;  %v2354_v22 = vperm.slane %v8431_v44, 5 }
 0x1ee   :  { %v2577_v19 = vmul.f32 %v2569_v32, %v8464_v40  ;;  %v2281_v53 = vmul.f32 %v2273_v55, %v8465_v34  ;;  %v2531_v61 = vadd.f32 %v2523_v27, %v2504_v49  ;;  %v8467_v43 = vunpack.c.l.bf16 %v7125_v41 }
 0x1ef   :  { %v2287_v15 = vadd.f32 %v2279_v39, %v2260_v57  ;;  %v2306_v2 = vmul.f32 %v2300_v21, %v8466_v38  ;;  %v8468_v54 = vunpack.c.h.bf16 %v8434_v5  ;;  %v2556_v32 = vadd.f32 %v2548_v30, %v2529_v35 }
 0x1f0   :  { %v2602_v13 = vmul.f32 %v2596_v60, %v8467_v43  ;;  %v2289_v31 = vadd.f32 %v2281_v53, %v2262_v14  ;;  %v8469_v52 = vunpack.c.h.bf16 %v6898_v48  ;;  %v2381_v20 = vperm.slane %v8431_v44, 6 }
 0x1f1   :  { %v2308_v62 = vmul.f32 %v2300_v21, %v8468_v54  ;;  %v2314_v0 = vadd.f32 %v2306_v2, %v2287_v15  ;;  %v2558_v37 = vadd.f32 %v2550_v24, %v2531_v61  ;;  %v8470_v6 = vunpack.c.l.bf16 %v7130_v10 }
 0x1f2   :  { %v2333_v55 = vmul.f32 %v2327_v29, %v8469_v52  ;;  %v8471_v27 = vunpack.c.h.bf16 %v6934_v33  ;;  %v2583_v51 = vadd.f32 %v2575_v18, %v2556_v32  ;;  %v8472_v5 = vunpack.c.h.bf16 %v8404_v1 }
 0x1f3   :  { %v2604_v25 = vmul.f32 %v2596_v60, %v8470_v6  ;;  %v2316_v46 = vadd.f32 %v2308_v62, %v2289_v31  ;;  %v2408_v30 = vperm.slane %v8431_v44, 7  ;;  %v2585_v57 = vadd.f32 %v2577_v19, %v2558_v37 }
 0x1f4   :  { %v2335_v26 = vmul.f32 %v2327_v29, %v8471_v27  ;;  %v2341_v36 = vadd.f32 %v2333_v55, %v2314_v0  ;;  %v2360_v21 = vmul.f32 %v2354_v22, %v8472_v5  ;;  %v8473_v48 = vunpack.c.l.bf16 %v7149_v58 }
 0x1f5   :  { %v8474_v24 = vunpack.c.h.bf16 %v8405_v50  ;;  %v2610_v60 = vadd.f32 %v2602_v13, %v2583_v51  ;;  %v8475_v33 = vunpack.c.h.bf16 %v6957_v63  ;;  %v2435_v18 = vperm.slane %v7340_v4, 0 }
 0x1f6   :  { %v2629_v17 = vmul.f32 %v2623_v16, %v8473_v48  ;;  %v2343_v39 = vadd.f32 %v2335_v26, %v2316_v46  ;;  %v2368_v40 = vadd.f32 %v2360_v21, %v2341_v36  ;;  %v2612_v14 = vadd.f32 %v2604_v25, %v2585_v57  ;;  %v8485_v26 = vld [vmem:[#allocation26_spill] sm:$0xff]  ;;  %v1049_v57 = vpop.f32.mrf.mxu0  ;;  %v1068_v48 = vpop.f32.mrf.mxu1 }
 0x1f7   :  { %v2362_v49 = vmul.f32 %v2354_v22, %v8474_v24  ;;  %v2387_v29 = vmul.f32 %v2381_v20, %v8475_v33  ;;  %v8476_v1 = vunpack.c.l.bf16 %v7154_v12  ;;  %v8477_v19 = vunpack.c.h.bf16 %v6962_v47 }
 0x1f8   :  { %v2637_v35 = vadd.f32 %v2629_v17, %v2610_v60  ;;  %v8478_v50 = vunpack.c.h.bf16 %v6979_v9  ;;  %v2462_v2 = vperm.slane %v7340_v4, 1  ;;  %v8479_v61 = vunpack.c.h.bf16 %v6984_v11  ;;  %v8488_v17 = vld [vmem:[#allocation27_spill] sm:$0xff] }
 0x1f9   :  { %v2631_v34 = vmul.f32 %v2623_v16, %v8476_v1  ;;  %v2370_v44 = vadd.f32 %v2362_v49, %v2343_v39  ;;  %v2389_v53 = vmul.f32 %v2381_v20, %v8477_v19  ;;  %v2395_v15 = vadd.f32 %v2387_v29, %v2368_v40  ;;  %v8490_v49 = vld [vmem:[#allocation28_spill] sm:$0xff] }
 0x1fa   :  { %v2414_v38 = vmul.f32 %v2408_v30, %v8478_v50  ;;  %v2416_v43 = vmul.f32 %v2408_v30, %v8479_v61  ;;  %v8480_v31 = vunpack.c.h.bf16 %v6993_v8  ;;  %v2489_v54 = vperm.slane %v7340_v4, 2 }
 0x1fb   :  { %v2639_v22 = vadd.f32 %v2631_v34, %v2612_v14  ;;  %v2397_v63 = vadd.f32 %v2389_v53, %v2370_v44  ;;  %v8481_v32 = vunpack.c.h.bf16 %v6998_v42  ;;  %v8482_v52 = vunpack.c.h.bf16 %v7023_v28 }
 0x1fc   :  { %v2422_v13 = vadd.f32 %v2414_v38, %v2395_v15  ;;  %v2441_v16 = vmul.f32 %v2435_v18, %v8480_v31  ;;  %v2516_v20 = vperm.slane %v7340_v4, 3  ;;  %v8483_v37 = vunpack.c.h.bf16 %v7030_v7  ;;  %v1087_v31 = vpop.f32.mrf.mxu2 }
 0x1fd   :  { %v2643_v47 = vpack.c.bf16 %v2639_v22, %v2637_v35  ;;  %v2424_v62 = vadd.f32 %v2416_v43, %v2397_v63  ;;  %v2443_v0 = vmul.f32 %v2435_v18, %v8481_v32  ;;  %v2468_v55 = vmul.f32 %v2462_v2, %v8482_v52 }
 0x1fe   :  { %v2449_v9 = vadd.f32 %v2441_v16, %v2422_v13  ;;  %v2470_v8 = vmul.f32 %v2462_v2, %v8483_v37  ;;  %v8484_v25 = vunpack.c.h.bf16 %v7035_v56  ;;  %v2543_v27 = vperm.slane %v7340_v4, 4  ;;  %v1106_v16 = vpop.f32.mrf.mxu3 }
 0x1ff   :  { %2856 = vmatmul.bf16.gmra.mxu0 %v2643_v47  ;;  %2894 = vmatmul.bf16.gmra.mxu2 %v2643_v47  ;;  %v2451_v11 = vadd.f32 %v2443_v0, %v2424_v62  ;;  %v8486_v51 = vunpack.c.h.bf16 %v8485_v26  ;;  %v8487_v5 = vunpack.c.h.bf16 %v7061_v23  ;;  %v2570_v30 = vperm.slane %v7340_v4, 5  ;;  %v1070_v47 = vpop.f32.mrf.mxu1  ;;  %v4019_v26 = vld [vmem:[%s7929_s7 + $0x78] sm:$0xf0] }
 0x200   :  { %v2476_v6 = vadd.f32 %v2468_v55, %v2449_v9  ;;  %v2495_v46 = vmul.f32 %v2489_v54, %v8484_v25  ;;  %v8489_v39 = vunpack.c.h.bf16 %v8488_v17  ;;  %v8491_v60 = vunpack.c.h.bf16 %v8490_v49  ;;  %v4262_v25 = vld [vmem:[%s7929_s7 + $0x74] sm:$0xf0] }
 0x201   :  { %v2478_v42 = vadd.f32 %v2470_v8, %v2451_v11  ;;  %v2497_v36 = vmul.f32 %v2489_v54, %v8486_v51  ;;  %v2522_v21 = vmul.f32 %v2516_v20, %v8487_v5  ;;  %v2597_v33 = vperm.slane %v7340_v4, 6  ;;  %v1051_v54 = vpop.f32.mrf.mxu0  ;;  %v4009_v51 = vld [vmem:[%s7929_s7 + $0x60] sm:$0xf]  ;;  %v4278_v49 = vld [vmem:[%s7929_s7 + $0xf4] sm:$0xf0] }
 0x202   :  { %v2503_v28 = vadd.f32 %v2495_v46, %v2476_v6  ;;  %v2524_v24 = vmul.f32 %v2516_v20, %v8489_v39  ;;  %v2549_v40 = vmul.f32 %v2543_v27, %v8491_v60  ;;  %v8492_v18 = vunpack.c.h.bf16 %v7087_v59  ;;  %v4017_v6 = vld [vmem:[%s7929_s7 + $0x70] sm:$0xf] }
 0x203   :  { %v2505_v7 = vadd.f32 %v2497_v36, %v2478_v42  ;;  %v8493_v1 = vunpack.c.h.bf16 %v7106_v45  ;;  %v2624_v44 = vperm.slane %v7340_v4, 7  ;;  %v8494_v53 = vunpack.c.h.bf16 %v7111_v3  ;;  %v1116_v3 = vld [vmem:[%s7928_s6] sm:$0x3]  ;;  %v4260_v36 = vld [vmem:[%s7929_s7 + $0x64] sm:$0xf0] }
 0x204   :  { %v2530_v56 = vadd.f32 %v2522_v21, %v2503_v28  ;;  %v2551_v14 = vmul.f32 %v2543_v27, %v8492_v18  ;;  %v8495_v50 = vunpack.c.h.bf16 %v7125_v41  ;;  %v8496_v22 = vunpack.c.h.bf16 %v7130_v10  ;;  %v1089_v20 = vpop.f32.mrf.mxu2  ;;  %v4261_v27 = vld [vmem:[%s7929_s7 + $0x74] sm:$0xf]  ;;  %v4001_v60 = vld [vmem:[%s7929_s7 + $0x50] sm:$0xf] }
 0x205   :  { %v2532_v29 = vadd.f32 %v2524_v24, %v2505_v7  ;;  %v2576_v34 = vmul.f32 %v2570_v30, %v8493_v1  ;;  %v2578_v35 = vmul.f32 %v2570_v30, %v8494_v53  ;;  %v8497_v61 = vunpack.c.h.bf16 %v7149_v58  ;;  %v4259_v30 = vld [vmem:[%s7929_s7 + $0x64] sm:$0xf]  ;;  %v4083_v7 = vld [vmem:[%s7929_s7 + $0xf8] sm:$0xf0] }
 0x206   :  { %v2557_v23 = vadd.f32 %v2549_v40, %v2530_v56  ;;  %v2603_v38 = vmul.f32 %v2597_v33, %v8495_v50  ;;  %v2605_v63 = vmul.f32 %v2597_v33, %v8496_v22  ;;  %v8498_v13 = vunpack.c.h.bf16 %v7154_v12  ;;  %v1108_v11 = vpop.f32.mrf.mxu3  ;;  %v4081_v56 = vld [vmem:[%s7929_s7 + $0xf0] sm:$0xf]  ;;  %v4258_v40 = vld [vmem:[%s7929_s7 + $0x54] sm:$0xf0]  ;;  %v4275_v33 = vld [vmem:[%s7929_s7 + $0xe4] sm:$0xf] }
 0x207   :  { %v2559_v19 = vadd.f32 %v2551_v14, %v2532_v29  ;;  %v2630_v43 = vmul.f32 %v2624_v44, %v8497_v61  ;;  %v1069_v10 = vadd.f32 %v1068_v48, %v1049_v57  ;;  %v7479_v32 = vperm.slane %v1116_v3, 0  ;;  %v4011_v57 = vld [vmem:[%s7929_s7 + $0x68] sm:$0xf0]  ;;  %v4277_v48 = vld [vmem:[%s7929_s7 + $0xf4] sm:$0xf] }
 0x208   :  { %v2584_v15 = vadd.f32 %v2576_v34, %v2557_v23  ;;  %v2632_v4 = vmul.f32 %v2624_v44, %v8498_v13  ;;  %v1071_v58 = vadd.f32 %v1070_v47, %v1051_v54  ;;  %v7490_v55 = vperm.slane %v1116_v3, 1  ;;  %v4075_v29 = vld [vmem:[%s7929_s7 + $0xe8] sm:$0xf0]  ;;  %v4257_v44 = vld [vmem:[%s7929_s7 + $0x54] sm:$0xf]  ;;  %v1073_v47 = vpop.f32.mrf.mxu1 }
 0x209   :  { %v2586_v2 = vadd.f32 %v2578_v35, %v2559_v19  ;;  %v7482_v12 = vadd.f32 %v7479_v32, %v1069_v10  ;;  %v1107_v37 = vadd.f32 %v1106_v16, %v1087_v31  ;;  %v1109_v46 = vadd.f32 %v1108_v11, %v1089_v20  ;;  %v4003_v19 = vld [vmem:[%s7929_s7 + $0x58] sm:$0xf0]  ;;  %v4073_v3 = vld [vmem:[%s7929_s7 + $0xe0] sm:$0xf]  ;;  %v4276_v31 = vld [vmem:[%s7929_s7 + $0xe4] sm:$0xf0]  ;;  %v1054_v54 = vpop.f32.mrf.mxu0 }
 0x20a   :  { %v2611_v59 = vadd.f32 %v2603_v38, %v2584_v15  ;;  %v7485_v9 = vadd.f32 %v7479_v32, %v1071_v58  ;;  %v4018_v42 = vor.u32 %v4262_v25, %v4017_v6  ;;  %v4022_v39 = vor.u32 %v4261_v27, %v4019_v26  ;;  %v3993_v16 = vld [vmem:[%s7929_s7 + $0x40] sm:$0xf]  ;;  %v4256_v10 = vld [vmem:[%s7929_s7 + $0x44] sm:$0xf0]  ;;  %v3995_v58 = vld [vmem:[%s7929_s7 + $0x48] sm:$0xf0] }
 0x20b   :  { %v2613_v45 = vadd.f32 %v2605_v63, %v2586_v2  ;;  %v7488_v52 = vmul.f32 0.70710677, %v7482_v12  ;;  %v7517_v5 = vadd.f32 %v7490_v55, %v1107_v37  ;;  %v7535_v17 = vadd.f32 %v7490_v55, %v1109_v46  ;;  %v4273_v37 = vld [vmem:[%s7929_s7 + $0xd4] sm:$0xf]  ;;  %v4067_v6 = vld [vmem:[%s7929_s7 + $0xd8] sm:$0xf0] }
 0x20c   :  { %v2638_v41 = vadd.f32 %v2630_v43, %v2611_v59  ;;  %v7493_v8 = vmul.f32 0.70710677, %v7485_v9  ;;  %3129 = vmatpush.bf16.msrb.mxu0 %v4018_v42  ;;  %v4010_v24 = vor.u32 %v4260_v36, %v4009_v51  ;;  %3167 = vmatpush.bf16.msrb.mxu2 %v4022_v39  ;;  %v4014_v23 = vor.u32 %v4259_v30, %v4011_v57  ;;  %v4065_v25 = vld [vmem:[%s7929_s7 + $0xd0] sm:$0xf]  ;;  %v4274_v27 = vld [vmem:[%s7929_s7 + $0xd4] sm:$0xf0] }
 0x20d   :  { %v2640_v62 = vadd.f32 %v2632_v4, %v2613_v45  ;;  %v7514_v28 = vand.u32 2147483647, %v7488_v52  ;;  %v7557_v14 = vmul.f32 0.70710677, %v7517_v5  ;;  %v4086_v1 = vor.u32 %v4277_v48, %v4083_v7  ;;  %v1092_v48 = vpop.f32.mrf.mxu2 }
 0x20e   :  { %v7520_v21 = vand.u32 2147483647, %v7493_v8  ;;  %v7567_v53 = vmul.f32 0.70710677, %v7535_v17  ;;  %v4082_v35 = vor.u32 %v4278_v49, %v4081_v56  ;;  %v4002_v15 = vor.u32 %v4258_v40, %v4001_v60  ;;  %v1111_v7 = vpop.f32.mrf.mxu3 }
 0x20f   :  { %v2644_v0 = vpack.c.bf16 %v2640_v62, %v2638_v41  ;;  %v1162_v18 = vmul.f32 0.3275911, %v7514_v28  ;;  %3186 = vmatpush.bf16.msrb.mxu3 %v4086_v1  ;;  %v4078_v50 = vor.u32 %v4275_v33, %v4075_v29  ;;  %v7570_v38 = vand.u32 2147483647, %v7557_v14 }
 0x210   :  { %v1164_v34 = vmul.f32 0.3275911, %v7520_v21  ;;  %3130 = vmatpush.bf16.msrb.mxu0 %v4010_v24  ;;  %3168 = vmatpush.bf16.msrb.mxu2 %v4014_v23  ;;  %v4006_v2 = vor.u32 %v4257_v44, %v4003_v19  ;;  %v7573_v59 = vand.u32 2147483647, %v7567_v53  ;;  %v4074_v62 = vor.u32 %v4276_v31, %v4073_v3  ;;  %v1075_v49 = vpop.f32.mrf.mxu1 }
 0x211   :  { %2875 = vmatmul.bf16.gmra.mxu1 %v2644_v0  ;;  %2913 = vmatmul.bf16.gmra.mxu3 %v2644_v0  ;;  %v1170_v22 = vadd.f32 1.0, %v1162_v18  ;;  %v1163_v61 = vmul.f32 0.3275911, %v7570_v38  ;;  %v4255_v0 = vld [vmem:[%s7929_s7 + $0x44] sm:$0xf]  ;;  %v3994_v20 = vor.u32 %v4256_v10, %v3993_v16  ;;  %v4070_v46 = vor.u32 %v4273_v37, %v4067_v6  ;;  %v1056_v56 = vpop.f32.mrf.mxu0 }
 0x212   :  { %3148 = vmatpush.bf16.msrb.mxu1 %v4082_v35  ;;  %v1172_v63 = vadd.f32 1.0, %v1164_v34  ;;  %v1165_v43 = vmul.f32 0.3275911, %v7573_v59  ;;  %v3998_v11 = vor.u32 %v4255_v0, %v3995_v58  ;;  %v4066_v26 = vor.u32 %v4274_v27, %v4065_v25  ;;  %v3987_v37 = vld [vmem:[%s7929_s7 + $0x38] sm:$0xf0] }
 0x213   :  { %3187 = vmatpush.bf16.msrb.mxu3 %v4078_v50  ;;  %4280 = vrcp.f32 %v1170_v22  ;;  %v1171_v45 = vadd.f32 1.0, %v1163_v61  ;;  %v1074_v33 = vadd.f32 %v1073_v47, %v1054_v54  ;;  %v1076_v29 = vadd.f32 %v1075_v49, %v1056_v56  ;;  %v3985_v47 = vld [vmem:[%s7929_s7 + $0x30] sm:$0xf]  ;;  %v4271_v6 = vld [vmem:[%s7929_s7 + $0xc4] sm:$0xf] }
 0x214   :  { %3131 = vmatpush.bf16.msrb.mxu0 %v4002_v15  ;;  %3169 = vmatpush.bf16.msrb.mxu2 %v4006_v2  ;;  %4282 = vrcp.f32 %v1172_v63  ;;  %v1173_v13 = vadd.f32 1.0, %v1165_v43  ;;  %v1258_v22 = vsub.f32 0.0, %v7514_v28  ;;  %v1259_v43 = vsub.f32 0.0, %v7570_v38  ;;  %v4057_v27 = vld [vmem:[%s7929_s7 + $0xc0] sm:$0xf] }
 0x215   :  { %4284 = vrcp.f32 %v1171_v45  ;;  %v7622_v44 = vadd.f32 %v7479_v32, %v1074_v33  ;;  %v7625_v19 = vadd.f32 %v7479_v32, %v1076_v29  ;;  %v1094_v63 = vpop.f32.mrf.mxu2  ;;  %v1260_v45 = vsub.f32 0.0, %v7520_v21  ;;  %v4269_v56 = vld [vmem:[%s7929_s7 + $0xb4] sm:$0xf] }
 0x216   :  { %3149 = vmatpush.bf16.msrb.mxu1 %v4074_v62  ;;  %4286 = vrcp.f32 %v1173_v13  ;;  %v1113_v61 = vpop.f32.mrf.mxu3  ;;  %v1112_v32 = vadd.f32 %v1111_v7, %v1092_v48  ;;  %v4254_v62 = vld [vmem:[%s7929_s7 + $0x34] sm:$0xf0]  ;;  %v1266_v58 = vmul.f32 %v1258_v22, %v7514_v28  ;;  %v4059_v28 = vld [vmem:[%s7929_s7 + $0xc8] sm:$0xf0]  ;;  %v4251_v48 = vld [vmem:[%s7929_s7 + $0x24] sm:$0xf] }
 0x217   :  { %3188 = vmatpush.bf16.msrb.mxu3 %v4070_v46  ;;  %v7634_v13 = vmul.f32 0.70710677, %v7622_v44  ;;  %v7637_v3 = vmul.f32 0.70710677, %v7625_v19  ;;  %v1114_v54 = vadd.f32 %v1113_v61, %v1094_v63  ;;  %v1268_v25 = vmul.f32 %v1260_v45, %v7520_v21  ;;  %v3977_v21 = vld [vmem:[%s7929_s7 + $0x20] sm:$0xf] }
 0x218   :  { %3132 = vmatpush.bf16.msrb.mxu0 %v3994_v20  ;;  %3170 = vmatpush.bf16.msrb.mxu2 %v3998_v11  ;;  %v3986_v20 = vor.u32 %v4254_v62, %v3985_v47  ;;  %v4253_v11 = vld [vmem:[%s7929_s7 + $0x34] sm:$0xf]  ;;  %v1274_v33 = vmul.f32 1.442695, %v1266_v58  ;;  %v1267_v47 = vmul.f32 %v1259_v43, %v7570_v38  ;;  %v3969_v62 = vld [vmem:[%s7929_s7 + $0x10] sm:$0xf] }
 0x219   :  { %v7577_v4 = vpop.eup %4280  ;;  %v3990_v46 = vor.u32 %v4253_v11, %v3987_v37  ;;  %v7679_v7 = vadd.f32 %v7490_v55, %v1114_v54  ;;  %v7707_v61 = vand.u32 2147483647, %v7637_v3  ;;  %v3971_v38 = vld [vmem:[%s7929_s7 + $0x18] sm:$0xf0]  ;;  %v4267_v43 = vld [vmem:[%s7929_s7 + $0xa4] sm:$0xf] }
 0x21a   :  { %v7588_v41 = vpop.eup %4282  ;;  %v1186_v42 = vmul.f32 1.0614054, %v7577_v4  ;;  %3150 = vmatpush.bf16.msrb.mxu1 %v4066_v26  ;;  %v7667_v26 = vadd.f32 %v7490_v55, %v1112_v32  ;;  %4288 = vpow2.f32 %v1274_v33  ;;  %v4043_v11 = vld [vmem:[%s7929_s7 + $0xa8] sm:$0xf0]  ;;  %vm1138_vm0 = vcmp.ge.f32.partialorder %v7488_v52, 0.0 }
 0x21b   :  { %v1188_v51 = vmul.f32 1.0614054, %v7588_v41  ;;  %v7613_v30 = vpop.eup %4284  ;;  %v7710_v45 = vmul.f32 0.70710677, %v7679_v7  ;;  %vm1140_vm1 = vcmp.ge.f32.partialorder %v7493_v8, 0.0  ;;  %vm1139_vm2 = vcmp.ge.f32.partialorder %v7557_v14, 0.0 }
 0x21c   :  { %v1194_v36 = vadd.f32 -1.4531521, %v1186_v42  ;;  %v1187_v24 = vmul.f32 1.0614054, %v7613_v30  ;;  %v7618_v40 = vpop.eup %4286  ;;  %v4272_v42 = vld [vmem:[%s7929_s7 + $0xc4] sm:$0xf0]  ;;  %3133 = vmatpush.bf16.msrb.mxu0 %v3986_v20  ;;  %3171 = vmatpush.bf16.msrb.mxu2 %v3990_v46 }
 0x21d   :  { %v1196_v57 = vadd.f32 -1.4531521, %v1188_v51  ;;  %v1189_v34 = vmul.f32 1.0614054, %v7618_v40  ;;  %v4062_v51 = vor.u32 %v4271_v6, %v4059_v28  ;;  %v7704_v63 = vmul.f32 0.70710677, %v7667_v26 }
 0x21e   :  { %v1202_v39 = vmul.f32 %v7577_v4, %v1194_v36  ;;  %v1195_v23 = vadd.f32 -1.4531521, %v1187_v24  ;;  %v4058_v36 = vor.u32 %v4272_v42, %v4057_v27  ;;  %v3979_v24 = vld [vmem:[%s7929_s7 + $0x28] sm:$0xf0]  ;;  %v1168_v28 = vmul.f32 0.3275911, %v7707_v61 }
 0x21f   :  { %v1204_v60 = vmul.f32 %v7588_v41, %v1196_v57  ;;  %v1197_v2 = vadd.f32 -1.4531521, %v1189_v34  ;;  %v4252_v57 = vld [vmem:[%s7929_s7 + $0x24] sm:$0xf0]  ;;  %3189 = vmatpush.bf16.msrb.mxu3 %v4062_v51  ;;  %v3982_v55 = vor.u32 %v4251_v48, %v3979_v24  ;;  %v1276_v27 = vmul.f32 1.442695, %v1267_v47 }
 0x220   :  { %v1210_v18 = vadd.f32 1.4214138, %v1202_v39  ;;  %v1203_v15 = vmul.f32 %v7613_v30, %v1195_v23  ;;  %v3978_v39 = vor.u32 %v4252_v57, %v3977_v21  ;;  %3151 = vmatpush.bf16.msrb.mxu1 %v4058_v36  ;;  %v7739_v42 = vand.u32 2147483647, %v7710_v45  ;;  %v4289_v51 = vpop.eup %4288 }
 0x221   :  { %v1212_v1 = vadd.f32 1.4214138, %v1204_v60  ;;  %v1205_v0 = vmul.f32 %v7618_v40, %v1197_v2  ;;  %v7701_v2 = vand.u32 2147483647, %v7634_v13  ;;  %3172 = vmatpush.bf16.msrb.mxu2 %v3982_v55  ;;  %vm1141_vm3 = vcmp.ge.f32.partialorder %v7567_v53, 0.0 }
 0x222   :  { %v1218_v35 = vmul.f32 %v7577_v4, %v1210_v18  ;;  %v1211_v16 = vadd.f32 1.4214138, %v1203_v15  ;;  %v4051_v18 = vld [vmem:[%s7929_s7 + $0xb8] sm:$0xf0]  ;;  %v4270_v15 = vld [vmem:[%s7929_s7 + $0xb4] sm:$0xf0]  ;;  %3134 = vmatpush.bf16.msrb.mxu0 %v3978_v39 }
 0x223   :  { %v1220_v50 = vmul.f32 %v7588_v41, %v1212_v1  ;;  %v1213_v60 = vadd.f32 1.4214138, %v1205_v0  ;;  %v1278_v1 = vmul.f32 1.442695, %v1268_v25  ;;  %v4054_v34 = vor.u32 %v4269_v56, %v4051_v18  ;;  %v4249_v0 = vld [vmem:[%s7929_s7 + $0x14] sm:$0xf] }
 0x224   :  { %v1226_v31 = vadd.f32 -0.28449672, %v1218_v35  ;;  %v1219_v49 = vmul.f32 %v7613_v30, %v1211_v16  ;;  %v4049_v35 = vld [vmem:[%s7929_s7 + $0xb0] sm:$0xf]  ;;  %v1166_v37 = vmul.f32 0.3275911, %v7701_v2  ;;  %v3974_v6 = vor.u32 %v4249_v0, %v3971_v38 }
 0x225   :  { %v1228_v10 = vadd.f32 -0.28449672, %v1220_v50  ;;  %v1261_v50 = vsub.f32 0.0, %v7573_v59  ;;  %v4050_v22 = vor.u32 %v4270_v15, %v4049_v35  ;;  %v1221_v32 = vmul.f32 %v7618_v40, %v1213_v60  ;;  %3190 = vmatpush.bf16.msrb.mxu3 %v4054_v34  ;;  %v4035_v38 = vld [vmem:[%s7929_s7 + $0x98] sm:$0xf0] }
 0x226   :  { %v1234_v29 = vmul.f32 %v7577_v4, %v1226_v31  ;;  %v1227_v16 = vadd.f32 -0.28449672, %v1219_v49  ;;  %4290 = vpow2.f32 %v1278_v1  ;;  %v4046_v25 = vor.u32 %v4267_v43, %v4043_v11  ;;  %3173 = vmatpush.bf16.msrb.mxu2 %v3974_v6  ;;  %v4033_v43 = vld [vmem:[%s7929_s7 + $0x90] sm:$0xf] }
 0x227   :  { %v1236_v23 = vmul.f32 %v7588_v41, %v1228_v10  ;;  %3152 = vmatpush.bf16.msrb.mxu1 %v4050_v22  ;;  %v4250_v10 = vld [vmem:[%s7929_s7 + $0x14] sm:$0xf0]  ;;  %v1269_v58 = vmul.f32 %v1261_v50, %v7573_v59  ;;  %v1229_v46 = vadd.f32 -0.28449672, %v1221_v32  ;;  %v7735_v59 = vand.u32 2147483647, %v7704_v63 }
 0x228   :  { %v1242_v31 = vadd.f32 0.2548296, %v1234_v29  ;;  %v3970_v20 = vor.u32 %v4250_v10, %v3969_v62  ;;  %v1235_v57 = vmul.f32 %v7613_v30, %v1227_v16  ;;  %v1174_v24 = vadd.f32 1.0, %v1166_v37  ;;  %v4041_v22 = vld [vmem:[%s7929_s7 + $0xa0] sm:$0xf] }
 0x229   :  { %v1244_v54 = vadd.f32 0.2548296, %v1236_v23  ;;  %3191 = vmatpush.bf16.msrb.mxu3 %v4046_v25  ;;  %v1280_v36 = vmul.f32 1.442695, %v1269_v58  ;;  %v1237_v56 = vmul.f32 %v7618_v40, %v1229_v46  ;;  %v1167_v49 = vmul.f32 0.3275911, %v7735_v59 }
 0x22a   :  { %3135 = vmatpush.bf16.msrb.mxu0 %v3970_v20  ;;  %v1250_v21 = vmul.f32 %v7577_v4, %v1242_v31  ;;  %v1176_v60 = vadd.f32 1.0, %v1168_v28  ;;  %4292 = vpow2.f32 %v1276_v27  ;;  %v1169_v33 = vmul.f32 0.3275911, %v7739_v42  ;;  %v4268_v32 = vld [vmem:[%s7929_s7 + $0xa4] sm:$0xf0] }
 0x22b   :  { %v1252_v48 = vmul.f32 %v7588_v41, %v1244_v54  ;;  %4294 = vpow2.f32 %v1280_v36  ;;  %v1243_v55 = vadd.f32 0.2548296, %v1235_v57  ;;  %v1245_v4 = vadd.f32 0.2548296, %v1237_v56  ;;  %v3961_v31 = vld [vmem:[%s7929_s7] sm:$0xf] }
 0x22c   :  { %v4291_v39 = vpop.eup %4290  ;;  %v1290_v29 = vmul.f32 %v4289_v51, %v1250_v21  ;;  %4296 = vrcp.f32 %v1174_v24  ;;  %v1175_v23 = vadd.f32 1.0, %v1167_v49  ;;  %v1177_v41 = vadd.f32 1.0, %v1169_v33  ;;  %v4247_v62 = vld [vmem:[%s7929_s7 + $0x4] sm:$0xf]  ;;  %v3963_v10 = vld [vmem:[%s7929_s7 + $0x8] sm:$0xf0] }
 0x22d   :  { %v1292_v18 = vmul.f32 %v4291_v39, %v1252_v48  ;;  %4298 = vrcp.f32 %v1176_v60  ;;  %v1251_v35 = vmul.f32 %v7613_v30, %v1243_v55  ;;  %v1253_v16 = vmul.f32 %v7618_v40, %v1245_v4  ;;  %v4248_v30 = vld [vmem:[%s7929_s7 + $0x4] sm:$0xf0]  ;;  %v4265_v20 = vld [vmem:[%s7929_s7 + $0x94] sm:$0xf]  ;;  %v2677_v46 = vld [vmem:[%s7930_s5] sm:$0x3] }
 0x22e   :  { %v1298_v34 = vsub.f32 1.0, %v1290_v29  ;;  %4300 = vrcp.f32 %v1175_v23  ;;  %v4042_v47 = vor.u32 %v4268_v32, %v4041_v22  ;;  %v3962_v58 = vor.u32 %v4248_v30, %v3961_v31  ;;  %v4266_v51 = vld [vmem:[%s7929_s7 + $0x94] sm:$0xf0] }
 0x22f   :  { %v1300_v15 = vsub.f32 1.0, %v1292_v18  ;;  %4302 = vrcp.f32 %v1177_v41  ;;  %v3966_v40 = vor.u32 %v4247_v62, %v3963_v10  ;;  %v4320_v37 = vmov -1.0  }
 0x230   :  { %v4293_v50 = vpop.eup %4292  ;;  %v1146_v6 = vsel %vm1138_vm0, 1.0, %v4320_v37  ;;  %v1148_v25 = vsel %vm1140_vm1, 1.0, %v4320_v37  ;;  %3153 = vmatpush.bf16.msrb.mxu1 %v4042_v47  ;;  %v4038_v27 = vor.u32 %v4265_v20, %v4035_v38  ;;  %3136 = vmatpush.bf16.msrb.mxu0 %v3962_v58  ;;  %v4034_v52 = vor.u32 %v4266_v51, %v4033_v43 }
 0x231   :  { %v4295_v54 = vpop.eup %4294  ;;  %v1291_v28 = vmul.f32 %v4293_v50, %v1251_v35  ;;  %3174 = vmatpush.bf16.msrb.mxu2 %v3966_v40  ;;  %v7797_v48 = vperm.slane %v2677_v46, 0  ;;  %v1306_v39 = vmul.f32 %v1298_v34, %v1146_v6  ;;  %v1308_v24 = vmul.f32 %v1300_v15, %v1148_v25 }
 0x232   :  { %v7769_v0 = vpop.eup %4296  ;;  %v1293_v36 = vmul.f32 %v4295_v54, %v1253_v16  ;;  %3192 = vmatpush.bf16.msrb.mxu3 %v4038_v27  ;;  %v1147_v14 = vsel %vm1139_vm2, 1.0, %v4320_v37  ;;  %v1314_v55 = vmul.f32 0.5, %v7482_v12  ;;  %v1316_v18 = vmul.f32 0.5, %v7485_v9 }
 0x233   :  { %v7780_v11 = vpop.eup %4298  ;;  %v1190_v57 = vmul.f32 1.0614054, %v7769_v0  ;;  %v1299_v60 = vsub.f32 1.0, %v1291_v28  ;;  %v1149_v4 = vsel %vm1141_vm3, 1.0, %v4320_v37  ;;  %v1322_v35 = vadd.f32 1.0, %v1306_v39 }
 0x234   :  { %v1192_v56 = vmul.f32 1.0614054, %v7780_v11  ;;  %v7800_v49 = vpop.eup %4300  ;;  %3154 = vmatpush.bf16.msrb.mxu1 %v4034_v52  ;;  %v1301_v29 = vsub.f32 1.0, %v1293_v36  ;;  %v1324_v15 = vadd.f32 1.0, %v1308_v24  ;;  %v7813_v54 = vperm.slane %v2677_v46, 1 }
 0x235   :  { %v7802_v33 = vpop.eup %4302  ;;  %v1198_v41 = vadd.f32 -1.4531521, %v1190_v57  ;;  %v1307_v22 = vmul.f32 %v1299_v60, %v1147_v14  ;;  %v1191_v31 = vmul.f32 1.0614054, %v7800_v49  ;;  %v1315_v47 = vmul.f32 0.5, %v7517_v5 }
 0x236   :  { %v1200_v50 = vadd.f32 -1.4531521, %v1192_v56  ;;  %v1193_v16 = vmul.f32 1.0614054, %v7802_v33  ;;  %v1309_v53 = vmul.f32 %v1301_v29, %v1149_v4  ;;  %v1330_v62 = vmul.f32 %v1322_v35, %v1314_v55  ;;  %v4027_v55 = vld [vmem:[%s7929_s7 + $0x88] sm:$0xf0] }
 0x237   :  { %v1332_v10 = vmul.f32 %v1324_v15, %v1316_v18  ;;  %v1317_v20 = vmul.f32 0.5, %v7535_v17  ;;  %v1323_v38 = vadd.f32 1.0, %v1307_v22  ;;  %v1199_v6 = vadd.f32 -1.4531521, %v1191_v31  ;;  %v4025_v18 = vld [vmem:[%s7929_s7 + $0x80] sm:$0xf] }
 0x238   :  { %v1208_v40 = vmul.f32 %v7780_v11, %v1200_v50  ;;  %v1201_v25 = vadd.f32 -1.4531521, %v1193_v16  ;;  %v1325_v51 = vadd.f32 1.0, %v1309_v53  ;;  %v1262_v39 = vsub.f32 0.0, %v7701_v2 }
 0x239   :  { %v1207_v17 = vmul.f32 %v7800_v49, %v1199_v6  ;;  %v1331_v60 = vmul.f32 %v1323_v38, %v1315_v47  ;;  %v1264_v4 = vsub.f32 0.0, %v7707_v61  ;;  %v1263_v53 = vsub.f32 0.0, %v7735_v59 }
 0x23a   :  { %v1216_v57 = vadd.f32 1.4214138, %v1208_v40  ;;  %v1209_v56 = vmul.f32 %v7802_v33, %v1201_v25  ;;  %v1333_v14 = vmul.f32 %v1325_v51, %v1317_v20  ;;  %v1270_v31 = vmul.f32 %v1262_v39, %v7701_v2 }
 0x23b   :  { %v1271_v2 = vmul.f32 %v1263_v53, %v7735_v59  ;;  %vm1142_vm4 = vcmp.ge.f32.partialorder %v7634_v13, 0.0  ;;  %vm1144_vm5 = vcmp.ge.f32.partialorder %v7637_v3, 0.0  ;;  %vm1143_vm6 = vcmp.ge.f32.partialorder %v7704_v63, 0.0 }
 0x23c   :  { %v1224_v22 = vmul.f32 %v7780_v11, %v1216_v57  ;;  %vm1145_vm7 = vcmp.ge.f32.partialorder %v7710_v45, 0.0 }
 0x23d   :  { %v1284_v25 = vmul.f32 1.442695, %v1271_v2 }
 0x240   :  { %v2852_v1 = vpop.f32.mrf.mxu0 }
 0x241   :  { %v2853_v34 = vadd.f32 %v2852_v1, %v7797_v48  ;;  %v1206_v1 = vmul.f32 %v7769_v0, %v1198_v41 }
 0x243   :  { %v1214_v5 = vadd.f32 1.4214138, %v1206_v1  ;;  %v1265_v1 = vsub.f32 0.0, %v7739_v42 }
 0x245   :  { %v1273_v38 = vmul.f32 %v1265_v1, %v7739_v42 }
 0x246   :  { %v2890_v21 = vpop.f32.mrf.mxu2 }
 0x247   :  { %v2891_v28 = vadd.f32 %v2890_v21, %v7813_v54  ;;  %v4263_v21 = vld [vmem:[%s7929_s7 + $0x84] sm:$0xf] }
 0x248   :  { %v2854_v23 = vpop.f32.mrf.mxu0  ;;  %v4030_v41 = vor.u32 %v4263_v21, %v4027_v55  ;;  %v1152_v55 = vsel %vm1144_vm5, 1.0, %v4320_v37 }
 0x249   :  { %v2855_v9 = vadd.f32 %v2854_v23, %v7797_v48  ;;  %v1222_v23 = vmul.f32 %v7769_v0, %v1214_v5 }
 0x24a   :  { %3193 = vmatpush.bf16.msrb.mxu3 %v4030_v41 }
 0x24b   :  { %v1230_v47 = vadd.f32 -0.28449672, %v1222_v23 }
 0x24d   :  { %v1238_v20 = vmul.f32 %v7769_v0, %v1230_v47 }
 0x24e   :  { %v2892_v43 = vpop.f32.mrf.mxu2 }
 0x257   :  { %v2871_v8 = vpop.f32.mrf.mxu1 }
 0x258   :  { %v2872_v12 = vadd.f32 %v2871_v8, %v2853_v34  ;;  %v2893_v8 = vadd.f32 %v2892_v43, %v7813_v54  ;;  %v4264_v34 = vld [vmem:[%s7929_s7 + $0x84] sm:$0xf0] }
 0x259   :  { %v4026_v50 = vor.u32 %v4264_v34, %v4025_v18 }
 0x25a   :  { %v2919_v46 = vmul.f32 %v2872_v12, %v1330_v62  ;;  %v1217_v12 = vadd.f32 1.4214138, %v1209_v56 }
 0x25b   :  { %3155 = vmatpush.bf16.msrb.mxu1 %v4026_v50 }
 0x25d   :  { %v2909_v32 = vpop.f32.mrf.mxu3 }
 0x25e   :  { %v2910_v36 = vadd.f32 %v2909_v32, %v2891_v28  ;;  %v1215_v32 = vadd.f32 1.4214138, %v1207_v17 }
 0x25f   :  { %v2873_v30 = vpop.f32.mrf.mxu1 }
 0x260   :  { %v2874_v58 = vadd.f32 %v2873_v30, %v2855_v9  ;;  %v2920_v35 = vmul.f32 %v2910_v36, %v1331_v60  ;;  %v1272_v9 = vmul.f32 %v1264_v4, %v7707_v61  ;;  %v1232_v30 = vadd.f32 -0.28449672, %v1224_v22 }
 0x261   :  { %v1223_v62 = vmul.f32 %v7800_v49, %v1215_v32  ;;  %v1320_v22 = vmul.f32 0.5, %v7625_v19 }
 0x262   :  { %v2921_v27 = vmul.f32 %v2874_v58, %v1332_v10  ;;  %v1282_v10 = vmul.f32 1.442695, %v1270_v31  ;;  %v1225_v58 = vmul.f32 %v7802_v33, %v1217_v12  ;;  %v1286_v40 = vmul.f32 1.442695, %v1272_v9 }
 0x263   :  { %v1240_v61 = vmul.f32 %v7780_v11, %v1232_v30  ;;  %v1231_v43 = vadd.f32 -0.28449672, %v1223_v62 }
 0x264   :  { %v2927_v52 = vpack.c.bf16 %v2921_v27, %v2919_v46  ;;  %4304 = vpow2.f32 %v1282_v10  ;;  %v1233_v6 = vadd.f32 -0.28449672, %v1225_v58  ;;  %v1246_v46 = vadd.f32 0.2548296, %v1238_v20 }
 0x265   :  { %v2911_v24 = vpop.f32.mrf.mxu3  ;;  %4306 = vpow2.f32 %v1286_v40  ;;  %v1248_v28 = vadd.f32 0.2548296, %v1240_v61  ;;  %v1288_v27 = vmul.f32 1.442695, %v1273_v38  ;;  %v1239_v51 = vmul.f32 %v7800_v49, %v1231_v43 }
 0x266   :  { %v2912_v29 = vadd.f32 %v2911_v24, %v2893_v8  ;;  %3137 = vmatmul.bf16.vlgmr.msrb.gmra.mxu0 %v2927_v52  ;;  %3175 = vmatmul.bf16.vlgmr.msrb.gmra.mxu2 %v2927_v52  ;;  %v1241_v5 = vmul.f32 %v7802_v33, %v1233_v6  ;;  %4308 = vpow2.f32 %v1284_v25  ;;  %v1254_v59 = vmul.f32 %v7769_v0, %v1246_v46 }
 0x267   :  { %v1256_v52 = vmul.f32 %v7780_v11, %v1248_v28  ;;  %4310 = vpow2.f32 %v1288_v27  ;;  %v1247_v42 = vadd.f32 0.2548296, %v1239_v51  ;;  %v1150_v11 = vsel %vm1142_vm4, 1.0, %v4320_v37  ;;  %v2963_v27 = vld [vmem:[%s7931_s8] sm:$0x3] }
 0x268   :  { %v2922_v15 = vmul.f32 %v2912_v29, %v1333_v14  ;;  %v1249_v57 = vadd.f32 0.2548296, %v1241_v5  ;;  %v2965_v5 = vperm.slane %v2963_v27, 0 }
 0x269   :  { %v1255_v56 = vmul.f32 %v7800_v49, %v1247_v42  ;;  %v4312_v42 = vld [vmem:[%s7924_s0] sm:$0xff] }
 0x26a   :  { %v2928_v16 = vpack.c.bf16 %v2922_v15, %v2920_v35  ;;  %v4305_v36 = vpop.eup %4304  ;;  %v1257_v14 = vmul.f32 %v7802_v33, %v1249_v57  ;;  %v1151_v33 = vsel %vm1143_vm6, 1.0, %v4320_v37  ;;  %v1318_v35 = vmul.f32 0.5, %v7622_v44 }
 0x26b   :  { %v4307_v8 = vpop.eup %4306  ;;  %v1294_v39 = vmul.f32 %v4305_v36, %v1254_v59  ;;  %v1153_v15 = vsel %vm1145_vm7, 1.0, %v4320_v37  ;;  %v1319_v44 = vmul.f32 0.5, %v7667_v26  ;;  %v1321_v37 = vmul.f32 0.5, %v7679_v7 }
 0x26c   :  { %3194 = vmatmul.bf16.vlgmr.msrb.gmra.mxu3 %v2928_v16  ;;  %3156 = vmatmul.bf16.vlgmr.msrb.gmra.mxu1 %v2928_v16  ;;  %v1296_v24 = vmul.f32 %v4307_v8, %v1256_v52  ;;  %v4309_v60 = vpop.eup %4308  ;;  %v2966_v52 = vperm.slane %v2963_v27, 1 }
 0x26d   :  { %v4311_v29 = vpop.eup %4310  ;;  %v1302_v0 = vsub.f32 1.0, %v1294_v39  ;;  %v1295_v18 = vmul.f32 %v4309_v60, %v1255_v56 }
 0x26e   :  { %v1304_v21 = vsub.f32 1.0, %v1296_v24  ;;  %v1297_v4 = vmul.f32 %v4311_v29, %v1257_v14  ;;  %v4313_v14 = vld [vmem:[%s7924_s0 + $0x8] sm:$0xff] }
 0x26f   :  { %v1310_v13 = vmul.f32 %v1302_v0, %v1150_v11  ;;  %v1303_v3 = vsub.f32 1.0, %v1295_v18 }
 0x270   :  { %v1312_v41 = vmul.f32 %v1304_v21, %v1152_v55  ;;  %v1305_v34 = vsub.f32 1.0, %v1297_v4  ;;  %v4314_v55 = vld [vmem:[%s7924_s0 + $0x10] sm:$0xff] }
 0x271   :  { %v1326_v63 = vadd.f32 1.0, %v1310_v13  ;;  %v1311_v16 = vmul.f32 %v1303_v3, %v1151_v33  ;;  %v4315_v13 = vld [vmem:[%s7924_s0 + $0x18] sm:$0xff] }
 0x272   :  { %v1328_v31 = vadd.f32 1.0, %v1312_v41  ;;  %v1313_v53 = vmul.f32 %v1305_v34, %v1153_v15 }
 0x273   :  { %v1334_v30 = vmul.f32 %v1326_v63, %v1318_v35  ;;  %v1327_v10 = vadd.f32 1.0, %v1311_v16 }
 0x274   :  { %v1336_v1 = vmul.f32 %v1328_v31, %v1320_v22  ;;  %v1329_v20 = vadd.f32 1.0, %v1313_v53 }
 0x275   :  { %v1335_v6 = vmul.f32 %v1327_v10, %v1319_v44 }
 0x276   :  { %v1337_v25 = vmul.f32 %v1329_v20, %v1321_v37 }
 0x27c   :  { %v2857_v17 = vpop.f32.mrf.mxu0 }
 0x27d   :  { %v2858_v32 = vadd.f32 %v2857_v17, %v7797_v48 }
 0x282   :  { %v2895_v49 = vpop.f32.mrf.mxu2 }
 0x283   :  { %v2896_v40 = vadd.f32 %v2895_v49, %v7813_v54 }
 0x284   :  { %v2859_v50 = vpop.f32.mrf.mxu0 }
 0x285   :  { %v2860_v9 = vadd.f32 %v2859_v50, %v7797_v48  ;;  %v4316_v50 = vld [vmem:[%s7924_s0 + $0x20] sm:$0xff] }
 0x28a   :  { %v2897_v19 = vpop.f32.mrf.mxu2 }
 0x28b   :  { %v2898_v38 = vadd.f32 %v2897_v19, %v7813_v54  ;;  %v4319_v19 = vld [vmem:[%s7924_s0 + $0x38] sm:$0xff] }
 0x28e   :  { %v2876_v23 = vpop.f32.mrf.mxu1 }
 0x28f   :  { %v2877_v45 = vadd.f32 %v2876_v23, %v2858_v32 }
 0x291   :  { %v2923_v58 = vmul.f32 %v2877_v45, %v1334_v30 }
 0x294   :  { %v2914_v12 = vpop.f32.mrf.mxu3 }
 0x295   :  { %v2915_v61 = vadd.f32 %v2914_v12, %v2896_v40 }
 0x296   :  { %v2878_v47 = vpop.f32.mrf.mxu1 }
 0x297   :  { %v2879_v62 = vadd.f32 %v2878_v47, %v2860_v9  ;;  %v2924_v26 = vmul.f32 %v2915_v61, %v1335_v6  ;;  %v4317_v9 = vld [vmem:[%s7924_s0 + $0x28] sm:$0xff] }
 0x299   :  { %v2925_v2 = vmul.f32 %v2879_v62, %v1336_v1  ;;  %v4318_v1 = vld [vmem:[%s7924_s0 + $0x30] sm:$0xff] }
 0x29b   :  { %v2929_v48 = vpack.c.bf16 %v2925_v2, %v2923_v58 }
 0x29c   :  { %v2916_v43 = vpop.f32.mrf.mxu3 }
 0x29d   :  { %v2917_v46 = vadd.f32 %v2916_v43, %v2898_v38  ;;  %3142 = vmatmul.bf16.gmra.mxu0 %v2929_v48  ;;  %3180 = vmatmul.bf16.gmra.mxu2 %v2929_v48 }
 0x29f   :  { %v2926_v28 = vmul.f32 %v2917_v46, %v1337_v25 }
 0x2a1   :  { %v2930_v7 = vpack.c.bf16 %v2926_v28, %v2924_v26 }
 0x2a3   :  { %3161 = vmatmul.bf16.gmra.mxu1 %v2930_v7  ;;  %3199 = vmatmul.bf16.gmra.mxu3 %v2930_v7 }
 0x2e3   :  { %v3138_v51 = vpop.f32.mrf.mxu0 }
 0x2e4   :  { %v3139_v36 = vadd.f32 %v3138_v51, %v2965_v5 }
 0x2e9   :  { %v3176_v54 = vpop.f32.mrf.mxu2  ;;  %v3157_v59 = vpop.f32.mrf.mxu1 }
 0x2ea   :  { %v3158_v8 = vadd.f32 %v3157_v59, %v3139_v36  ;;  %v3177_v39 = vadd.f32 %v3176_v54, %v2966_v52 }
 0x2eb   :  { %v3140_v24 = vpop.f32.mrf.mxu0 }
 0x2ec   :  { %v3205_v57 = vadd.f32 %v4312_v42, %v3158_v8  ;;  %v3141_v60 = vadd.f32 %v3140_v24, %v2965_v5 }
 0x2ee   :  { %3213 = vst [vmem:[%s7932_s9] sm:$0xff] %v3205_v57 }
 0x2ef   :  { %v3195_v17 = vpop.f32.mrf.mxu3 }
 0x2f0   :  { %v3196_v56 = vadd.f32 %v3195_v17, %v3177_v39 }
 0x2f1   :  { %v3159_v0 = vpop.f32.mrf.mxu1  ;;  %v3178_v11 = vpop.f32.mrf.mxu2 }
 0x2f2   :  { %v3206_v29 = vadd.f32 %v4313_v14, %v3196_v56  ;;  %v3160_v21 = vadd.f32 %v3159_v0, %v3141_v60  ;;  %v3179_v4 = vadd.f32 %v3178_v11, %v2966_v52 }
 0x2f4   :  { %3214 = vst [vmem:[%s7932_s9 + $0x8] sm:$0xff] %v3206_v29  ;;  %v3207_v18 = vadd.f32 %v4314_v55, %v3160_v21 }
 0x2f6   :  { %3215 = vst [vmem:[%s7932_s9 + $0x10] sm:$0xff] %v3207_v18 }
 0x2f7   :  { %v3197_v23 = vpop.f32.mrf.mxu3 }
 0x2f8   :  { %v3198_v49 = vadd.f32 %v3197_v23, %v3179_v4 }
 0x2fa   :  { %v3208_v41 = vadd.f32 %v4315_v13, %v3198_v49 }
 0x2fc   :  { %3216 = vst [vmem:[%s7932_s9 + $0x18] sm:$0xff] %v3208_v41 }
 0x31a   :  { %v3143_v3 = vpop.f32.mrf.mxu0 }
 0x31b   :  { %v3144_v33 = vadd.f32 %v3143_v3, %v2965_v5 }
 0x320   :  { %v3162_v34 = vpop.f32.mrf.mxu1  ;;  %v3181_v35 = vpop.f32.mrf.mxu2 }
 0x321   :  { %v3163_v15 = vadd.f32 %v3162_v34, %v3144_v33  ;;  %v3182_v63 = vadd.f32 %v3181_v35, %v2966_v52 }
 0x322   :  { %v3145_v32 = vpop.f32.mrf.mxu0 }
 0x323   :  { %v3209_v22 = vadd.f32 %v4316_v50, %v3163_v15  ;;  %v3146_v16 = vadd.f32 %v3145_v32, %v2965_v5 }
 0x325   :  { %3217 = vst [vmem:[%s7932_s9 + $0x20] sm:$0xff] %v3209_v22 }
 0x326   :  { %v3200_v31 = vpop.f32.mrf.mxu3 }
 0x327   :  { %v3201_v12 = vadd.f32 %v3200_v31, %v3182_v63 }
 0x328   :  { %v3164_v45 = vpop.f32.mrf.mxu1  ;;  %v3183_v30 = vpop.f32.mrf.mxu2 }
 0x329   :  { %v3210_v53 = vadd.f32 %v4317_v9, %v3201_v12  ;;  %v3165_v47 = vadd.f32 %v3164_v45, %v3146_v16  ;;  %v3184_v44 = vadd.f32 %v3183_v30, %v2966_v52 }
 0x32b   :  { %3218 = vst [vmem:[%s7932_s9 + $0x28] sm:$0xff] %v3210_v53  ;;  %v3211_v62 = vadd.f32 %v4318_v1, %v3165_v47 }
 0x32d   :  { %3219 = vst [vmem:[%s7932_s9 + $0x30] sm:$0xff] %v3211_v62 }
 0x32e   :  { %v3202_v37 = vpop.f32.mrf.mxu3 }
 0x32f   :  { %v3203_v10 = vadd.f32 %v3202_v37, %v3184_v44 }
 0x331   :  { %v3212_v58 = vadd.f32 %v4319_v19, %v3203_v10 }
 0x333   :  { %3220 = vst [vmem:[%s7932_s9 + $0x38] sm:$0xff] %v3212_v58 }

</bundles_post_ra>
